<compile_context>
chip_gen: v5e
topology: v5e:2x2
jax: 0.10.0
libtpu: 0.0.40
codegen_flags: <defaults>
</compile_context>

<pallas_src>
import functools

import jax
import jax.numpy as jnp
from jax import lax
from jax.experimental import pallas as pl
from jax.experimental.pallas import tpu as pltpu

EPS = 1e-5
VMEM_LIMIT = 64 * 1024 * 1024


# --------------------------------------------------------------------------
# Kernels
# --------------------------------------------------------------------------

def conv1_kernel(x_ref, w1_ref, h1_ref, st1_ref):
    """1x1 conv (matmul) + per-block BN1 partial stats."""
    xb = x_ref[...].astype(jnp.bfloat16)
    h1 = jnp.dot(xb, w1_ref[...], preferred_element_type=jnp.float32)
    h1_ref[...] = h1
    st1_ref[0] = jnp.concatenate(
        [jnp.sum(h1, axis=0, keepdims=True),
         jnp.sum(h1 * h1, axis=0, keepdims=True)], axis=0)


def conv2_kernel(h1_ref, s1_ref, t1_ref, w2_ref, h2_ref, st2_ref, patch_ref):
    """bn1(scale/shift)+relu, 3x3 conv via W-im2col, + per-image BN2 partial stats.

    h1_ref : (1, H, W, C) f32     s1/t1 : (1, C) f32 folded BN1 scale/shift
    w2_ref : (3, 3C, C)  bf16     rows of w2_ref[ky] are [kx*C + cin]
    h2_ref : (1, H, W, C) f32     st2_ref : (1, 2, C) f32
    patch_ref : VMEM scratch (H+2, W, 3C) bf16 (H-padded im2col patch)
    """
    _, H, W, C = h1_ref.shape
    C3 = 3 * C

    # BN1 as folded scale/shift (one fused mul+add), then ReLU, then bf16.
    a1 = jnp.maximum(h1_ref[0] * s1_ref[...] + t1_ref[...], 0.0)
    a1 = a1.astype(jnp.bfloat16)                                  # (H, W, C)

    # W-shifted taps (kx=0 reads w-1, kx=2 reads w+1), zero outside the image.
    zcol = jnp.zeros((H, 1, C), jnp.bfloat16)
    left = jnp.concatenate([zcol, a1[:, :W - 1, :]], axis=1)      # value at w-1
    right = jnp.concatenate([a1[:, 1:, :], zcol], axis=1)         # value at w+1
    patch = jnp.concatenate([left, a1, right], axis=-1)           # (H, W, 3C)

    # H-padded patch: only the two halo rows are zeroed, interior overwritten.
    zrow = jnp.zeros((1, W, C3), jnp.bfloat16)
    patch_ref[0:1] = zrow
    patch_ref[H + 1:H + 2] = zrow
    patch_ref[1:H + 1] = patch

    # 3 matmuls with K = 3C; slices along the leading (untiled) axis are
    # layout-aligned.  Accumulator initialised by the ky=0 matmul.
    acc = jnp.dot(patch_ref[0:H].reshape(H * W, C3), w2_ref[0],
                  preferred_element_type=jnp.float32)
    for ky in (1, 2):
        acc = acc + jnp.dot(patch_ref[ky:ky + H].reshape(H * W, C3), w2_ref[ky],
                            preferred_element_type=jnp.float32)

    h2_ref[0] = acc.reshape(H, W, C)
    st2_ref[0] = jnp.concatenate(
        [jnp.sum(acc, axis=0, keepdims=True),
         jnp.sum(acc * acc, axis=0, keepdims=True)], axis=0)


def conv3_kernel(h2_ref, s2_ref, t2_ref, w3_ref, h3_ref, st3_ref):
    """bn2(scale/shift)+relu, 1x1 conv, + per-block BN3 partial stats."""
    a2 = jnp.maximum(h2_ref[...] * s2_ref[...] + t2_ref[...], 0.0)
    h3 = jnp.dot(a2.astype(jnp.bfloat16), w3_ref[...],
                 preferred_element_type=jnp.float32)
    h3_ref[...] = h3
    st3_ref[0] = jnp.concatenate(
        [jnp.sum(h3, axis=0, keepdims=True),
         jnp.sum(h3 * h3, axis=0, keepdims=True)], axis=0)


def residual_kernel(h3_ref, x_ref, s3_ref, t3_ref, o_ref):
    """bn3(scale/shift) + identity residual + relu."""
    o_ref[...] = jnp.maximum(
        h3_ref[...] * s3_ref[...] + t3_ref[...] + x_ref[...], 0.0)


# --------------------------------------------------------------------------
# Wrapper
# --------------------------------------------------------------------------

def _pick_block_rows(rows, target):
    if rows <= target:
        return rows
    for cand in (target, 256, 128, 64, 32, 16, 8):
        if cand % 8 == 0 and rows % cand == 0:
            return cand
    return rows  # single block (block == full dim is always legal)


def _fold_bn(partial_stats, count, gamma, beta):
    """Combine per-block (sum, sumsq) into per-channel scale/shift."""
    s = jnp.sum(partial_stats[:, 0, :], axis=0, keepdims=True)    # (1, C)
    ss = jnp.sum(partial_stats[:, 1, :], axis=0, keepdims=True)   # (1, C)
    mean = s / count
    var = ss / count - mean * mean
    scale = gamma * lax.rsqrt(var + EPS)
    shift = beta - mean * scale
    return scale.astype(jnp.float32), shift.astype(jnp.float32)


def bottleneck_forward(x_nchw, params, *, block_rows=512):
    """x_nchw: (N, 4C, H, W) float32.  Returns (N, 4C, H, W) float32."""
    w1, g1, b1, w2, g2, b2, w3, g3, b3 = params
    N, Cin, H, W = x_nchw.shape
    C = w1.shape[1]
    assert Cin == 4 * C, "identity shortcut requires in_channels == 4*out_channels"

    R = N * H * W
    bm = _pick_block_rows(R, block_rows)
    nb = R // bm

    # Glue: NCHW -> NHWC -> (rows, channels).
    x_flat = jnp.transpose(x_nchw, (0, 2, 3, 1)).reshape(R, Cin).astype(jnp.float32)

    # Weights as bf16 MXU operands; 3x3 taps packed per ky as (3C, C).
    w1b = w1.astype(jnp.bfloat16)
    w3b = w3.astype(jnp.bfloat16)
    w2p = w2.reshape(3, 3, C, C).reshape(3, 3 * C, C).astype(jnp.bfloat16)

    cparams = pltpu.CompilerParams(dimension_semantics=("parallel",),
                                   vmem_limit_bytes=VMEM_LIMIT)

    # ---- pass 1: conv1 (1x1) + BN1 partial stats --------------------------
    h1, st1 = pl.pallas_call(
        conv1_kernel,
        grid=(nb,),
        in_specs=[pl.BlockSpec((bm, Cin), lambda i: (i, 0)),
                  pl.BlockSpec((Cin, C), lambda i: (0, 0))],
        out_specs=[pl.BlockSpec((bm, C), lambda i: (i, 0)),
                   pl.BlockSpec((1, 2, C), lambda i: (i, 0, 0))],
        out_shape=[jax.ShapeDtypeStruct((R, C), jnp.float32),
                   jax.ShapeDtypeStruct((nb, 2, C), jnp.float32)],
        compiler_params=cparams,
    )(x_flat, w1b)
    s1, t1 = _fold_bn(st1, R, g1, b1)

    # ---- pass 2: bn1+relu -> conv2 (3x3) + BN2 partial stats --------------
    h1_4d = h1.reshape(N, H, W, C)
    h2, st2 = pl.pallas_call(
        conv2_kernel,
        grid=(N,),
        in_specs=[pl.BlockSpec((1, H, W, C), lambda n: (n, 0, 0, 0)),
                  pl.BlockSpec((1, C), lambda n: (0, 0)),
                  pl.BlockSpec((1, C), lambda n: (0, 0)),
                  pl.BlockSpec((3, 3 * C, C), lambda n: (0, 0, 0))],
        out_specs=[pl.BlockSpec((1, H, W, C), lambda n: (n, 0, 0, 0)),
                   pl.BlockSpec((1, 2, C), lambda n: (n, 0, 0))],
        out_shape=[jax.ShapeDtypeStruct((N, H, W, C), jnp.float32),
                   jax.ShapeDtypeStruct((N, 2, C), jnp.float32)],
        scratch_shapes=[pltpu.VMEM((H + 2, W, 3 * C), jnp.bfloat16)],
        compiler_params=cparams,
    )(h1_4d, s1, t1, w2p)
    s2, t2 = _fold_bn(st2, R, g2, b2)

    # ---- pass 3: bn2+relu -> conv3 (1x1) + BN3 partial stats --------------
    h2_flat = h2.reshape(R, C)
    h3, st3 = pl.pallas_call(
        conv3_kernel,
        grid=(nb,),
        in_specs=[pl.BlockSpec((bm, C), lambda i: (i, 0)),
                  pl.BlockSpec((1, C), lambda i: (0, 0)),
                  pl.BlockSpec((1, C), lambda i: (0, 0)),
                  pl.BlockSpec((C, Cin), lambda i: (0, 0))],
        out_specs=[pl.BlockSpec((bm, Cin), lambda i: (i, 0)),
                   pl.BlockSpec((1, 2, Cin), lambda i: (i, 0, 0))],
        out_shape=[jax.ShapeDtypeStruct((R, Cin), jnp.float32),
                   jax.ShapeDtypeStruct((nb, 2, Cin), jnp.float32)],
        compiler_params=cparams,
    )(h2_flat, s2, t2, w3b)
    s3, t3 = _fold_bn(st3, R, g3, b3)

    # ---- pass 4: bn3 + residual add + relu (in-place over h3) -------------
    out_flat = pl.pallas_call(
        residual_kernel,
        grid=(nb,),
        in_specs=[pl.BlockSpec((bm, Cin), lambda i: (i, 0)),
                  pl.BlockSpec((bm, Cin), lambda i: (i, 0)),
                  pl.BlockSpec((1, Cin), lambda i: (0, 0)),
                  pl.BlockSpec((1, Cin), lambda i: (0, 0))],
        out_specs=pl.BlockSpec((bm, Cin), lambda i: (i, 0)),
        out_shape=jax.ShapeDtypeStruct((R, Cin), jnp.float32),
        input_output_aliases={0: 0},
        compiler_params=cparams,
    )(h3, x_flat, s3, t3)

    return jnp.transpose(out_flat.reshape(N, H, W, Cin), (0, 3, 1, 2))


# --------------------------------------------------------------------------
# Params + precision-matched pure-JAX reference
# --------------------------------------------------------------------------

def make_params(key, out_channels, in_channels):
    C, Cin = out_channels, in_channels
    ks = jax.random.split(key, 9)
    w1 = 0.1 * jax.random.normal(ks[0], (Cin, C), jnp.float32)
    w2 = 0.1 * jax.random.normal(ks[1], (9, C, C), jnp.float32)      # [ky*3+kx][cin,cout]
    w3 = 0.1 * jax.random.normal(ks[2], (C, 4 * C), jnp.float32)
    g1 = 1.0 + 0.1 * jax.random.normal(ks[3], (1, C), jnp.float32)
    b1 = 0.1 * jax.random.normal(ks[4], (1, C), jnp.float32)
    g2 = 1.0 + 0.1 * jax.random.normal(ks[5], (1, C), jnp.float32)
    b2 = 0.1 * jax.random.normal(ks[6], (1, C), jnp.float32)
    g3 = 1.0 + 0.1 * jax.random.normal(ks[7], (1, 4 * C), jnp.float32)
    b3 = 0.1 * jax.random.normal(ks[8], (1, 4 * C), jnp.float32)
    return (w1, g1, b1, w2, g2, b2, w3, g3, b3)


def _bn_ref(h, g, b):
    mean = jnp.mean(h, axis=(0, 1, 2), keepdims=True)
    var = jnp.mean(h * h, axis=(0, 1, 2), keepdims=True) - mean * mean
    scale = g.reshape(1, 1, 1, -1) * lax.rsqrt(var + EPS)
    shift = b.reshape(1, 1, 1, -1) - mean * scale
    return h * scale + shift


def reference_forward(x_nchw, params):
    """Pure-JAX reference mirroring the module (bf16 matmul operands, f32 accum)."""
    w1, g1, b1, w2, g2, b2, w3, g3, b3 = params
    C = w1.shape[1]
    bf = jnp.bfloat16
    x = jnp.transpose(x_nchw, (0, 2, 3, 1)).astype(jnp.float32)      # NHWC

    h = jnp.einsum('nhwi,io->nhwo', x.astype(bf), w1.astype(bf),
                   preferred_element_type=jnp.float32)
    h = jax.nn.relu(_bn_ref(h, g1, b1))
    w2_hwio = w2.reshape(3, 3, C, C)
    h = lax.conv_general_dilated(h.astype(bf), w2_hwio.astype(bf),
                                 window_strides=(1, 1), padding='SAME',
                                 dimension_numbers=('NHWC', 'HWIO', 'NHWC'),
                                 preferred_element_type=jnp.float32)
    h = jax.nn.relu(_bn_ref(h, g2, b2))
    h = jnp.einsum('nhwi,io->nhwo', h.astype(bf), w3.astype(bf),
                   preferred_element_type=jnp.float32)
    h = _bn_ref(h, g3, b3)
    out = jax.nn.relu(h + x)
    return jnp.transpose(out, (0, 3, 1, 2))


# --------------------------------------------------------------------------
# Test
# --------------------------------------------------------------------------

if __name__ == "__main__":
    key = jax.random.PRNGKey(0)
    k_x, k_p = jax.random.split(key)

    out_channels = 32
    in_channels = out_channels * 4          # BottleNeck.expansion = 4 -> 128 (lane-dense)
    N, H, W = 2, 16, 16

    x = jax.random.normal(k_x, (N, in_channels, H, W), jnp.float32)   # NCHW like PyTorch
    params = make_params(k_p, out_channels, in_channels)

    fwd = jax.jit(functools.partial(bottleneck_forward, block_rows=128))  # 4 row blocks
    out = jax.block_until_ready(fwd(x, params))

    ref = reference_forward(x, params)
    assert out.shape == (N, in_channels, H, W)
    assert jnp.allclose(out, ref, rtol=1e-2, atol=1e-2), (
        f"max abs diff {float(jnp.max(jnp.abs(out - ref)))}")

    print("KERNEL_OK")
</pallas_src>

<mosaic_0001>
module attributes {stable_mosaic.version = 11 : i64} {
  func.func @conv1_kernel(%arg0: i32, %arg1: memref<128x128xf32, #tpu.memory_space<vmem>>, %arg2: memref<128x32xbf16, #tpu.memory_space<vmem>>, %arg3: memref<128x32xf32, #tpu.memory_space<vmem>>, %arg4: memref<1x2x32xf32, #tpu.memory_space<vmem>>) attributes {dimension_semantics = [#tpu.dimension_semantics<parallel>], iteration_bounds = array<i64: 4>, scalar_prefetch = 0 : i64, scratch_operands = 0 : i64, tpu.core_type = #tpu.core_type<tc>, window_params = [{transform_indices = @transform_0, window_bounds = array<i64: 128, 128>}, {pipeline_mode = #tpu.pipeline_mode<synchronous>, transform_indices = @transform_1, window_bounds = array<i64: 128, 32>}, {transform_indices = @transform_2, window_bounds = array<i64: 128, 32>}, {transform_indices = @transform_3, window_bounds = array<i64: 1, 2, 32>}]} {
    %c0 = arith.constant 0 : index
    %c0_0 = arith.constant 0 : index
    %0 = vector.load %arg1[%c0, %c0_0] : memref<128x128xf32, #tpu.memory_space<vmem>>, vector<128x128xf32>
    %1 = arith.truncf %0 : vector<128x128xf32> to vector<128x128xbf16>
    %c0_1 = arith.constant 0 : index
    %c0_2 = arith.constant 0 : index
    %2 = vector.load %arg2[%c0_1, %c0_2] : memref<128x32xbf16, #tpu.memory_space<vmem>>, vector<128x32xbf16>
    %cst = arith.constant dense<0.000000e+00> : vector<128x32xf32>
    %3 = tpu.matmul %1, %2, %cst {dimension_numbers = #tpu.dot_dimension_numbers<[1], [0], [0], [1], [0, 0, 1, 1], [], []>} : vector<128x128xbf16>, vector<128x32xbf16>, vector<128x32xf32> -> vector<128x32xf32>
    %c0_3 = arith.constant 0 : index
    %c0_4 = arith.constant 0 : index
    %4 = vector.load %arg3[%c0_3, %c0_4] : memref<128x32xf32, #tpu.memory_space<vmem>>, vector<128x32xf32>
    tpu.vector_store %arg3[%c0_3, %c0_4], %3 {strides = array<i32>} : memref<128x32xf32, #tpu.memory_space<vmem>>, vector<128x32xf32>,
    %cst_5 = arith.constant dense<0.000000e+00> : vector<32xf32>
    %5 = vector.multi_reduction <add>, %3, %cst_5 [0] : vector<128x32xf32> to vector<32xf32>
    %6 = vector.shape_cast %5 : vector<32xf32> to vector<1x32xf32>
    %7 = arith.mulf %3, %3 : vector<128x32xf32>
    %cst_6 = arith.constant dense<0.000000e+00> : vector<32xf32>
    %8 = vector.multi_reduction <add>, %7, %cst_6 [0] : vector<128x32xf32> to vector<32xf32>
    %9 = vector.shape_cast %8 : vector<32xf32> to vector<1x32xf32>
    %10 = tpu.concatenate %6, %9 in 0 : vector<1x32xf32>, vector<1x32xf32> -> vector<2x32xf32>
    %c0_7 = arith.constant 0 : index
    %c0_8 = arith.constant 0 : index
    %c0_9 = arith.constant 0 : index
    %11 = vector.load %arg4[%c0_7, %c0_8, %c0_9] : memref<1x2x32xf32, #tpu.memory_space<vmem>>, vector<1x2x32xf32>
    %12 = vector.shape_cast %11 : vector<1x2x32xf32> to vector<2x32xf32>
    %13 = vector.shape_cast %10 : vector<2x32xf32> to vector<1x2x32xf32>
    tpu.vector_store %arg4[%c0_7, %c0_8, %c0_9], %13 {strides = array<i32>} : memref<1x2x32xf32, #tpu.memory_space<vmem>>, vector<1x2x32xf32>,
    return
  }
  func.func @transform_0(%arg0: i32) -> (i32, i32) {
    %c0_i32 = arith.constant 0 : i32
    %c0_i32_0 = arith.constant 0 : i32
    return %arg0, %c0_i32 : i32, i32
  }
  func.func @transform_1(%arg0: i32) -> (i32, i32) {
    %c0_i32 = arith.constant 0 : i32
    %c0_i32_0 = arith.constant 0 : i32
    %c0_i32_1 = arith.constant 0 : i32
    return %c0_i32, %c0_i32_0 : i32, i32
  }
  func.func @transform_2(%arg0: i32) -> (i32, i32) {
    %c0_i32 = arith.constant 0 : i32
    %c0_i32_0 = arith.constant 0 : i32
    return %arg0, %c0_i32 : i32, i32
  }
  func.func @transform_3(%arg0: i32) -> (i32, i32, i32) {
    %c0_i32 = arith.constant 0 : i32
    %c0_i32_0 = arith.constant 0 : i32
    %c0_i32_1 = arith.constant 0 : i32
    return %arg0, %c0_i32, %c0_i32_0 : i32, i32, i32
  }
}

module attributes {stable_mosaic.version = 11 : i64} {
  func.func @conv2_kernel(%arg0: i32, %arg1: memref<1x16x16x32xf32, #tpu.memory_space<vmem>>, %arg2: memref<1x32xf32, #tpu.memory_space<vmem>>, %arg3: memref<1x32xf32, #tpu.memory_space<vmem>>, %arg4: memref<3x96x32xbf16, #tpu.memory_space<vmem>>, %arg5: memref<1x16x16x32xf32, #tpu.memory_space<vmem>>, %arg6: memref<1x2x32xf32, #tpu.memory_space<vmem>>, %arg7: memref<18x16x96xbf16, #tpu.memory_space<vmem>>) attributes {dimension_semantics = [#tpu.dimension_semantics<parallel>], iteration_bounds = array<i64: 2>, scalar_prefetch = 0 : i64, scratch_operands = 1 : i64, tpu.core_type = #tpu.core_type<tc>, window_params = [{transform_indices = @transform_0, window_bounds = array<i64: 1, 16, 16, 32>}, {pipeline_mode = #tpu.pipeline_mode<synchronous>, transform_indices = @transform_1, window_bounds = array<i64: 1, 32>}, {pipeline_mode = #tpu.pipeline_mode<synchronous>, transform_indices = @transform_2, window_bounds = array<i64: 1, 32>}, {pipeline_mode = #tpu.pipeline_mode<synchronous>, transform_indices = @transform_3, window_bounds = array<i64: 3, 96, 32>}, {transform_indices = @transform_4, window_bounds = array<i64: 1, 16, 16, 32>}, {transform_indices = @transform_5, window_bounds = array<i64: 1, 2, 32>}]} {
    %c0 = arith.constant 0 : index
    %c0_0 = arith.constant 0 : index
    %c0_1 = arith.constant 0 : index
    %c0_2 = arith.constant 0 : index
    %0 = vector.load %arg1[%c0, %c0_0, %c0_1, %c0_2] : memref<1x16x16x32xf32, #tpu.memory_space<vmem>>, vector<1x16x16x32xf32>
    %1 = vector.shape_cast %0 : vector<1x16x16x32xf32> to vector<16x16x32xf32>
    %c0_3 = arith.constant 0 : index
    %c0_4 = arith.constant 0 : index
    %2 = vector.load %arg2[%c0_3, %c0_4] : memref<1x32xf32, #tpu.memory_space<vmem>>, vector<1x32xf32>
    %3 = vector.shape_cast %2 : vector<1x32xf32> to vector<1x1x32xf32>
    %4 = vector.broadcast %3 : vector<1x1x32xf32> to vector<16x16x32xf32>
    %5 = arith.mulf %1, %4 : vector<16x16x32xf32>
    %c0_5 = arith.constant 0 : index
    %c0_6 = arith.constant 0 : index
    %6 = vector.load %arg3[%c0_5, %c0_6] : memref<1x32xf32, #tpu.memory_space<vmem>>, vector<1x32xf32>
    %7 = vector.shape_cast %6 : vector<1x32xf32> to vector<1x1x32xf32>
    %8 = vector.broadcast %7 : vector<1x1x32xf32> to vector<16x16x32xf32>
    %9 = arith.addf %5, %8 : vector<16x16x32xf32>
    %cst = arith.constant 0.000000e+00 : f32
    %10 = vector.broadcast %cst : f32 to vector<16x16x32xf32>
    %11 = arith.maximumf %9, %10 : vector<16x16x32xf32>
    %12 = arith.truncf %11 : vector<16x16x32xf32> to vector<16x16x32xbf16>
    %cst_7 = arith.constant 0.000000e+00 : bf16
    %13 = vector.broadcast %cst_7 : bf16 to vector<16x1x32xbf16>
    %14 = vector.extract_strided_slice %12 {offsets = [0, 0, 0], sizes = [16, 15, 32], strides = [1, 1, 1]} : vector<16x16x32xbf16> to vector<16x15x32xbf16>
    %15 = tpu.concatenate %13, %14 in 1 : vector<16x1x32xbf16>, vector<16x15x32xbf16> -> vector<16x16x32xbf16>
    %16 = vector.extract_strided_slice %12 {offsets = [0, 1, 0], sizes = [16, 15, 32], strides = [1, 1, 1]} : vector<16x16x32xbf16> to vector<16x15x32xbf16>
    %17 = tpu.concatenate %16, %13 in 1 : vector<16x15x32xbf16>, vector<16x1x32xbf16> -> vector<16x16x32xbf16>
    %18 = tpu.concatenate %15, %12, %17 in 2 : vector<16x16x32xbf16>, vector<16x16x32xbf16>, vector<16x16x32xbf16> -> vector<16x16x96xbf16>
    %cst_8 = arith.constant 0.000000e+00 : bf16
    %19 = vector.broadcast %cst_8 : bf16 to vector<1x16x96xbf16>
    %c0_9 = arith.constant 0 : index
    %c0_10 = arith.constant 0 : index
    %c0_11 = arith.constant 0 : index
    %20 = vector.load %arg7[%c0_9, %c0_10, %c0_11] : memref<18x16x96xbf16, #tpu.memory_space<vmem>>, vector<1x16x96xbf16>
    tpu.vector_store %arg7[%c0_9, %c0_10, %c0_11], %19 {strides = array<i32>} : memref<18x16x96xbf16, #tpu.memory_space<vmem>>, vector<1x16x96xbf16>,
    %c17 = arith.constant 17 : index
    %c0_12 = arith.constant 0 : index
    %c0_13 = arith.constant 0 : index
    %21 = vector.load %arg7[%c17, %c0_12, %c0_13] : memref<18x16x96xbf16, #tpu.memory_space<vmem>>, vector<1x16x96xbf16>
    tpu.vector_store %arg7[%c17, %c0_12, %c0_13], %19 {strides = array<i32>} : memref<18x16x96xbf16, #tpu.memory_space<vmem>>, vector<1x16x96xbf16>,
    %c1 = arith.constant 1 : index
    %c0_14 = arith.constant 0 : index
    %c0_15 = arith.constant 0 : index
    %22 = vector.load %arg7[%c1, %c0_14, %c0_15] : memref<18x16x96xbf16, #tpu.memory_space<vmem>>, vector<16x16x96xbf16>
    tpu.vector_store %arg7[%c1, %c0_14, %c0_15], %18 {strides = array<i32>} : memref<18x16x96xbf16, #tpu.memory_space<vmem>>, vector<16x16x96xbf16>,
    %c0_16 = arith.constant 0 : index
    %c0_17 = arith.constant 0 : index
    %c0_18 = arith.constant 0 : index
    %23 = vector.load %arg7[%c0_16, %c0_17, %c0_18] : memref<18x16x96xbf16, #tpu.memory_space<vmem>>, vector<16x16x96xbf16>
    %24 = vector.shape_cast %23 : vector<16x16x96xbf16> to vector<256x96xbf16>
    %c0_19 = arith.constant 0 : index
    %c0_20 = arith.constant 0 : index
    %c0_21 = arith.constant 0 : index
    %25 = vector.load %arg4[%c0_19, %c0_20, %c0_21] : memref<3x96x32xbf16, #tpu.memory_space<vmem>>, vector<1x96x32xbf16>
    %26 = vector.shape_cast %25 : vector<1x96x32xbf16> to vector<96x32xbf16>
    %cst_22 = arith.constant dense<0.000000e+00> : vector<256x32xf32>
    %27 = tpu.matmul %24, %26, %cst_22 {dimension_numbers = #tpu.dot_dimension_numbers<[1], [0], [0], [1], [0, 0, 1, 1], [], []>} : vector<256x96xbf16>, vector<96x32xbf16>, vector<256x32xf32> -> vector<256x32xf32>
    %c1_23 = arith.constant 1 : index
    %c0_24 = arith.constant 0 : index
    %c0_25 = arith.constant 0 : index
    %28 = vector.load %arg7[%c1_23, %c0_24, %c0_25] : memref<18x16x96xbf16, #tpu.memory_space<vmem>>, vector<16x16x96xbf16>
    %29 = vector.shape_cast %28 : vector<16x16x96xbf16> to vector<256x96xbf16>
    %c1_26 = arith.constant 1 : index
    %c0_27 = arith.constant 0 : index
    %c0_28 = arith.constant 0 : index
    %30 = vector.load %arg4[%c1_26, %c0_27, %c0_28] : memref<3x96x32xbf16, #tpu.memory_space<vmem>>, vector<1x96x32xbf16>
    %31 = vector.shape_cast %30 : vector<1x96x32xbf16> to vector<96x32xbf16>
    %cst_29 = arith.constant dense<0.000000e+00> : vector<256x32xf32>
    %32 = tpu.matmul %29, %31, %cst_29 {dimension_numbers = #tpu.dot_dimension_numbers<[1], [0], [0], [1], [0, 0, 1, 1], [], []>} : vector<256x96xbf16>, vector<96x32xbf16>, vector<256x32xf32> -> vector<256x32xf32>
    %33 = arith.addf %27, %32 : vector<256x32xf32>
    %c2 = arith.constant 2 : index
    %c0_30 = arith.constant 0 : index
    %c0_31 = arith.constant 0 : index
    %34 = vector.load %arg7[%c2, %c0_30, %c0_31] : memref<18x16x96xbf16, #tpu.memory_space<vmem>>, vector<16x16x96xbf16>
    %35 = vector.shape_cast %34 : vector<16x16x96xbf16> to vector<256x96xbf16>
    %c2_32 = arith.constant 2 : index
    %c0_33 = arith.constant 0 : index
    %c0_34 = arith.constant 0 : index
    %36 = vector.load %arg4[%c2_32, %c0_33, %c0_34] : memref<3x96x32xbf16, #tpu.memory_space<vmem>>, vector<1x96x32xbf16>
    %37 = vector.shape_cast %36 : vector<1x96x32xbf16> to vector<96x32xbf16>
    %cst_35 = arith.constant dense<0.000000e+00> : vector<256x32xf32>
    %38 = tpu.matmul %35, %37, %cst_35 {dimension_numbers = #tpu.dot_dimension_numbers<[1], [0], [0], [1], [0, 0, 1, 1], [], []>} : vector<256x96xbf16>, vector<96x32xbf16>, vector<256x32xf32> -> vector<256x32xf32>
    %39 = arith.addf %33, %38 : vector<256x32xf32>
    %40 = vector.shape_cast %39 : vector<256x32xf32> to vector<16x16x32xf32>
    %c0_36 = arith.constant 0 : index
    %c0_37 = arith.constant 0 : index
    %c0_38 = arith.constant 0 : index
    %c0_39 = arith.constant 0 : index
    %41 = vector.load %arg5[%c0_36, %c0_37, %c0_38, %c0_39] : memref<1x16x16x32xf32, #tpu.memory_space<vmem>>, vector<1x16x16x32xf32>
    %42 = vector.shape_cast %41 : vector<1x16x16x32xf32> to vector<16x16x32xf32>
    %43 = vector.shape_cast %40 : vector<16x16x32xf32> to vector<1x16x16x32xf32>
    tpu.vector_store %arg5[%c0_36, %c0_37, %c0_38, %c0_39], %43 {strides = array<i32>} : memref<1x16x16x32xf32, #tpu.memory_space<vmem>>, vector<1x16x16x32xf32>,
    %cst_40 = arith.constant dense<0.000000e+00> : vector<32xf32>
    %44 = vector.multi_reduction <add>, %39, %cst_40 [0] : vector<256x32xf32> to vector<32xf32>
    %45 = vector.shape_cast %44 : vector<32xf32> to vector<1x32xf32>
    %46 = arith.mulf %39, %39 : vector<256x32xf32>
    %cst_41 = arith.constant dense<0.000000e+00> : vector<32xf32>
    %47 = vector.multi_reduction <add>, %46, %cst_41 [0] : vector<256x32xf32> to vector<32xf32>
    %48 = vector.shape_cast %47 : vector<32xf32> to vector<1x32xf32>
    %49 = tpu.concatenate %45, %48 in 0 : vector<1x32xf32>, vector<1x32xf32> -> vector<2x32xf32>
    %c0_42 = arith.constant 0 : index
    %c0_43 = arith.constant 0 : index
    %c0_44 = arith.constant 0 : index
    %50 = vector.load %arg6[%c0_42, %c0_43, %c0_44] : memref<1x2x32xf32, #tpu.memory_space<vmem>>, vector<1x2x32xf32>
    %51 = vector.shape_cast %50 : vector<1x2x32xf32> to vector<2x32xf32>
    %52 = vector.shape_cast %49 : vector<2x32xf32> to vector<1x2x32xf32>
    tpu.vector_store %arg6[%c0_42, %c0_43, %c0_44], %52 {strides = array<i32>} : memref<1x2x32xf32, #tpu.memory_space<vmem>>, vector<1x2x32xf32>,
    return
  }
  func.func @transform_0(%arg0: i32) -> (i32, i32, i32, i32) {
    %c0_i32 = arith.constant 0 : i32
    %c0_i32_0 = arith.constant 0 : i32
    %c0_i32_1 = arith.constant 0 : i32
    %c0_i32_2 = arith.constant 0 : i32
    return %arg0, %c0_i32, %c0_i32_0, %c0_i32_1 : i32, i32, i32, i32
  }
  func.func @transform_1(%arg0: i32) -> (i32, i32) {
    %c0_i32 = arith.constant 0 : i32
    %c0_i32_0 = arith.constant 0 : i32
    %c0_i32_1 = arith.constant 0 : i32
    return %c0_i32, %c0_i32_0 : i32, i32
  }
  func.func @transform_2(%arg0: i32) -> (i32, i32) {
    %c0_i32 = arith.constant 0 : i32
    %c0_i32_0 = arith.constant 0 : i32
    %c0_i32_1 = arith.constant 0 : i32
    return %c0_i32, %c0_i32_0 : i32, i32
  }
  func.func @transform_3(%arg0: i32) -> (i32, i32, i32) {
    %c0_i32 = arith.constant 0 : i32
    %c0_i32_0 = arith.constant 0 : i32
    %c0_i32_1 = arith.constant 0 : i32
    %c0_i32_2 = arith.constant 0 : i32
    return %c0_i32, %c0_i32_0, %c0_i32_1 : i32, i32, i32
  }
  func.func @transform_4(%arg0: i32) -> (i32, i32, i32, i32) {
    %c0_i32 = arith.constant 0 : i32
    %c0_i32_0 = arith.constant 0 : i32
    %c0_i32_1 = arith.constant 0 : i32
    %c0_i32_2 = arith.constant 0 : i32
    return %arg0, %c0_i32, %c0_i32_0, %c0_i32_1 : i32, i32, i32, i32
  }
  func.func @transform_5(%arg0: i32) -> (i32, i32, i32) {
    %c0_i32 = arith.constant 0 : i32
    %c0_i32_0 = arith.constant 0 : i32
    %c0_i32_1 = arith.constant 0 : i32
    return %arg0, %c0_i32, %c0_i32_0 : i32, i32, i32
  }
}

module attributes {stable_mosaic.version = 11 : i64} {
  func.func @conv3_kernel(%arg0: i32, %arg1: memref<128x32xf32, #tpu.memory_space<vmem>>, %arg2: memref<1x32xf32, #tpu.memory_space<vmem>>, %arg3: memref<1x32xf32, #tpu.memory_space<vmem>>, %arg4: memref<32x128xbf16, #tpu.memory_space<vmem>>, %arg5: memref<128x128xf32, #tpu.memory_space<vmem>>, %arg6: memref<1x2x128xf32, #tpu.memory_space<vmem>>) attributes {dimension_semantics = [#tpu.dimension_semantics<parallel>], iteration_bounds = array<i64: 4>, scalar_prefetch = 0 : i64, scratch_operands = 0 : i64, tpu.core_type = #tpu.core_type<tc>, window_params = [{transform_indices = @transform_0, window_bounds = array<i64: 128, 32>}, {pipeline_mode = #tpu.pipeline_mode<synchronous>, transform_indices = @transform_1, window_bounds = array<i64: 1, 32>}, {pipeline_mode = #tpu.pipeline_mode<synchronous>, transform_indices = @transform_2, window_bounds = array<i64: 1, 32>}, {pipeline_mode = #tpu.pipeline_mode<synchronous>, transform_indices = @transform_3, window_bounds = array<i64: 32, 128>}, {transform_indices = @transform_4, window_bounds = array<i64: 128, 128>}, {transform_indices = @transform_5, window_bounds = array<i64: 1, 2, 128>}]} {
    %c0 = arith.constant 0 : index
    %c0_0 = arith.constant 0 : index
    %0 = vector.load %arg1[%c0, %c0_0] : memref<128x32xf32, #tpu.memory_space<vmem>>, vector<128x32xf32>
    %c0_1 = arith.constant 0 : index
    %c0_2 = arith.constant 0 : index
    %1 = vector.load %arg2[%c0_1, %c0_2] : memref<1x32xf32, #tpu.memory_space<vmem>>, vector<1x32xf32>
    %2 = vector.broadcast %1 : vector<1x32xf32> to vector<128x32xf32>
    %3 = arith.mulf %0, %2 : vector<128x32xf32>
    %c0_3 = arith.constant 0 : index
    %c0_4 = arith.constant 0 : index
    %4 = vector.load %arg3[%c0_3, %c0_4] : memref<1x32xf32, #tpu.memory_space<vmem>>, vector<1x32xf32>
    %5 = vector.broadcast %4 : vector<1x32xf32> to vector<128x32xf32>
    %6 = arith.addf %3, %5 : vector<128x32xf32>
    %cst = arith.constant 0.000000e+00 : f32
    %7 = vector.broadcast %cst : f32 to vector<128x32xf32>
    %8 = arith.maximumf %6, %7 : vector<128x32xf32>
    %9 = arith.truncf %8 : vector<128x32xf32> to vector<128x32xbf16>
    %c0_5 = arith.constant 0 : index
    %c0_6 = arith.constant 0 : index
    %10 = vector.load %arg4[%c0_5, %c0_6] : memref<32x128xbf16, #tpu.memory_space<vmem>>, vector<32x128xbf16>
    %cst_7 = arith.constant dense<0.000000e+00> : vector<128x128xf32>
    %11 = tpu.matmul %9, %10, %cst_7 {dimension_numbers = #tpu.dot_dimension_numbers<[1], [0], [0], [1], [0, 0, 1, 1], [], []>} : vector<128x32xbf16>, vector<32x128xbf16>, vector<128x128xf32> -> vector<128x128xf32>
    %c0_8 = arith.constant 0 : index
    %c0_9 = arith.constant 0 : index
    %12 = vector.load %arg5[%c0_8, %c0_9] : memref<128x128xf32, #tpu.memory_space<vmem>>, vector<128x128xf32>
    tpu.vector_store %arg5[%c0_8, %c0_9], %11 {strides = array<i32>} : memref<128x128xf32, #tpu.memory_space<vmem>>, vector<128x128xf32>,
    %cst_10 = arith.constant dense<0.000000e+00> : vector<128xf32>
    %13 = vector.multi_reduction <add>, %11, %cst_10 [0] : vector<128x128xf32> to vector<128xf32>
    %14 = vector.shape_cast %13 : vector<128xf32> to vector<1x128xf32>
    %15 = arith.mulf %11, %11 : vector<128x128xf32>
    %cst_11 = arith.constant dense<0.000000e+00> : vector<128xf32>
    %16 = vector.multi_reduction <add>, %15, %cst_11 [0] : vector<128x128xf32> to vector<128xf32>
    %17 = vector.shape_cast %16 : vector<128xf32> to vector<1x128xf32>
    %18 = tpu.concatenate %14, %17 in 0 : vector<1x128xf32>, vector<1x128xf32> -> vector<2x128xf32>
    %c0_12 = arith.constant 0 : index
    %c0_13 = arith.constant 0 : index
    %c0_14 = arith.constant 0 : index
    %19 = vector.load %arg6[%c0_12, %c0_13, %c0_14] : memref<1x2x128xf32, #tpu.memory_space<vmem>>, vector<1x2x128xf32>
    %20 = vector.shape_cast %19 : vector<1x2x128xf32> to vector<2x128xf32>
    %21 = vector.shape_cast %18 : vector<2x128xf32> to vector<1x2x128xf32>
    tpu.vector_store %arg6[%c0_12, %c0_13, %c0_14], %21 {strides = array<i32>} : memref<1x2x128xf32, #tpu.memory_space<vmem>>, vector<1x2x128xf32>,
    return
  }
  func.func @transform_0(%arg0: i32) -> (i32, i32) {
    %c0_i32 = arith.constant 0 : i32
    %c0_i32_0 = arith.constant 0 : i32
    return %arg0, %c0_i32 : i32, i32
  }
  func.func @transform_1(%arg0: i32) -> (i32, i32) {
    %c0_i32 = arith.constant 0 : i32
    %c0_i32_0 = arith.constant 0 : i32
    %c0_i32_1 = arith.constant 0 : i32
    return %c0_i32, %c0_i32_0 : i32, i32
  }
  func.func @transform_2(%arg0: i32) -> (i32, i32) {
    %c0_i32 = arith.constant 0 : i32
    %c0_i32_0 = arith.constant 0 : i32
    %c0_i32_1 = arith.constant 0 : i32
    return %c0_i32, %c0_i32_0 : i32, i32
  }
  func.func @transform_3(%arg0: i32) -> (i32, i32) {
    %c0_i32 = arith.constant 0 : i32
    %c0_i32_0 = arith.constant 0 : i32
    %c0_i32_1 = arith.constant 0 : i32
    return %c0_i32, %c0_i32_0 : i32, i32
  }
  func.func @transform_4(%arg0: i32) -> (i32, i32) {
    %c0_i32 = arith.constant 0 : i32
    %c0_i32_0 = arith.constant 0 : i32
    return %arg0, %c0_i32 : i32, i32
  }
  func.func @transform_5(%arg0: i32) -> (i32, i32, i32) {
    %c0_i32 = arith.constant 0 : i32
    %c0_i32_0 = arith.constant 0 : i32
    %c0_i32_1 = arith.constant 0 : i32
    return %arg0, %c0_i32, %c0_i32_0 : i32, i32, i32
  }
}

module attributes {stable_mosaic.version = 11 : i64} {
  func.func @residual_kernel(%arg0: i32, %arg1: memref<128x128xf32, #tpu.memory_space<vmem>>, %arg2: memref<128x128xf32, #tpu.memory_space<vmem>>, %arg3: memref<1x128xf32, #tpu.memory_space<vmem>>, %arg4: memref<1x128xf32, #tpu.memory_space<vmem>>, %arg5: memref<128x128xf32, #tpu.memory_space<vmem>>) attributes {dimension_semantics = [#tpu.dimension_semantics<parallel>], iteration_bounds = array<i64: 4>, scalar_prefetch = 0 : i64, scratch_operands = 0 : i64, tpu.core_type = #tpu.core_type<tc>, window_params = [{transform_indices = @transform_0, window_bounds = array<i64: 128, 128>}, {transform_indices = @transform_1, window_bounds = array<i64: 128, 128>}, {pipeline_mode = #tpu.pipeline_mode<synchronous>, transform_indices = @transform_2, window_bounds = array<i64: 1, 128>}, {pipeline_mode = #tpu.pipeline_mode<synchronous>, transform_indices = @transform_3, window_bounds = array<i64: 1, 128>}, {transform_indices = @transform_4, window_bounds = array<i64: 128, 128>}]} {
    %c0 = arith.constant 0 : index
    %c0_0 = arith.constant 0 : index
    %0 = vector.load %arg1[%c0, %c0_0] : memref<128x128xf32, #tpu.memory_space<vmem>>, vector<128x128xf32>
    %c0_1 = arith.constant 0 : index
    %c0_2 = arith.constant 0 : index
    %1 = vector.load %arg3[%c0_1, %c0_2] : memref<1x128xf32, #tpu.memory_space<vmem>>, vector<1x128xf32>
    %2 = vector.broadcast %1 : vector<1x128xf32> to vector<128x128xf32>
    %3 = arith.mulf %0, %2 : vector<128x128xf32>
    %c0_3 = arith.constant 0 : index
    %c0_4 = arith.constant 0 : index
    %4 = vector.load %arg4[%c0_3, %c0_4] : memref<1x128xf32, #tpu.memory_space<vmem>>, vector<1x128xf32>
    %5 = vector.broadcast %4 : vector<1x128xf32> to vector<128x128xf32>
    %6 = arith.addf %3, %5 : vector<128x128xf32>
    %c0_5 = arith.constant 0 : index
    %c0_6 = arith.constant 0 : index
    %7 = vector.load %arg2[%c0_5, %c0_6] : memref<128x128xf32, #tpu.memory_space<vmem>>, vector<128x128xf32>
    %8 = arith.addf %6, %7 : vector<128x128xf32>
    %cst = arith.constant 0.000000e+00 : f32
    %9 = vector.broadcast %cst : f32 to vector<128x128xf32>
    %10 = arith.maximumf %8, %9 : vector<128x128xf32>
    %c0_7 = arith.constant 0 : index
    %c0_8 = arith.constant 0 : index
    %11 = vector.load %arg5[%c0_7, %c0_8] : memref<128x128xf32, #tpu.memory_space<vmem>>, vector<128x128xf32>
    tpu.vector_store %arg5[%c0_7, %c0_8], %10 {strides = array<i32>} : memref<128x128xf32, #tpu.memory_space<vmem>>, vector<128x128xf32>,
    return
  }
  func.func @transform_0(%arg0: i32) -> (i32, i32) {
    %c0_i32 = arith.constant 0 : i32
    %c0_i32_0 = arith.constant 0 : i32
    return %arg0, %c0_i32 : i32, i32
  }
  func.func @transform_1(%arg0: i32) -> (i32, i32) {
    %c0_i32 = arith.constant 0 : i32
    %c0_i32_0 = arith.constant 0 : i32
    return %arg0, %c0_i32 : i32, i32
  }
  func.func @transform_2(%arg0: i32) -> (i32, i32) {
    %c0_i32 = arith.constant 0 : i32
    %c0_i32_0 = arith.constant 0 : i32
    %c0_i32_1 = arith.constant 0 : i32
    return %c0_i32, %c0_i32_0 : i32, i32
  }
  func.func @transform_3(%arg0: i32) -> (i32, i32) {
    %c0_i32 = arith.constant 0 : i32
    %c0_i32_0 = arith.constant 0 : i32
    %c0_i32_1 = arith.constant 0 : i32
    return %c0_i32, %c0_i32_0 : i32, i32
  }
  func.func @transform_4(%arg0: i32) -> (i32, i32) {
    %c0_i32 = arith.constant 0 : i32
    %c0_i32_0 = arith.constant 0 : i32
    return %arg0, %c0_i32 : i32, i32
  }
}

</mosaic_0001>

<bundles_post_ra>
// kernel: bottleneck_forward.4
= control target key start
LH: loop header
LB: loop body
LE: loop exit
PB: predicated region body
PF: predicated region fallthrough
CT: control target
= control target key end

     0   :  { %9 = vsyncpa [#allocation3], 0  ;;  %s994_s0 = inlined_call_operand.hbm [shape: f32[512,128], index: 0, kind: input, shape index: {}]   ;;  %s995_s1 = inlined_call_operand.vmem [shape: bf16[128,32], index: 1, kind: input, shape index: {}]   ;;  %s996_s2 = inlined_call_operand.vmem [shape: f32[512,32], index: 2, kind: output, shape index: {0}]   ;;  %s997_s3 = inlined_call_operand.vmem [shape: f32[4,2,32], index: 3, kind: output, shape index: {1}]  }
   0x1   :  { %11 = vsyncpa [#allocation3 + $0x1], 0  ;;  %s760_s12 = smov 0   ;;  %s762_s13 = smov 0  }
   0x2   :  { %s764_s14 = smov 0   ;;  %s766_s15 = smov 0  }
   0x3 LB: > { %s779_s16 = sadd.s32 4294967295, %s736_s15   ;;  %s782_s17 = sadd.s32 1, %s736_s15   ;;  %s736_s15 = sphi %s766_s15, %s1004_s15   ;;  %s732_s14 = sphi %s764_s14, %s1003_s14   ;;  %s728_s13 = sphi %s762_s13, %s1002_s13   ;;  %s724_s12 = sphi %s760_s12, %s1001_s12  }
   0x4   : > { %s21_s18 = ssub.s32 %s736_s15, %s782_s17  ;;  %s24_s19 = sadd.s32 1, %s732_s14 }
   0x5   : > { %p22_p0 = scmp.eq.s32.totalorder %s21_s18, 0  ;;  %p31_p1 = scmp.ne.s32.totalorder %s732_s14, %s728_s13 }
   0x6   : > { %p32_p2 = scmp.eq.s32.totalorder %s736_s15, 0  ;;  %p37_p3 = scmp.ne.s32.totalorder %s728_s13, %s724_s12 }
   0x7   : > { %s792_s20 = scalar_select %p22_p0, %s732_s14, %s24_s19  }
   0x8   : > { %p794_p4 = por %p32_p2, %p31_p1  ;;  %p38_p5 = scmp.eq.s32.totalorder %s779_s16, 0 }
   0x9   : > { %p637_p6 = scmp.lt.s32.totalorder %s736_s15, 4  ;;  %s137_s23 = sand.u32 1, %s732_s14  }
   0xa   : > { %p800_p7 = por %p38_p5, %p37_p3  ;;  %s556_s24 = sshll.u32 %s137_s23, 7 }
   0xb   : > { %s598_s25 = sshll.u32 %s736_s15, 7  ;;  %s141_s29 = scalar_lea.vmem [#allocation2], %s556_s24 }
   0xc   : > { %s146_s28 = scalar_lea.hbm %s994_s0, %s598_s25  ;;  %s149_s30 = sshll.u32 %s141_s29, 4  ;;  %s150_s30 = int_to_ptr.vmem [resolvable:$true] %s149_s30 }
   0xd   : > { %s147_s4 = sshll.u32 %s146_s28, 4  ;;  %p811_p8 = pnand %p637_p6, %p794_p4  ;;  %s148_s4 = int_to_ptr.hbm [resolvable:$true] %s147_s4 }
   0xe   : > { %p559_p9 = scmp.ge.s32.totalorder %s736_s15, 1  ;;  %s138_s6 = scalar_lea.sflag [#allocation3], %s137_s23 }
   0xf   : > { %s672_s7 = sshra.s32 %s148_s4, 4  ;;  %p676_p11 = pneg %p811_p8  ;;  %s673_s7 = int_to_ptr.hbm [resolvable:$true] %s672_s7 }
  0x10   : > { %s674_s8 = scalar_lea.hbm %s673_s7, 128  ;;  %s679_s11 = scalar_lea.hbm %s994_s0, 512 }
  0x11   : > { %p675_p10 = scmp.ne.s32.totalorder %s673_s7, %s674_s8  ;;  %p680_p0 = scmp.lt.s32.totalorder %s673_s7, %s994_s0 }
  0x12   : > { %p681_p1 = scmp.lt.s32.totalorder %s679_s11, %s674_s8 }
  0x13   : > { %p677_p12 = pnand %p676_p11, %p675_p10 }
  0x14   : > { %p682_p2 = por %p681_p1, %p680_p0 }
  0x15   : > { %p678_p13 = pneg %p677_p12 }
  0x17   : > { %p683_p3 = pnand %p682_p2, %p678_p13 }
  0x19   : > { %686 = shalt.err (!%p683_p3)
}
  0x1a   : > { %s738_s19 = smov 128   ;;  %s739_s21 = smov 8  }
  0x1b   : > { %636 = dma.hbm_to_vmem [thread:$0]  (!%p811_p8), %s148_s4, 2048, %s150_s30, %s138_s6, %s738_s19, %s738_s19, %s739_s21  }
  0x1c   : > { %p157_p4 = scmp.lt.s32.totalorder %s736_s15, 5 }
  0x1e   : > { %p158_p5 = pnand %p559_p9, %p157_p4 }
  0x1f   : > { %s163_s23 = sand.u32 (!%p158_p5), 1, %s728_s13  }
  0x20   : > { %161 = sbr.rel (%p158_p5) target bundleno = 263 (0x107), region = 28  ;;  %s560_s24 = sshll.u32 (!%p158_p5), %s163_s23, 7 }
  0x21   : > { %s164_s25 = scalar_lea.sflag (!%p158_p5), [#allocation3], %s163_s23  ;;  %s830_s26 = scalar_lea.vmem (!%p158_p5), [#allocation2], %s560_s24 }
  0x25   : > { %719 = dma.done.wait (%p800_p7), %s164_s25, 2048  }
  0x26   : > { %721 = vsyncadd (%p800_p7), %s164_s25, 4294965248  ;;  %v606_v0 = vld [vmem:[%s995_s1 + $0x38] sm:$0xff]  ;;  %v605_v1 = vld [vmem:[%s995_s1 + $0x30] sm:$0xff]  ;;  %s561_s19 = sshll.u32 %s779_s16, 4  ;;  %vm343_vm0 = vcmask 261120   ;;  %p202_p7 = scmp.lt.s32.totalorder %s779_s16, 3 }
  0x27   : > { %294 = vmatpush.bf16.msra.mxu0 %v606_v0  ;;  %607 = vmatpush.bf16.msra.mxu1 %v606_v0  ;;  %v604_v2 = vld [vmem:[%s995_s1 + $0x28] sm:$0xff]  ;;  %v603_v3 = vld [vmem:[%s995_s1 + $0x20] sm:$0xff]  ;;  %v602_v4 = vld [vmem:[%s995_s1 + $0x18] sm:$0xff]  ;;  %p197_p6 = scmp.lt.s32.totalorder %s561_s19, 63  ;;  %vm450_vm1 = vcmask 1040384   ;;  %vm452_vm2 = vcmask 254976  }
  0x28   : > { %608 = vmatpush.bf16.msra.mxu2 %v606_v0  ;;  %609 = vmatpush.bf16.msra.mxu3 %v606_v0  ;;  %v601_v5 = vld [vmem:[%s995_s1 + $0x10] sm:$0xff]  ;;  %v600_v6 = vld [vmem:[%s995_s1 + $0x8] sm:$0xff]  ;;  %v599_v7 = vld [vmem:[%s995_s1] sm:$0xff]  ;;  %s1008_s16 = smov (!%p202_p7, %s779_s16), 3 }
  0x29   : > { %v206_v8 = vld [vmem:[%s830_s26] sm:$0xff]  ;;  %v207_v9 = vld [vmem:[%s830_s26 + $0x8] sm:$0xff]  ;;  %v208_v20 = vld [vmem:[%s830_s26 + $0x10] sm:$0xff]  ;;  %s1006_s19 = smov (!%p197_p6, %s561_s19), 63 }
  0x2a   : > { %v210_v10 = vld [vmem:[%s830_s26 + $0x20] sm:$0xff]  ;;  %v211_v11 = vld [vmem:[%s830_s26 + $0x28] sm:$0xff]  ;;  %v222_v16 = vpack.c.bf16 %v207_v9, %v206_v8  ;;  %v209_v21 = vld [vmem:[%s830_s26 + $0x18] sm:$0xff]  ;;  %s562_s21 = sshll.u32 %s1006_s19, 3 }
  0x2b   : > { %295 = vmatpush.bf16.msra.mxu0 %v605_v1  ;;  %610 = vmatpush.bf16.msra.mxu1 %v605_v1  ;;  %v214_v12 = vld [vmem:[%s830_s26 + $0x40] sm:$0xff]  ;;  %v215_v13 = vld [vmem:[%s830_s26 + $0x48] sm:$0xff]  ;;  %v224_v17 = vpack.c.bf16 %v211_v11, %v210_v10  ;;  %v212_v22 = vld [vmem:[%s830_s26 + $0x30] sm:$0xff]  ;;  %v223_v28 = vpack.c.bf16 %v209_v21, %v208_v20  ;;  %s880_s25 = scalar_lea.vmem %s996_s2, %s562_s21 }
  0x2c   : > { %611 = vmatpush.bf16.msra.mxu2 %v605_v1  ;;  %612 = vmatpush.bf16.msra.mxu3 %v605_v1  ;;  %v218_v14 = vld [vmem:[%s830_s26 + $0x60] sm:$0xff]  ;;  %v219_v15 = vld [vmem:[%s830_s26 + $0x68] sm:$0xff]  ;;  %v226_v18 = vpack.c.bf16 %v215_v13, %v214_v12  ;;  %v213_v23 = vld [vmem:[%s830_s26 + $0x38] sm:$0xff] }
  0x2d   : > { %v228_v19 = vpack.c.bf16 %v219_v15, %v218_v14  ;;  %v216_v24 = vld [vmem:[%s830_s26 + $0x50] sm:$0xff]  ;;  %v217_v25 = vld [vmem:[%s830_s26 + $0x58] sm:$0xff]  ;;  %v225_v29 = vpack.c.bf16 %v213_v23, %v212_v22 }
  0x2e   : > { %v220_v26 = vld [vmem:[%s830_s26 + $0x70] sm:$0xff]  ;;  %v221_v27 = vld [vmem:[%s830_s26 + $0x78] sm:$0xff]  ;;  %v227_v30 = vpack.c.bf16 %v217_v25, %v216_v24  ;;  %s563_s26 = sshll.u32 %s1008_s16, 1 }
  0x2f   : > { %296 = vmatpush.bf16.msra.mxu0 %v604_v2  ;;  %613 = vmatpush.bf16.msra.mxu1 %v604_v2  ;;  %v229_v31 = vpack.c.bf16 %v221_v27, %v220_v26  ;;  %s205_s15 = scalar_lea.vmem %s997_s3, %s563_s26 }
  0x30   : > { %614 = vmatpush.bf16.msra.mxu2 %v604_v2  ;;  %615 = vmatpush.bf16.msra.mxu3 %v604_v2 }
  0x33   : > { %297 = vmatpush.bf16.msra.mxu0 %v603_v3  ;;  %616 = vmatpush.bf16.msra.mxu1 %v603_v3 }
  0x34   : > { %617 = vmatpush.bf16.msra.mxu2 %v603_v3  ;;  %618 = vmatpush.bf16.msra.mxu3 %v603_v3 }
  0x37   : > { %298 = vmatpush.bf16.msra.mxu0 %v602_v4  ;;  %619 = vmatpush.bf16.msra.mxu1 %v602_v4 }
  0x38   : > { %620 = vmatpush.bf16.msra.mxu2 %v602_v4  ;;  %621 = vmatpush.bf16.msra.mxu3 %v602_v4 }
  0x3b   : > { %299 = vmatpush.bf16.msra.mxu0 %v601_v5  ;;  %622 = vmatpush.bf16.msra.mxu1 %v601_v5 }
  0x3c   : > { %623 = vmatpush.bf16.msra.mxu2 %v601_v5  ;;  %624 = vmatpush.bf16.msra.mxu3 %v601_v5 }
  0x3f   : > { %300 = vmatpush.bf16.msra.mxu0 %v600_v6  ;;  %625 = vmatpush.bf16.msra.mxu1 %v600_v6 }
  0x40   : > { %626 = vmatpush.bf16.msra.mxu2 %v600_v6  ;;  %627 = vmatpush.bf16.msra.mxu3 %v600_v6 }
  0x43   : > { %301 = vmatpush.bf16.msra.mxu0 %v599_v7  ;;  %628 = vmatpush.bf16.msra.mxu1 %v599_v7 }
  0x44   : > { %629 = vmatpush.bf16.msra.mxu2 %v599_v7  ;;  %630 = vmatpush.bf16.msra.mxu3 %v599_v7 }
  0x46   : > { %302 = vmatmul.bf16.vlgmr.msra.gmra.mxu0 %v222_v16  ;;  %312 = vmatmul.bf16.vlgmr.msra.gmra.mxu1 %v224_v17 }
  0x47   : > { %322 = vmatmul.bf16.vlgmr.msra.gmra.mxu2 %v226_v18  ;;  %332 = vmatmul.bf16.vlgmr.msra.gmra.mxu3 %v228_v19 }
  0x56   : > { %307 = vmatmul.bf16.gmra.mxu0 %v223_v28  ;;  %317 = vmatmul.bf16.gmra.mxu1 %v225_v29 }
  0x57   : > { %327 = vmatmul.bf16.gmra.mxu2 %v227_v30  ;;  %337 = vmatmul.bf16.gmra.mxu3 %v229_v31 }
  0xc3   : > { %v303_v32 = vpop.f32.mrf.mxu0  ;;  %v313_v33 = vpop.f32.mrf.mxu1 }
  0xc4   : > { %344 = vst.msk [vmem:[%s880_s25] sm:$0xff] %vm343_vm0, %v303_v32  ;;  %v397_v43 = vmul.f32 %v303_v32, %v303_v32  ;;  %v360_v46 = vsel %vm343_vm0, %v303_v32, 0.0  ;;  %v401_v58 = vmul.f32 %v313_v33, %v313_v33  ;;  %v367_v63 = vsel %vm343_vm0, %v313_v33, 0.0 }
  0xc5   : > { %348 = vst.msk [vmem:[%s880_s25 + $0x20] sm:$0xff] %vm343_vm0, %v313_v33 }
  0xc6   : > { %v413_v50 = vsel %vm343_vm0, %v397_v43, 0.0  ;;  %v420_v4 = vsel %vm343_vm0, %v401_v58, 0.0 }
  0xca   : > { %v886_v34 = vpop.f32.mrf.mxu2  ;;  %v888_v35 = vpop.f32.mrf.mxu3 }
  0xcb   : > { %v305_v36 = vpop.f32.mrf.mxu0  ;;  %v315_v37 = vpop.f32.mrf.mxu1  ;;  %352 = vst.msk [vmem:[%s880_s25 + $0x40] sm:$0xff] %vm343_vm0, %v886_v34  ;;  %v405_v16 = vmul.f32 %v886_v34, %v886_v34  ;;  %v375_v21 = vsel %vm343_vm0, %v886_v34, 0.0 }
  0xcc   : > { %345 = vst.msk [vmem:[%s880_s25 + $0x8] sm:$0xff] %vm343_vm0, %v305_v36  ;;  %v398_v42 = vmul.f32 %v305_v36, %v305_v36  ;;  %v361_v44 = vsel %vm343_vm0, %v305_v36, 0.0  ;;  %v402_v0 = vmul.f32 %v315_v37, %v315_v37  ;;  %v369_v5 = vsel %vm343_vm0, %v315_v37, 0.0 }
  0xcd   : > { %349 = vst.msk [vmem:[%s880_s25 + $0x28] sm:$0xff] %vm343_vm0, %v315_v37  ;;  %v362_v49 = vadd.f32 %v361_v44, %v360_v46  ;;  %v428_v26 = vsel %vm343_vm0, %v405_v16, 0.0  ;;  %v409_v37 = vmul.f32 %v888_v35, %v888_v35 }
  0xce   : > { %356 = vst.msk [vmem:[%s880_s25 + $0x60] sm:$0xff] %vm343_vm0, %v888_v35  ;;  %v414_v47 = vsel %vm343_vm0, %v398_v42, 0.0  ;;  %v422_v9 = vsel %vm343_vm0, %v402_v0, 0.0 }
  0xcf   : > { %v415_v54 = vadd.f32 %v414_v47, %v413_v50 }
  0xd2   : > { %v900_v38 = vpop.f32.mrf.mxu2  ;;  %v902_v39 = vpop.f32.mrf.mxu3 }
  0xd3   : > { %v308_v40 = vpop.f32.mrf.mxu0  ;;  %v318_v41 = vpop.f32.mrf.mxu1  ;;  %353 = vst.msk [vmem:[%s880_s25 + $0x48] sm:$0xff] %vm343_vm0, %v900_v38  ;;  %v406_v22 = vmul.f32 %v900_v38, %v900_v38  ;;  %v377_v27 = vsel %vm343_vm0, %v900_v38, 0.0  ;;  %v383_v38 = vsel %vm343_vm0, %v888_v35, 0.0  ;;  %v410_v44 = vmul.f32 %v902_v39, %v902_v39 }
  0xd4   : > { %346 = vst.msk [vmem:[%s880_s25 + $0x10] sm:$0xff] %vm343_vm0, %v308_v40  ;;  %v399_v45 = vmul.f32 %v308_v40, %v308_v40  ;;  %v363_v48 = vsel %vm343_vm0, %v308_v40, 0.0  ;;  %v403_v6 = vmul.f32 %v318_v41, %v318_v41  ;;  %v371_v10 = vsel %vm343_vm0, %v318_v41, 0.0 }
  0xd5   : > { %350 = vst.msk [vmem:[%s880_s25 + $0x30] sm:$0xff] %vm343_vm0, %v318_v41  ;;  %v364_v55 = vadd.f32 %v363_v48, %v362_v49  ;;  %v430_v31 = vsel %vm343_vm0, %v406_v22, 0.0  ;;  %v436_v48 = vsel %vm343_vm0, %v409_v37, 0.0  ;;  %v385_v49 = vsel %vm343_vm0, %v902_v39, 0.0 }
  0xd6   : > { %357 = vst.msk [vmem:[%s880_s25 + $0x68] sm:$0xff] %vm343_vm0, %v902_v39  ;;  %v416_v51 = vsel %vm343_vm0, %v399_v45, 0.0  ;;  %v424_v17 = vsel %vm343_vm0, %v403_v6, 0.0  ;;  %v438_v35 = vsel %vm343_vm0, %v410_v44, 0.0 }
  0xd7   : > { %v417_v61 = vadd.f32 %v416_v51, %v415_v54 }
  0xda   : > { %v328_v52 = vpop.f32.mrf.mxu2  ;;  %v920_v53 = vpop.f32.mrf.mxu3 }
  0xdb   : > { %v310_v56 = vpop.f32.mrf.mxu0  ;;  %v320_v57 = vpop.f32.mrf.mxu1  ;;  %354 = vst.msk [vmem:[%s880_s25 + $0x50] sm:$0xff] %vm343_vm0, %v328_v52  ;;  %v407_v28 = vmul.f32 %v328_v52, %v328_v52  ;;  %v379_v32 = vsel %vm343_vm0, %v328_v52, 0.0  ;;  %v411_v50 = vmul.f32 %v920_v53, %v920_v53  ;;  %v387_v54 = vsel %vm343_vm0, %v920_v53, 0.0 }
  0xdc   : > { %347 = vst.msk [vmem:[%s880_s25 + $0x18] sm:$0xff] %vm343_vm0, %v310_v56  ;;  %v365_v59 = vsel %vm343_vm0, %v310_v56, 0.0  ;;  %v400_v60 = vmul.f32 %v310_v56, %v310_v56  ;;  %v404_v11 = vmul.f32 %v320_v57, %v320_v57  ;;  %v373_v18 = vsel %vm343_vm0, %v320_v57, 0.0 }
  0xdd   : > { %v366_v62 = vadd.f32 %v365_v59, %v364_v55  ;;  %351 = vst.msk [vmem:[%s880_s25 + $0x38] sm:$0xff] %vm343_vm0, %v320_v57  ;;  %v432_v40 = vsel %vm343_vm0, %v407_v28, 0.0  ;;  %v440_v58 = vsel %vm343_vm0, %v411_v50, 0.0 }
  0xde   : > { %v418_v1 = vsel %vm343_vm0, %v400_v60, 0.0  ;;  %358 = vst.msk [vmem:[%s880_s25 + $0x70] sm:$0xff] %vm343_vm0, %v920_v53  ;;  %v426_v23 = vsel %vm343_vm0, %v404_v11, 0.0 }
  0xdf   : > { %v368_v2 = vadd.f32 %v367_v63, %v366_v62  ;;  %v419_v3 = vadd.f32 %v418_v1, %v417_v61 }
  0xe1   : > { %v421_v7 = vadd.f32 %v420_v4, %v419_v3  ;;  %v370_v8 = vadd.f32 %v369_v5, %v368_v2 }
  0xe2   : > { %v330_v12 = vpop.f32.mrf.mxu2  ;;  %v340_v13 = vpop.f32.mrf.mxu3 }
  0xe3   : > { %v372_v14 = vadd.f32 %v371_v10, %v370_v8  ;;  %v423_v15 = vadd.f32 %v422_v9, %v421_v7  ;;  %355 = vst.msk [vmem:[%s880_s25 + $0x58] sm:$0xff] %vm343_vm0, %v330_v12  ;;  %v408_v33 = vmul.f32 %v330_v12, %v330_v12  ;;  %v381_v41 = vsel %vm343_vm0, %v330_v12, 0.0 }
  0xe4   : > { %359 = vst.msk [vmem:[%s880_s25 + $0x78] sm:$0xff] %vm343_vm0, %v340_v13  ;;  %v412_v55 = vmul.f32 %v340_v13, %v340_v13  ;;  %v389_v59 = vsel %vm343_vm0, %v340_v13, 0.0 }
  0xe5   : > { %v374_v19 = vadd.f32 %v373_v18, %v372_v14  ;;  %v425_v20 = vadd.f32 %v424_v17, %v423_v15  ;;  %v434_v45 = vsel %vm343_vm0, %v408_v33, 0.0 }
  0xe6   : > { %v442_v61 = vsel %vm343_vm0, %v412_v55, 0.0 }
  0xe7   : > { %v376_v24 = vadd.f32 %v375_v21, %v374_v19  ;;  %v427_v25 = vadd.f32 %v426_v23, %v425_v20 }
  0xe9   : > { %v429_v29 = vadd.f32 %v428_v26, %v427_v25  ;;  %v378_v30 = vadd.f32 %v377_v27, %v376_v24 }
  0xeb   : > { %v380_v34 = vadd.f32 %v379_v32, %v378_v30  ;;  %v431_v36 = vadd.f32 %v430_v31, %v429_v29 }
  0xed   : > { %v433_v42 = vadd.f32 %v432_v40, %v431_v36  ;;  %v382_v43 = vadd.f32 %v381_v41, %v380_v34 }
  0xef   : > { %v384_v46 = vadd.f32 %v383_v38, %v382_v43  ;;  %v435_v47 = vadd.f32 %v434_v45, %v433_v42 }
  0xf1   : > { %v437_v51 = vadd.f32 %v436_v48, %v435_v47  ;;  %v386_v52 = vadd.f32 %v385_v49, %v384_v46 }
  0xf3   : > { %v388_v56 = vadd.f32 %v387_v54, %v386_v52  ;;  %v439_v57 = vadd.f32 %v438_v35, %v437_v51 }
  0xf5   : > { %v441_v39 = vadd.f32 %v440_v58, %v439_v57  ;;  %v390_v60 = vadd.f32 %v389_v59, %v388_v56 }
  0xf7   : > { %v391_v62 = vrot.slane %v390_v60, 4  ;;  %v443_v63 = vadd.f32 %v442_v61, %v441_v39 }
  0xf9   : > { %v392_v0 = vadd.f32 %v391_v62, %v390_v60  ;;  %v444_v1 = vrot.slane %v443_v63, 4 }
  0xfb   : > { %v393_v2 = vrot.slane %v392_v0, 2  ;;  %v445_v3 = vadd.f32 %v444_v1, %v443_v63 }
  0xfd   : > { %v394_v53 = vadd.f32 %v393_v2, %v392_v0  ;;  %v446_v4 = vrot.slane %v445_v3, 2 }
  0xff   : > { %v395_v5 = vrot.slane %v394_v53, 1  ;;  %v447_v6 = vadd.f32 %v446_v4, %v445_v3 }
 0x101   : > { %v448_v7 = vrot.slane %v447_v6, 1  ;;  %v396_v8 = vadd.f32 %v395_v5, %v394_v53 }
 0x103   : > { %v449_v9 = vadd.f32 %v448_v7, %v447_v6 }
 0x105   : > { %v451_v10 = vsel %vm450_vm1, %v396_v8, %v449_v9 }
 0x106   : > { %453 = vst.msk [vmem:[%s205_s15] sm:$0x3] %vm452_vm2, %v451_v10 }
 0x107 PF: > { %p14_p8 = scmp.ge.s32.totalorder %s782_s17, 6   ;;  %s1001_s12 = smov %s728_s13 }
 0x108   : > { %s1002_s13 = smov %s732_s14  ;;  %s1003_s14 = smov %s792_s20 }
 0x109   : > { %s1004_s15 = smov %s782_s17  ;;  %16 = sbr.rel (!%p14_p8) target bundleno = 3 (0x3), region = 80 }
 0x10e   :  { %490 = vsyncpa [#allocation3], 1 }
 0x10f   :  { %492 = vsyncpa [#allocation3 + $0x1], 1 }

// kernel: bottleneck_forward.6
= control target key start
LH: loop header
LB: loop body
LE: loop exit
PB: predicated region body
PF: predicated region fallthrough
CT: control target
= control target key end

     0   :  { %s658_s18 = smov 0   ;;  %s782_s0 = inlined_call_operand.vmem [shape: f32[512,32], index: 0, kind: input, shape index: {}]   ;;  %s783_s1 = inlined_call_operand.vmem [shape: f32[1,32], index: 1, kind: input, shape index: {}]   ;;  %s784_s2 = inlined_call_operand.vmem [shape: f32[1,32], index: 2, kind: input, shape index: {}]   ;;  %s785_s3 = inlined_call_operand.vmem [shape: bf16[32,128], index: 3, kind: input, shape index: {}]   ;;  %s786_s4 = inlined_call_operand.vmem [shape: f32[512,128], index: 4, kind: output, shape index: {0}]   ;;  %s787_s5 = inlined_call_operand.vmem [shape: f32[4,2,128], index: 5, kind: output, shape index: {1}]  }
   0x1 LB: > { %s664_s19 = sadd.s32 4294967295, %s626_s18   ;;  %p578_p0 = scmp.ge.s32.totalorder %s626_s18, 1  ;;  %s626_s18 = sphi %s658_s18, %s16_s18  }
   0x2   : > { %p191_p1 = scmp.lt.s32.totalorder %s626_s18, 5 }
   0x4   : > { %p192_p2 = pnand %p578_p0, %p191_p1 }
   0x5   : > { %s579_s22 = sshll.u32 (!%p192_p2), %s664_s19, 4  ;;  %p235_p4 = scmp.lt.s32.totalorder (!%p192_p2), %s664_s19, 3 }
   0x6   : > { %195 = sbr.rel (%p192_p2) target bundleno = 216 (0xd8), region = 36  ;;  %p224_p3 = scmp.lt.s32.totalorder (!%p192_p2), %s579_s22, 63 }
   0xb   : > { %v603_v0 = vld [vmem:[%s785_s3 + $0x8] sm:$0xff]  ;;  %v602_v1 = vld [vmem:[%s785_s3] sm:$0xff]  ;;  %s789_s22 = smov (!%p224_p3, %s579_s22), 63  ;;  %vm336_vm0 = vcmask 261120   ;;  %s791_s19 = smov (!%p235_p4, %s664_s19), 3  ;;  %vm484_vm1 = vcmask 1040384  }
   0xc   : > { %367 = vmatpush.bf16.msra.mxu0 %v603_v0  ;;  %604 = vmatpush.bf16.msra.mxu1 %v603_v0  ;;  %v680_v2 = vld [vmem:[%s783_s1] ss:$0 sm:$0xff]  ;;  %s580_s27 = sshll.u32 %s789_s22, 3  ;;  %s583_s11 = sshll.u32 %s791_s19, 1 }
   0xd   : > { %605 = vmatpush.bf16.msra.mxu2 %v603_v0  ;;  %606 = vmatpush.bf16.msra.mxu3 %v603_v0  ;;  %s688_s30 = scalar_lea.vmem %s782_s0, %s580_s27  ;;  %v693_v3 = vld [vmem:[%s784_s2] ss:$0 sm:$0xff]  ;;  %s756_s10 = scalar_lea.vmem %s786_s4, %s580_s27 }
   0xe   : > { %v240_v4 = vld [vmem:[%s688_s30] sm:$0xff]  ;;  %v241_v5 = vld [vmem:[%s688_s30 + $0x8] sm:$0xff]  ;;  %v242_v30 = vld [vmem:[%s688_s30 + $0x10] sm:$0xff]  ;;  %s238_s14 = scalar_lea.vmem %s787_s5, %s583_s11 }
   0xf   : > { %v244_v6 = vld [vmem:[%s688_s30 + $0x20] sm:$0xff]  ;;  %v260_v7 = vmul.f32 %v680_v2, %v240_v4  ;;  %v261_v8 = vmul.f32 %v680_v2, %v241_v5  ;;  %v245_v9 = vld [vmem:[%s688_s30 + $0x28] sm:$0xff]  ;;  %v243_v35 = vld [vmem:[%s688_s30 + $0x18] sm:$0xff]  ;;  %v262_v45 = vmul.f32 %v680_v2, %v242_v30 }
  0x10   : > { %368 = vmatpush.bf16.msra.mxu0 %v602_v1  ;;  %607 = vmatpush.bf16.msra.mxu1 %v602_v1  ;;  %v264_v10 = vmul.f32 %v680_v2, %v244_v6  ;;  %v248_v11 = vld [vmem:[%s688_s30 + $0x40] sm:$0xff]  ;;  %v249_v12 = vld [vmem:[%s688_s30 + $0x48] sm:$0xff]  ;;  %v265_v13 = vmul.f32 %v680_v2, %v245_v9  ;;  %v246_v36 = vld [vmem:[%s688_s30 + $0x30] sm:$0xff]  ;;  %v263_v46 = vmul.f32 %v680_v2, %v243_v35 }
  0x11   : > { %608 = vmatpush.bf16.msra.mxu2 %v602_v1  ;;  %609 = vmatpush.bf16.msra.mxu3 %v602_v1  ;;  %v268_v14 = vmul.f32 %v680_v2, %v248_v11  ;;  %v269_v15 = vmul.f32 %v680_v2, %v249_v12  ;;  %v252_v16 = vld [vmem:[%s688_s30 + $0x60] sm:$0xff]  ;;  %v253_v17 = vld [vmem:[%s688_s30 + $0x68] sm:$0xff]  ;;  %v280_v18 = vadd.f32 %v693_v3, %v260_v7  ;;  %v247_v37 = vld [vmem:[%s688_s30 + $0x38] sm:$0xff] }
  0x12   : > { %v281_v19 = vadd.f32 %v693_v3, %v261_v8  ;;  %v284_v20 = vadd.f32 %v693_v3, %v264_v10  ;;  %v272_v21 = vmul.f32 %v680_v2, %v252_v16  ;;  %v285_v22 = vadd.f32 %v693_v3, %v265_v13  ;;  %v250_v40 = vld [vmem:[%s688_s30 + $0x50] sm:$0xff]  ;;  %v251_v41 = vld [vmem:[%s688_s30 + $0x58] sm:$0xff] }
  0x13   : > { %v288_v23 = vadd.f32 %v693_v3, %v268_v14  ;;  %v289_v24 = vadd.f32 %v693_v3, %v269_v15  ;;  %v273_v25 = vmul.f32 %v680_v2, %v253_v17  ;;  %v296_v26 = vmax.f32 %v280_v18, 0.0  ;;  %v254_v49 = vld [vmem:[%s688_s30 + $0x70] sm:$0xff]  ;;  %v255_v50 = vld [vmem:[%s688_s30 + $0x78] sm:$0xff] }
  0x14   : > { %v297_v27 = vmax.f32 %v281_v19, 0.0  ;;  %v300_v28 = vmax.f32 %v284_v20, 0.0  ;;  %v292_v29 = vadd.f32 %v693_v3, %v272_v21  ;;  %v301_v31 = vmax.f32 %v285_v22, 0.0 }
  0x15   : > { %v304_v32 = vmax.f32 %v288_v23, 0.0  ;;  %v305_v33 = vmax.f32 %v289_v24, 0.0  ;;  %v293_v34 = vadd.f32 %v693_v3, %v273_v25  ;;  %v266_v47 = vmul.f32 %v680_v2, %v246_v36 }
  0x16   : > { %v312_v38 = vpack.c.bf16 %v297_v27, %v296_v26  ;;  %v308_v39 = vmax.f32 %v292_v29, 0.0  ;;  %v314_v42 = vpack.c.bf16 %v301_v31, %v300_v28  ;;  %v267_v48 = vmul.f32 %v680_v2, %v247_v37 }
  0x17   : > { %v316_v43 = vpack.c.bf16 %v305_v33, %v304_v32  ;;  %v309_v44 = vmax.f32 %v293_v34, 0.0  ;;  %v270_v52 = vmul.f32 %v680_v2, %v250_v40  ;;  %v271_v53 = vmul.f32 %v680_v2, %v251_v41 }
  0x18   : > { %592 = vmatmul.msk.bf16.vlgmr.msra.gmra.mxu0 %vm336_vm0, %v312_v38  ;;  %594 = vmatmul.msk.bf16.vlgmr.msra.gmra.mxu1 %vm336_vm0, %v314_v42  ;;  %v274_v54 = vmul.f32 %v680_v2, %v254_v49  ;;  %v275_v55 = vmul.f32 %v680_v2, %v255_v50  ;;  %v282_v56 = vadd.f32 %v693_v3, %v262_v45 }
  0x19   : > { %596 = vmatmul.msk.bf16.vlgmr.msra.gmra.mxu2 %vm336_vm0, %v316_v43  ;;  %v318_v51 = vpack.c.bf16 %v309_v44, %v308_v39  ;;  %v283_v57 = vadd.f32 %v693_v3, %v263_v46  ;;  %v286_v58 = vadd.f32 %v693_v3, %v266_v47  ;;  %v287_v59 = vadd.f32 %v693_v3, %v267_v48 }
  0x1a   : > { %v290_v60 = vadd.f32 %v693_v3, %v270_v52  ;;  %v291_v61 = vadd.f32 %v693_v3, %v271_v53  ;;  %v294_v62 = vadd.f32 %v693_v3, %v274_v54  ;;  %v295_v63 = vadd.f32 %v693_v3, %v275_v55 }
  0x1b   : > { %598 = vmatmul.msk.bf16.vlgmr.msra.gmra.mxu3 %vm336_vm0, %v318_v51  ;;  %v298_v0 = vmax.f32 %v282_v56, 0.0  ;;  %v299_v1 = vmax.f32 %v283_v57, 0.0  ;;  %v302_v2 = vmax.f32 %v286_v58, 0.0  ;;  %v303_v4 = vmax.f32 %v287_v59, 0.0 }
  0x1c   : > { %v306_v5 = vmax.f32 %v290_v60, 0.0  ;;  %v307_v6 = vmax.f32 %v291_v61, 0.0  ;;  %v310_v7 = vmax.f32 %v294_v62, 0.0  ;;  %v311_v8 = vmax.f32 %v295_v63, 0.0 }
  0x1d   : > { %v313_v9 = vpack.c.bf16 %v299_v1, %v298_v0  ;;  %v315_v10 = vpack.c.bf16 %v303_v4, %v302_v2 }
  0x1e   : > { %v317_v11 = vpack.c.bf16 %v307_v6, %v306_v5  ;;  %v319_v12 = vpack.c.bf16 %v311_v8, %v310_v7 }
  0x28   : > { %593 = vmatmul.msk.bf16.gmra.mxu0 %vm336_vm0, %v313_v9  ;;  %595 = vmatmul.msk.bf16.gmra.mxu1 %vm336_vm0, %v315_v10 }
  0x29   : > { %597 = vmatmul.msk.bf16.gmra.mxu2 %vm336_vm0, %v317_v11 }
  0x2b   : > { %599 = vmatmul.msk.bf16.gmra.mxu3 %vm336_vm0, %v319_v12 }
  0x95   : > { %v370_v3 = vpop.f32.mrf.mxu0  ;;  %v380_v13 = vpop.f32.mrf.mxu1 }
  0x96   : > { %410 = vst [vmem:[%s756_s10] sm:$0xff] %v370_v3  ;;  %v447_v23 = vmul.f32 %v370_v3, %v370_v3  ;;  %v451_v35 = vmul.f32 %v380_v13, %v380_v13 }
  0x97   : > { %414 = vst [vmem:[%s756_s10 + $0x20] sm:$0xff] %v380_v13 }
  0x9c   : > { %v390_v14 = vpop.f32.mrf.mxu2 }
  0x9d   : > { %v372_v15 = vpop.f32.mrf.mxu0  ;;  %418 = vst [vmem:[%s756_s10 + $0x40] sm:$0xff] %v390_v14  ;;  %v382_v16 = vpop.f32.mrf.mxu1  ;;  %v455_v49 = vmul.f32 %v390_v14, %v390_v14 }
  0x9e   : > { %411 = vst [vmem:[%s756_s10 + $0x8] sm:$0xff] %v372_v15  ;;  %v400_v17 = vpop.f32.mrf.mxu3  ;;  %v448_v22 = vmul.f32 %v372_v15, %v372_v15  ;;  %v426_v24 = vadd.f32 %v372_v15, %v370_v3  ;;  %v452_v38 = vmul.f32 %v382_v16, %v382_v16 }
  0x9f   : > { %415 = vst [vmem:[%s756_s10 + $0x28] sm:$0xff] %v382_v16  ;;  %v459_v61 = vmul.f32 %v400_v17, %v400_v17 }
  0xa0   : > { %422 = vst [vmem:[%s756_s10 + $0x60] sm:$0xff] %v400_v17  ;;  %v463_v26 = vadd.f32 %v448_v22, %v447_v23 }
  0xa4   : > { %v392_v18 = vpop.f32.mrf.mxu2 }
  0xa5   : > { %v375_v19 = vpop.f32.mrf.mxu0  ;;  %419 = vst [vmem:[%s756_s10 + $0x48] sm:$0xff] %v392_v18  ;;  %v385_v20 = vpop.f32.mrf.mxu1  ;;  %v456_v52 = vmul.f32 %v392_v18, %v392_v18 }
  0xa6   : > { %412 = vst [vmem:[%s756_s10 + $0x10] sm:$0xff] %v375_v19  ;;  %v402_v21 = vpop.f32.mrf.mxu3  ;;  %v449_v25 = vmul.f32 %v375_v19, %v375_v19  ;;  %v427_v27 = vadd.f32 %v426_v24, %v375_v19  ;;  %v453_v41 = vmul.f32 %v385_v20, %v385_v20 }
  0xa7   : > { %416 = vst [vmem:[%s756_s10 + $0x30] sm:$0xff] %v385_v20  ;;  %v460_v0 = vmul.f32 %v402_v21, %v402_v21 }
  0xa8   : > { %423 = vst [vmem:[%s756_s10 + $0x68] sm:$0xff] %v402_v21  ;;  %v464_v30 = vadd.f32 %v463_v26, %v449_v25 }
  0xac   : > { %v395_v28 = vpop.f32.mrf.mxu2 }
  0xad   : > { %v377_v29 = vpop.f32.mrf.mxu0  ;;  %420 = vst [vmem:[%s756_s10 + $0x50] sm:$0xff] %v395_v28  ;;  %v387_v33 = vpop.f32.mrf.mxu1  ;;  %v457_v56 = vmul.f32 %v395_v28, %v395_v28 }
  0xae   : > { %413 = vst [vmem:[%s756_s10 + $0x18] sm:$0xff] %v377_v29  ;;  %v428_v31 = vadd.f32 %v427_v27, %v377_v29  ;;  %v450_v32 = vmul.f32 %v377_v29, %v377_v29  ;;  %v405_v34 = vpop.f32.mrf.mxu3  ;;  %v454_v46 = vmul.f32 %v387_v33, %v387_v33 }
  0xaf   : > { %417 = vst [vmem:[%s756_s10 + $0x38] sm:$0xff] %v387_v33  ;;  %v461_v5 = vmul.f32 %v405_v34, %v405_v34 }
  0xb0   : > { %v429_v36 = vadd.f32 %v428_v31, %v380_v13  ;;  %v465_v37 = vadd.f32 %v464_v30, %v450_v32  ;;  %424 = vst [vmem:[%s756_s10 + $0x70] sm:$0xff] %v405_v34 }
  0xb2   : > { %v466_v39 = vadd.f32 %v465_v37, %v451_v35  ;;  %v430_v40 = vadd.f32 %v429_v36, %v382_v16 }
  0xb4   : > { %v431_v42 = vadd.f32 %v430_v40, %v385_v20  ;;  %v467_v43 = vadd.f32 %v466_v39, %v452_v38  ;;  %v397_v44 = vpop.f32.mrf.mxu2 }
  0xb5   : > { %421 = vst [vmem:[%s756_s10 + $0x58] sm:$0xff] %v397_v44  ;;  %v458_v60 = vmul.f32 %v397_v44, %v397_v44 }
  0xb6   : > { %v432_v45 = vadd.f32 %v431_v42, %v387_v33  ;;  %v468_v47 = vadd.f32 %v467_v43, %v453_v41  ;;  %v407_v48 = vpop.f32.mrf.mxu3 }
  0xb7   : > { %425 = vst [vmem:[%s756_s10 + $0x78] sm:$0xff] %v407_v48  ;;  %v462_v9 = vmul.f32 %v407_v48, %v407_v48 }
  0xb8   : > { %v433_v50 = vadd.f32 %v432_v45, %v390_v14  ;;  %v469_v51 = vadd.f32 %v468_v47, %v454_v46 }
  0xba   : > { %v470_v53 = vadd.f32 %v469_v51, %v455_v49  ;;  %v434_v54 = vadd.f32 %v433_v50, %v392_v18 }
  0xbc   : > { %v435_v55 = vadd.f32 %v434_v54, %v395_v28  ;;  %v471_v57 = vadd.f32 %v470_v53, %v456_v52 }
  0xbe   : > { %v472_v58 = vadd.f32 %v471_v57, %v457_v56  ;;  %v436_v59 = vadd.f32 %v435_v55, %v397_v44 }
  0xc0   : > { %v437_v62 = vadd.f32 %v436_v59, %v400_v17  ;;  %v473_v63 = vadd.f32 %v472_v58, %v458_v60 }
  0xc2   : > { %v474_v1 = vadd.f32 %v473_v63, %v459_v61  ;;  %v438_v2 = vadd.f32 %v437_v62, %v402_v21 }
  0xc4   : > { %v439_v4 = vadd.f32 %v438_v2, %v405_v34  ;;  %v475_v6 = vadd.f32 %v474_v1, %v460_v0 }
  0xc6   : > { %v476_v7 = vadd.f32 %v475_v6, %v461_v5  ;;  %v440_v8 = vadd.f32 %v439_v4, %v407_v48 }
  0xc8   : > { %v441_v10 = vrot.slane %v440_v8, 4  ;;  %v477_v11 = vadd.f32 %v476_v7, %v462_v9 }
  0xca   : > { %v442_v12 = vadd.f32 %v441_v10, %v440_v8  ;;  %v478_v3 = vrot.slane %v477_v11, 4 }
  0xcc   : > { %v443_v13 = vrot.slane %v442_v12, 2  ;;  %v479_v14 = vadd.f32 %v478_v3, %v477_v11 }
  0xce   : > { %v444_v15 = vadd.f32 %v443_v13, %v442_v12  ;;  %v480_v16 = vrot.slane %v479_v14, 2 }
  0xd0   : > { %v445_v17 = vrot.slane %v444_v15, 1  ;;  %v481_v18 = vadd.f32 %v480_v16, %v479_v14 }
  0xd2   : > { %v482_v19 = vrot.slane %v481_v18, 1  ;;  %v446_v20 = vadd.f32 %v445_v17, %v444_v15 }
  0xd4   : > { %v483_v21 = vadd.f32 %v482_v19, %v481_v18 }
  0xd6   : > { %v485_v22 = vsel %vm484_vm1, %v446_v20, %v483_v21 }
  0xd7   : > { %486 = vst [vmem:[%s238_s14] sm:$0x3] %v485_v22 }
  0xd8 PF: > { %s16_s18 = sadd.s32 1, %s626_s18  }
  0xd9   : > { %p13_p5 = scmp.ge.s32.totalorder %s16_s18, 6  }
  0xdb   :  { %15 = sbr.rel (!%p13_p5) target bundleno = 1 (0x1), region = 78 }

// kernel: bottleneck_forward.7
= control target key start
LH: loop header
LB: loop body
LE: loop exit
PB: predicated region body
PF: predicated region fallthrough
CT: control target
= control target key end

     0   :  { %9 = vsyncpa [#allocation3], 0  ;;  %s774_s0 = inlined_call_operand.vmem [shape: f32[512,128], index: 0, kind: input, shape index: {}, may-alias: {0,4}]   ;;  %s775_s1 = inlined_call_operand.hbm [shape: f32[512,128], index: 1, kind: input, shape index: {}]   ;;  %s776_s2 = inlined_call_operand.vmem [shape: f32[1,128], index: 2, kind: input, shape index: {}]   ;;  %s777_s3 = inlined_call_operand.vmem [shape: f32[1,128], index: 3, kind: input, shape index: {}]   ;;  %s778_s4 = inlined_call_operand.vmem [shape: f32[512,128], index: 4, kind: output, shape index: {}, may-alias: {0,4}]  }
   0x1   :  { %11 = vsyncpa [#allocation3 + $0x1], 0  ;;  %s595_s15 = smov 0   ;;  %s597_s16 = smov 0  }
   0x2   :  { %s599_s17 = smov 0   ;;  %s601_s18 = smov 0  }
   0x3 LB: > { %s443_s19 = sadd.s32 4294967295, %s566_s18   ;;  %s615_s20 = sadd.s32 1, %s566_s18   ;;  %s566_s18 = sphi %s601_s18, %s785_s18   ;;  %s562_s17 = sphi %s599_s17, %s784_s17   ;;  %s558_s16 = sphi %s597_s16, %s783_s16   ;;  %s554_s15 = sphi %s595_s15, %s782_s15  }
   0x4   : > { %s47_s21 = ssub.s32 %s566_s18, %s615_s20  ;;  %s50_s22 = sadd.s32 1, %s562_s17 }
   0x5   : > { %p48_p0 = scmp.eq.s32.totalorder %s47_s21, 0  ;;  %p57_p1 = scmp.ne.s32.totalorder %s562_s17, %s558_s16 }
   0x6   : > { %p58_p2 = scmp.eq.s32.totalorder %s566_s18, 0  ;;  %p63_p3 = scmp.ne.s32.totalorder %s558_s16, %s554_s15 }
   0x7   : > { %s625_s23 = scalar_select %p48_p0, %s562_s17, %s50_s22  }
   0x8   : > { %p627_p4 = por %p58_p2, %p57_p1  ;;  %p64_p5 = scmp.eq.s32.totalorder %s443_s19, 0 }
   0x9   : > { %p465_p6 = scmp.lt.s32.totalorder %s566_s18, 4  ;;  %s170_s26 = sand.u32 1, %s562_s17  }
   0xa   : > { %p634_p7 = por %p64_p5, %p63_p3  ;;  %s447_s27 = sshll.u32 %s170_s26, 7 }
   0xb   : > { %s458_s28 = sshll.u32 %s566_s18, 7  ;;  %s174_s6 = scalar_lea.vmem [#allocation2], %s447_s27 }
   0xc   : > { %s179_s5 = scalar_lea.hbm %s775_s1, %s458_s28  ;;  %s182_s7 = sshll.u32 %s174_s6, 4  ;;  %s183_s7 = int_to_ptr.vmem [resolvable:$true] %s182_s7 }
   0xd   : > { %s180_s8 = sshll.u32 %s179_s5, 4  ;;  %p645_p8 = pnand %p465_p6, %p627_p4  ;;  %s181_s8 = int_to_ptr.hbm [resolvable:$true] %s180_s8 }
   0xe   : > { %p450_p9 = scmp.ge.s32.totalorder %s566_s18, 1  ;;  %s171_s10 = scalar_lea.sflag [#allocation3], %s170_s26 }
   0xf   : > { %s502_s11 = sshra.s32 %s181_s8, 4  ;;  %p506_p11 = pneg %p645_p8  ;;  %s503_s11 = int_to_ptr.hbm [resolvable:$true] %s502_s11 }
  0x10   : > { %s504_s12 = scalar_lea.hbm %s503_s11, 128  ;;  %s509_s15 = scalar_lea.hbm %s775_s1, 512 }
  0x11   : > { %p505_p10 = scmp.ne.s32.totalorder %s503_s11, %s504_s12  ;;  %p510_p0 = scmp.lt.s32.totalorder %s503_s11, %s775_s1 }
  0x12   : > { %p511_p1 = scmp.lt.s32.totalorder %s509_s15, %s504_s12 }
  0x13   : > { %p507_p12 = pnand %p506_p11, %p505_p10 }
  0x14   : > { %p512_p2 = por %p511_p1, %p510_p0 }
  0x15   : > { %p508_p13 = pneg %p507_p12 }
  0x17   : > { %p513_p3 = pnand %p512_p2, %p508_p13 }
  0x19   : > { %516 = shalt.err (!%p513_p3)
}
  0x1a   : > { %s568_s24 = smov 128   ;;  %s569_s26 = smov 8  }
  0x1b   : > { %464 = dma.hbm_to_vmem [thread:$0]  (!%p645_p8), %s181_s8, 2048, %s183_s7, %s171_s10, %s568_s24, %s568_s24, %s569_s26  }
  0x1c   : > { %p190_p4 = scmp.lt.s32.totalorder %s566_s18, 5 }
  0x1e   : > { %p191_p5 = pnand %p450_p9, %p190_p4 }
  0x1f   : > { %s196_s27 = sand.u32 (!%p191_p5), 1, %s558_s16  }
  0x20   : > { %194 = sbr.rel (%p191_p5) target bundleno = 71 (0x47), region = 36  ;;  %s451_s28 = sshll.u32 (!%p191_p5), %s196_s27, 7 }
  0x21   : > { %s197_s29 = scalar_lea.sflag (!%p191_p5), [#allocation3], %s196_s27  ;;  %s664_s30 = scalar_lea.vmem (!%p191_p5), [#allocation2], %s451_s28 }
  0x25   : > { %549 = dma.done.wait (%p634_p7), %s197_s29, 2048  }
  0x26   : > { %551 = vsyncadd (%p634_p7), %s197_s29, 4294965248  ;;  %s452_s5 = sshll.u32 %s443_s19, 4  ;;  %v500_v4 = vld [vmem:[%s776_s2] ss:$0 sm:$0xff]  ;;  %v301_v26 = vld [vmem:[%s664_s30 + $0x8] sm:$0xff] }
  0x27   : > { %p232_p6 = scmp.lt.s32.totalorder %s452_s5, 63  ;;  %v694_v10 = vld [vmem:[%s777_s3] ss:$0 sm:$0xff]  ;;  %v302_v27 = vld [vmem:[%s664_s30 + $0x10] sm:$0xff]  ;;  %v303_v31 = vld [vmem:[%s664_s30 + $0x18] sm:$0xff] }
  0x28   : > { %v300_v25 = vld [vmem:[%s664_s30] sm:$0xff]  ;;  %v305_v40 = vld [vmem:[%s664_s30 + $0x28] sm:$0xff]  ;;  %v306_v46 = vld [vmem:[%s664_s30 + $0x30] sm:$0xff] }
  0x29   : > { %s787_s5 = smov (!%p232_p6, %s452_s5), 63  ;;  %v304_v37 = vld [vmem:[%s664_s30 + $0x20] sm:$0xff]  ;;  %v307_v52 = vld [vmem:[%s664_s30 + $0x38] sm:$0xff]  ;;  %v309_v59 = vld [vmem:[%s664_s30 + $0x48] sm:$0xff] }
  0x2a   : > { %s453_s6 = sshll.u32 %s787_s5, 3  ;;  %v308_v57 = vld [vmem:[%s664_s30 + $0x40] sm:$0xff] }
  0x2b   : > { %s680_s9 = scalar_lea.vmem %s774_s0, %s453_s6  ;;  %s728_s13 = scalar_lea.vmem %s778_s4, %s453_s6 }
  0x2c   : > { %v244_v0 = vld [vmem:[%s680_s9] sm:$0xff]  ;;  %v245_v1 = vld [vmem:[%s680_s9 + $0x8] sm:$0xff]  ;;  %v246_v2 = vld [vmem:[%s680_s9 + $0x10] sm:$0xff] }
  0x2d   : > { %v247_v3 = vld [vmem:[%s680_s9 + $0x18] sm:$0xff]  ;;  %v248_v5 = vld [vmem:[%s680_s9 + $0x20] sm:$0xff]  ;;  %v249_v6 = vld [vmem:[%s680_s9 + $0x28] sm:$0xff]  ;;  %v264_v7 = vmul.f32 %v500_v4, %v244_v0  ;;  %v265_v8 = vmul.f32 %v500_v4, %v245_v1  ;;  %v266_v9 = vmul.f32 %v500_v4, %v246_v2 }
  0x2e   : > { %v250_v11 = vld [vmem:[%s680_s9 + $0x30] sm:$0xff]  ;;  %v267_v12 = vmul.f32 %v500_v4, %v247_v3  ;;  %v251_v13 = vld [vmem:[%s680_s9 + $0x38] sm:$0xff]  ;;  %v268_v14 = vmul.f32 %v500_v4, %v248_v5  ;;  %v252_v15 = vld [vmem:[%s680_s9 + $0x40] sm:$0xff]  ;;  %v269_v16 = vmul.f32 %v500_v4, %v249_v6 }
  0x2f   : > { %v253_v17 = vld [vmem:[%s680_s9 + $0x48] sm:$0xff]  ;;  %v254_v18 = vld [vmem:[%s680_s9 + $0x50] sm:$0xff]  ;;  %v270_v19 = vmul.f32 %v500_v4, %v250_v11  ;;  %v284_v20 = vadd.f32 %v694_v10, %v264_v7  ;;  %v285_v21 = vadd.f32 %v694_v10, %v265_v8  ;;  %v286_v22 = vadd.f32 %v694_v10, %v266_v9  ;;  %v255_v28 = vld [vmem:[%s680_s9 + $0x58] sm:$0xff] }
  0x30   : > { %v271_v23 = vmul.f32 %v500_v4, %v251_v13  ;;  %v287_v24 = vadd.f32 %v694_v10, %v267_v12  ;;  %v272_v29 = vmul.f32 %v500_v4, %v252_v15  ;;  %v288_v30 = vadd.f32 %v694_v10, %v268_v14  ;;  %v256_v32 = vld [vmem:[%s680_s9 + $0x60] sm:$0xff]  ;;  %v257_v33 = vld [vmem:[%s680_s9 + $0x68] sm:$0xff]  ;;  %v258_v38 = vld [vmem:[%s680_s9 + $0x70] sm:$0xff] }
  0x31   : > { %v273_v34 = vmul.f32 %v500_v4, %v253_v17  ;;  %v274_v35 = vmul.f32 %v500_v4, %v254_v18  ;;  %v289_v36 = vadd.f32 %v694_v10, %v269_v16  ;;  %v290_v39 = vadd.f32 %v694_v10, %v270_v19  ;;  %v259_v48 = vld [vmem:[%s680_s9 + $0x78] sm:$0xff]  ;;  %v310_v2 = vld [vmem:[%s664_s30 + $0x50] sm:$0xff]  ;;  %v312_v12 = vld [vmem:[%s664_s30 + $0x60] sm:$0xff] }
  0x32   : > { %v316_v41 = vadd.f32 %v300_v25, %v284_v20  ;;  %v317_v42 = vadd.f32 %v301_v26, %v285_v21  ;;  %v318_v43 = vadd.f32 %v302_v27, %v286_v22  ;;  %v275_v44 = vmul.f32 %v500_v4, %v255_v28  ;;  %v311_v7 = vld [vmem:[%s664_s30 + $0x58] sm:$0xff]  ;;  %v313_v15 = vld [vmem:[%s664_s30 + $0x68] sm:$0xff]  ;;  %v314_v19 = vld [vmem:[%s664_s30 + $0x70] sm:$0xff] }
  0x33   : > { %v291_v45 = vadd.f32 %v694_v10, %v271_v23  ;;  %v319_v47 = vadd.f32 %v303_v31, %v287_v24  ;;  %v276_v49 = vmul.f32 %v500_v4, %v256_v32  ;;  %v277_v50 = vmul.f32 %v500_v4, %v257_v33  ;;  %v315_v22 = vld [vmem:[%s664_s30 + $0x78] sm:$0xff] }
  0x34   : > { %v292_v51 = vadd.f32 %v694_v10, %v272_v29  ;;  %v320_v53 = vadd.f32 %v304_v37, %v288_v30  ;;  %v278_v54 = vmul.f32 %v500_v4, %v258_v38  ;;  %v293_v55 = vadd.f32 %v694_v10, %v273_v34 }
  0x35   : > { %v294_v56 = vadd.f32 %v694_v10, %v274_v35  ;;  %v321_v58 = vadd.f32 %v305_v40, %v289_v36  ;;  %v322_v60 = vadd.f32 %v306_v46, %v290_v39  ;;  %v332_v61 = vmax.f32 %v316_v41, 0.0 }
  0x36   : > { %v333_v62 = vmax.f32 %v317_v42, 0.0  ;;  %v334_v63 = vmax.f32 %v318_v43, 0.0  ;;  %v279_v0 = vmul.f32 %v500_v4, %v259_v48  ;;  %v295_v1 = vadd.f32 %v694_v10, %v275_v44 }
  0x37   : > { %v323_v3 = vadd.f32 %v307_v52, %v291_v45  ;;  %v335_v5 = vmax.f32 %v319_v47, 0.0  ;;  %v296_v6 = vadd.f32 %v694_v10, %v276_v49  ;;  %v324_v8 = vadd.f32 %v308_v57, %v292_v51  ;;  %348 = vst [vmem:[%s728_s13] sm:$0xff] %v332_v61 }
  0x38   : > { %v336_v9 = vmax.f32 %v320_v53, 0.0  ;;  %v297_v11 = vadd.f32 %v694_v10, %v277_v50  ;;  %v325_v4 = vadd.f32 %v309_v59, %v293_v55  ;;  %v337_v13 = vmax.f32 %v321_v58, 0.0  ;;  %349 = vst [vmem:[%s728_s13 + $0x8] sm:$0xff] %v333_v62 }
  0x39   : > { %v298_v14 = vadd.f32 %v694_v10, %v278_v54  ;;  %v326_v16 = vadd.f32 %v310_v2, %v294_v56  ;;  %v338_v17 = vmax.f32 %v322_v60, 0.0  ;;  %350 = vst [vmem:[%s728_s13 + $0x10] sm:$0xff] %v334_v63  ;;  %v299_v18 = vadd.f32 %v694_v10, %v279_v0 }
  0x3a   : > { %v327_v20 = vadd.f32 %v311_v7, %v295_v1  ;;  %v339_v21 = vmax.f32 %v323_v3, 0.0  ;;  %351 = vst [vmem:[%s728_s13 + $0x18] sm:$0xff] %v335_v5  ;;  %v328_v23 = vadd.f32 %v312_v12, %v296_v6  ;;  %v340_v24 = vmax.f32 %v324_v8, 0.0 }
  0x3b   : > { %352 = vst [vmem:[%s728_s13 + $0x20] sm:$0xff] %v336_v9  ;;  %v329_v25 = vadd.f32 %v313_v15, %v297_v11  ;;  %v341_v26 = vmax.f32 %v325_v4, 0.0  ;;  %v330_v27 = vadd.f32 %v314_v19, %v298_v14  ;;  %v342_v10 = vmax.f32 %v326_v16, 0.0 }
  0x3c   : > { %353 = vst [vmem:[%s728_s13 + $0x28] sm:$0xff] %v337_v13  ;;  %v331_v28 = vadd.f32 %v315_v22, %v299_v18  ;;  %v343_v29 = vmax.f32 %v327_v20, 0.0  ;;  %v344_v30 = vmax.f32 %v328_v23, 0.0 }
  0x3d   : > { %354 = vst [vmem:[%s728_s13 + $0x30] sm:$0xff] %v338_v17  ;;  %v345_v31 = vmax.f32 %v329_v25, 0.0  ;;  %v346_v32 = vmax.f32 %v330_v27, 0.0 }
  0x3e   : > { %355 = vst [vmem:[%s728_s13 + $0x38] sm:$0xff] %v339_v21  ;;  %v347_v33 = vmax.f32 %v331_v28, 0.0 }
  0x3f   : > { %356 = vst [vmem:[%s728_s13 + $0x40] sm:$0xff] %v340_v24 }
  0x40   : > { %357 = vst [vmem:[%s728_s13 + $0x48] sm:$0xff] %v341_v26 }
  0x41   : > { %358 = vst [vmem:[%s728_s13 + $0x50] sm:$0xff] %v342_v10 }
  0x42   : > { %359 = vst [vmem:[%s728_s13 + $0x58] sm:$0xff] %v343_v29 }
  0x43   : > { %360 = vst [vmem:[%s728_s13 + $0x60] sm:$0xff] %v344_v30 }
  0x44   : > { %361 = vst [vmem:[%s728_s13 + $0x68] sm:$0xff] %v345_v31 }
  0x45   : > { %362 = vst [vmem:[%s728_s13 + $0x70] sm:$0xff] %v346_v32 }
  0x46   : > { %363 = vst [vmem:[%s728_s13 + $0x78] sm:$0xff] %v347_v33 }
  0x47 PF: > { %p14_p7 = scmp.ge.s32.totalorder %s615_s20, 6   ;;  %s782_s15 = smov %s558_s16 }
  0x48   : > { %s783_s16 = smov %s562_s17  ;;  %s784_s17 = smov %s625_s23 }
  0x49   : > { %s785_s18 = smov %s615_s20  ;;  %16 = sbr.rel (!%p14_p7) target bundleno = 3 (0x3), region = 79 }
  0x4e   :  { %386 = vsyncpa [#allocation3], 1 }
  0x4f   :  { %388 = vsyncpa [#allocation3 + $0x1], 1 }

// kernel: bottleneck_forward.5
= control target key start
LH: loop header
LB: loop body
LE: loop exit
PB: predicated region body
PF: predicated region fallthrough
CT: control target
= control target key end

     0   :  { %s2719_s18 = smov 0   ;;  %s3618_s0 = inlined_call_operand.vmem [shape: f32[2,16,16,32], index: 0, kind: input, shape index: {}]   ;;  %s3619_s1 = inlined_call_operand.vmem [shape: f32[1,32], index: 1, kind: input, shape index: {}]   ;;  %s3620_s2 = inlined_call_operand.vmem [shape: f32[1,32], index: 2, kind: input, shape index: {}]   ;;  %s3621_s3 = inlined_call_operand.vmem [shape: bf16[3,96,32], index: 3, kind: input, shape index: {}]   ;;  %s3622_s4 = inlined_call_operand.vmem [shape: f32[2,16,16,32], index: 4, kind: output, shape index: {0}]   ;;  %s3623_s5 = inlined_call_operand.vmem [shape: f32[2,2,32], index: 5, kind: output, shape index: {1}]  }
   0x1 LB: > { %s2231_s19 = sadd.s32 4294967295, %s2684_s18   ;;  %p2235_p0 = scmp.ge.s32.totalorder %s2684_s18, 1  ;;  %s2684_s18 = sphi %s2719_s18, %s16_s18  }
   0x2   : > { %p190_p1 = scmp.lt.s32.totalorder %s2684_s18, 3 }
   0x4   : > { %p191_p2 = pnand %p2235_p0, %p190_p1 }
   0x5   : > { %p222_p3 = scmp.lt.s32.totalorder (!%p191_p2), %s2231_s19, 1  ;;  %s2686_s28 = smov (!%p191_p2), 32  }
   0x6   : > { %194 = sbr.rel (%p191_p2) target bundleno = 517 (0x205), region = 36  ;;  %s2687_s29 = smov (!%p191_p2), 64  }
   0xb   : > { %s3641_s19 = smov (!%p222_p3, %s2231_s19), 1  ;;  %v2732_v0 = vld [vmem:[%s3619_s1] ss:$0 sm:$0xff]  ;;  %vm680_vm0 = vcmask 1047552   ;;  %vm681_vm1 = vsmask.f32 7424 }
   0xc   : > { %s2579_s22 = sshll.u32 %s3641_s19, 8  ;;  %v2745_v1 = vld [vmem:[%s3620_s2] ss:$0 sm:$0xff]  ;;  %vm2803_vm2 = vmand %vm680_vm0, %vm681_vm1  ;;  %vm861_vm3 = vcmask 781312   ;;  %vm1217_vm4 = vcmask 785408   ;;  %vm613_vm5 = vcmask 1040384  }
   0xd   : > { %s2740_s25 = scalar_lea.vmem %s3618_s0, %s2579_s22  ;;  %vm614_vm6 = vsmask.f32 256  ;;  %vm779_vm8 = vcmask 261120   ;;  %vm828_vm9 = vcmask 523264   ;;  %vm2143_vm10 = vcmask 254976  }
   0xe   : > { %v239_v2 = vld [vmem:[%s2740_s25 + $0x10] sm:$0xff]  ;;  %v240_v3 = vld [vmem:[%s2740_s25 + $0x18] sm:$0xff]  ;;  %v237_v4 = vld [vmem:[%s2740_s25] sm:$0xff] }
   0xf   : > { %v275_v5 = vmul.f32 %v2732_v0, %v239_v2  ;;  %v276_v6 = vmul.f32 %v2732_v0, %v240_v3  ;;  %v238_v7 = vld [vmem:[%s2740_s25 + $0x8] sm:$0xff]  ;;  %v273_v8 = vmul.f32 %v2732_v0, %v237_v4  ;;  %v241_v9 = vld [vmem:[%s2740_s25 + $0x20] sm:$0xff]  ;;  %v263_v40 = vld [vmem:[%s2740_s25 + $0xd0] sm:$0xff] }
  0x10   : > { %v242_v10 = vld [vmem:[%s2740_s25 + $0x28] sm:$0xff]  ;;  %v274_v11 = vmul.f32 %v2732_v0, %v238_v7  ;;  %v277_v12 = vmul.f32 %v2732_v0, %v241_v9  ;;  %v261_v14 = vld [vmem:[%s2740_s25 + $0xc0] sm:$0xff]  ;;  %v264_v41 = vld [vmem:[%s2740_s25 + $0xd8] sm:$0xff]  ;;  %v299_v52 = vmul.f32 %v2732_v0, %v263_v40 }
  0x11   : > { %v278_v13 = vmul.f32 %v2732_v0, %v242_v10  ;;  %v262_v15 = vld [vmem:[%s2740_s25 + $0xc8] sm:$0xff]  ;;  %v311_v16 = vadd.f32 %v2745_v1, %v275_v5  ;;  %v312_v17 = vadd.f32 %v2745_v1, %v276_v6  ;;  %v309_v18 = vadd.f32 %v2745_v1, %v273_v8  ;;  %v243_v61 = vld [vmem:[%s2740_s25 + $0x30] sm:$0xff]  ;;  %v244_v7 = vld [vmem:[%s2740_s25 + $0x38] sm:$0xff] }
  0x12   : > { %v297_v19 = vmul.f32 %v2732_v0, %v261_v14  ;;  %v310_v20 = vadd.f32 %v2745_v1, %v274_v11  ;;  %v313_v21 = vadd.f32 %v2745_v1, %v277_v12  ;;  %v298_v23 = vmul.f32 %v2732_v0, %v262_v15  ;;  %vm3146_vm7 = vmand %vm613_vm5, %vm614_vm6 }
  0x13   : > { %v314_v22 = vadd.f32 %v2745_v1, %v278_v13  ;;  %v343_v24 = vmax.f32 %v311_v16, 0.0  ;;  %v344_v25 = vmax.f32 %v312_v17, 0.0  ;;  %v341_v26 = vmax.f32 %v309_v18, 0.0 }
  0x14   : > { %v333_v27 = vadd.f32 %v2745_v1, %v297_v19  ;;  %v342_v28 = vmax.f32 %v310_v20, 0.0  ;;  %v345_v29 = vmax.f32 %v313_v21, 0.0  ;;  %v334_v31 = vadd.f32 %v2745_v1, %v298_v23  ;;  %v245_v19 = vld [vmem:[%s2740_s25 + $0x40] sm:$0xff] }
  0x15   : > { %v346_v30 = vmax.f32 %v314_v22, 0.0  ;;  %v375_v32 = vpack.c.bf16 %v343_v24, %v343_v24  ;;  %v376_v33 = vpack.c.bf16 %v344_v25, %v344_v25  ;;  %v373_v34 = vpack.c.bf16 %v341_v26, %v341_v26  ;;  %v246_v24 = vld [vmem:[%s2740_s25 + $0x48] sm:$0xff]  ;;  %v265_v25 = vld [vmem:[%s2740_s25 + $0xe0] sm:$0xff] }
  0x16   : > { %v365_v35 = vmax.f32 %v333_v27, 0.0  ;;  %v374_v36 = vpack.c.bf16 %v342_v28, %v342_v28  ;;  %v377_v37 = vpack.c.bf16 %v345_v29, %v345_v29  ;;  %v366_v39 = vmax.f32 %v334_v31, 0.0  ;;  %v266_v26 = vld [vmem:[%s2740_s25 + $0xe8] sm:$0xff] }
  0x17   : > { %v378_v38 = vpack.c.bf16 %v346_v30, %v346_v30  ;;  %v439_v42 = vunpack.c.l.b16 %v375_v32  ;;  %v440_v43 = vunpack.c.l.b16 %v376_v33  ;;  %v437_v44 = vunpack.c.l.b16 %v373_v34 }
  0x18   : > { %v397_v45 = vpack.c.bf16 %v365_v35, %v365_v35  ;;  %v438_v46 = vunpack.c.l.b16 %v374_v36  ;;  %v441_v47 = vunpack.c.l.b16 %v377_v37  ;;  %v398_v49 = vpack.c.bf16 %v366_v39, %v366_v39 }
  0x19   : > { %v442_v48 = vunpack.c.l.b16 %v378_v38  ;;  %v2773_v50 = vpack.c.b16 %v440_v43, %v439_v42  ;;  %v300_v53 = vmul.f32 %v2732_v0, %v264_v41  ;;  %v335_v59 = vadd.f32 %v2745_v1, %v299_v52 }
  0x1a   : > { %v461_v51 = vunpack.c.l.b16 %v397_v45  ;;  %v2777_v54 = vpack.c.b16 %v438_v46, %v437_v44  ;;  %v462_v56 = vunpack.c.l.b16 %v398_v49  ;;  %v279_v11 = vmul.f32 %v2732_v0, %v243_v61 }
  0x1b   : > { %v2779_v55 = vpack.c.b16 %v442_v48, %v441_v47  ;;  %701 = vrot.lane.b32.xlu0 %v2773_v50, %s2686_s28  ;;  %v493_v57 = vshrl.u32 %v2773_v50, 16  ;;  %v496_v58 = vshll.u32 %v2773_v50, 16  ;;  %v336_v60 = vadd.f32 %v2745_v1, %v300_v53 }
  0x1c   : > { %699 = vrot.lane.b32.xlu1 %v2777_v54, %s2686_s28  ;;  %v486_v62 = vshrl.u32 %v2777_v54, 16  ;;  %v489_v63 = vshll.u32 %v2777_v54, 16  ;;  %v2798_v5 = vpack.c.b16 %v462_v56, %v461_v51  ;;  %v367_v6 = vmax.f32 %v335_v59, 0.0  ;;  %v247_v51 = vld [vmem:[%s2740_s25 + $0x50] sm:$0xff] }
  0x1d   : > { %v503_v2 = vshll.u32 %v2779_v55, 16  ;;  %703 = vrot.lane.b32.xlu2 %v2779_v55, %s2686_s28  ;;  %v634_v3 = vrot.slane %v496_v58, 1  ;;  %v500_v4 = vshrl.u32 %v2779_v55, 16  ;;  %v368_v15 = vmax.f32 %v336_v60, 0.0  ;;  %v248_v60 = vld [vmem:[%s2740_s25 + $0x58] sm:$0xff] }
  0x1e   : > { %v632_v9 = vrot.slane %v489_v63, 1  ;;  %v570_v13 = vshrl.u32 %v2798_v5, 16  ;;  %v573_v14 = vshll.u32 %v2798_v5, 16  ;;  %v399_v17 = vpack.c.bf16 %v367_v6, %v367_v6 }
  0x1f   : > { %v636_v10 = vrot.slane %v503_v2, 1  ;;  %v635_v12 = vor.u32 %v634_v3, %v493_v57  ;;  %v280_v18 = vmul.f32 %v2732_v0, %v244_v7  ;;  %v400_v23 = vpack.c.bf16 %v368_v15, %v368_v15 }
  0x20   : > { %v633_v16 = vor.u32 %v632_v9, %v486_v62  ;;  %v656_v22 = vrot.slane %v573_v14, 1  ;;  %v463_v28 = vunpack.c.l.b16 %v399_v17  ;;  %v315_v29 = vadd.f32 %v2745_v1, %v279_v11  ;;  %v267_v17 = vld [vmem:[%s2740_s25 + $0xf0] sm:$0xff] }
  0x21   : > { %v684_v20 = vsel %vm2803_vm2, %v635_v12, 0  ;;  %v637_v21 = vor.u32 %v636_v10, %v500_v4  ;;  %v464_v31 = vunpack.c.l.b16 %v400_v23  ;;  %v316_v32 = vadd.f32 %v2745_v1, %v280_v18 }
  0x22   : > { %v683_v27 = vsel %vm2803_vm2, %v633_v16, 0  ;;  %v657_v30 = vor.u32 %v656_v22, %v570_v13  ;;  %v281_v33 = vmul.f32 %v2732_v0, %v245_v19  ;;  %v347_v34 = vmax.f32 %v315_v29, 0.0  ;;  %v268_v22 = vld [vmem:[%s2740_s25 + $0xf8] sm:$0xff] }
  0x23   : > { %749 = vrot.lane.b32.xlu0 %v684_v20, %s2687_s29  ;;  %v282_v35 = vmul.f32 %v2732_v0, %v246_v24  ;;  %v301_v36 = vmul.f32 %v2732_v0, %v265_v25  ;;  %v302_v37 = vmul.f32 %v2732_v0, %v266_v26  ;;  %v685_v38 = vsel %vm2803_vm2, %v637_v21, 0 }
  0x24   : > { %747 = vrot.lane.b32.xlu1 %v683_v27, %s2687_s29  ;;  %v2845_v39 = vpack.c.b16 %v464_v31, %v463_v28  ;;  %v348_v40 = vmax.f32 %v316_v32, 0.0  ;;  %v317_v41 = vadd.f32 %v2745_v1, %v281_v33  ;;  %v379_v42 = vpack.c.bf16 %v347_v34, %v347_v34 }
  0x25   : > { %723 = vrot.lane.b32.xlu2 %v2798_v5, %s2686_s28  ;;  %v318_v43 = vadd.f32 %v2745_v1, %v282_v35  ;;  %v337_v44 = vadd.f32 %v2745_v1, %v301_v36  ;;  %v338_v45 = vadd.f32 %v2745_v1, %v302_v37  ;;  %v695_v46 = vsel %vm2803_vm2, %v657_v30, 0 }
  0x26   : > { %v380_v47 = vpack.c.bf16 %v348_v40, %v348_v40  ;;  %v349_v48 = vmax.f32 %v317_v41, 0.0  ;;  %v580_v49 = vshll.u32 %v2845_v39, 16  ;;  %v443_v52 = vunpack.c.l.b16 %v379_v42  ;;  %v259_v41 = vld [vmem:[%s2740_s25 + $0xb0] sm:$0xff] }
  0x27   : > { %v350_v53 = vmax.f32 %v318_v43, 0.0  ;;  %v369_v56 = vmax.f32 %v337_v44, 0.0  ;;  %v370_v59 = vmax.f32 %v338_v45, 0.0  ;;  %v577_v6 = vshrl.u32 %v2845_v39, 16  ;;  %v260_v44 = vld [vmem:[%s2740_s25 + $0xb8] sm:$0xff] }
  0x28   : > { %v444_v61 = vunpack.c.l.b16 %v380_v47  ;;  %v381_v3 = vpack.c.bf16 %v349_v48, %v349_v48  ;;  %v658_v7 = vrot.slane %v580_v49, 1  ;;  %v283_v12 = vmul.f32 %v2732_v0, %v247_v51  ;;  %v249_v51 = vld [vmem:[%s2740_s25 + $0x60] sm:$0xff] }
  0x29   : > { %v382_v9 = vpack.c.bf16 %v350_v53, %v350_v53  ;;  %v401_v10 = vpack.c.bf16 %v369_v56, %v369_v56  ;;  %v402_v11 = vpack.c.bf16 %v370_v59, %v370_v59  ;;  %v284_v16 = vmul.f32 %v2732_v0, %v248_v60  ;;  %v2904_v60 = vld [vmem:[%s3621_s3 + $0x28] sm:$0xff] }
  0x2a   : > { %v2861_v15 = vpack.c.b16 %v444_v61, %v443_v52  ;;  %v445_v18 = vunpack.c.l.b16 %v381_v3  ;;  %v319_v21 = vadd.f32 %v2745_v1, %v283_v12  ;;  %v659_v27 = vor.u32 %v658_v7, %v577_v6  ;;  %1521 = vmatpush.bf16.msra.mxu1 %v2904_v60 }
  0x2b   : > { %751 = vrot.lane.b32.xlu0 %v685_v38, %s2687_s29  ;;  %v465_v19 = vunpack.c.l.b16 %v401_v10  ;;  %v466_v20 = vunpack.c.l.b16 %v402_v11  ;;  %v446_v25 = vunpack.c.l.b16 %v382_v9  ;;  %v320_v26 = vadd.f32 %v2745_v1, %v284_v16  ;;  %v250_v9 = vld [vmem:[%s2740_s25 + $0x68] sm:$0xff] }
  0x2c   : > { %771 = vrot.lane.b32.xlu1 %v695_v46, %s2687_s29  ;;  %v507_v23 = vshrl.u32 %v2861_v15, 16  ;;  %v510_v24 = vshll.u32 %v2861_v15, 16  ;;  %v351_v28 = vmax.f32 %v319_v21, 0.0  ;;  %v303_v29 = vmul.f32 %v2732_v0, %v267_v17  ;;  %v2917_v17 = vld [vmem:[%s3621_s3 + $0x20] sm:$0xff] }
  0x2d   : > { %705 = vrot.lane.b32.xlu2 %v2861_v15, %s2686_s28  ;;  %v2878_v31 = vpack.c.b16 %v466_v20, %v465_v19  ;;  %v352_v32 = vmax.f32 %v320_v26, 0.0  ;;  %v304_v33 = vmul.f32 %v2732_v0, %v268_v22  ;;  %v2884_v37 = vpack.c.b16 %v446_v25, %v445_v18 }
  0x2e   : > { %v638_v30 = vrot.slane %v510_v24, 1  ;;  %v383_v34 = vpack.c.bf16 %v351_v28, %v351_v28  ;;  %v339_v35 = vadd.f32 %v2745_v1, %v303_v29  ;;  %v696_v42 = vsel %vm2803_vm2, %v659_v27, 0  ;;  %1522 = vmatpush.bf16.msra.mxu1 %v2917_v17 }
  0x2f   : > { %v384_v38 = vpack.c.bf16 %v352_v32, %v352_v32  ;;  %v340_v40 = vadd.f32 %v2745_v1, %v304_v33  ;;  %v587_v46 = vshll.u32 %v2878_v31, 16  ;;  %v514_v48 = vshrl.u32 %v2884_v37, 16  ;;  %v251_v32 = vld [vmem:[%s2740_s25 + $0x70] sm:$0xff] }
  0x30   : > { %v639_v36 = vor.u32 %v638_v30, %v507_v23  ;;  %v371_v43 = vmax.f32 %v339_v35, 0.0  ;;  %v447_v52 = vunpack.c.l.b16 %v383_v34  ;;  %v517_v56 = vshll.u32 %v2884_v37, 16 }
  0x31   : > { %v372_v47 = vmax.f32 %v340_v40, 0.0  ;;  %v295_v59 = vmul.f32 %v2732_v0, %v259_v41  ;;  %v448_v61 = vunpack.c.l.b16 %v384_v38  ;;  %v296_v7 = vmul.f32 %v2732_v0, %v260_v44  ;;  %v252_v41 = vld [vmem:[%s2740_s25 + $0x78] sm:$0xff] }
  0x32   : > { %v686_v45 = vsel %vm2803_vm2, %v639_v36, 0  ;;  %v403_v53 = vpack.c.bf16 %v371_v43, %v371_v43  ;;  %v285_v10 = vmul.f32 %v2732_v0, %v249_v51  ;;  %v640_v12 = vrot.slane %v517_v56, 1 }
  0x33   : > { %725 = vrot.lane.b32.xlu0 %v2845_v39, %s2686_s28  ;;  %v404_v3 = vpack.c.bf16 %v372_v47, %v372_v47  ;;  %v331_v16 = vadd.f32 %v2745_v1, %v295_v59  ;;  %v584_v18 = vshrl.u32 %v2878_v31, 16  ;;  %v660_v19 = vrot.slane %v587_v46, 1  ;;  %v2948_v47 = vld [vmem:[%s3621_s3 + $0x18] sm:$0xff] }
  0x34   : > { %753 = vrot.lane.b32.xlu1 %v686_v45, %s2687_s29  ;;  %v467_v11 = vunpack.c.l.b16 %v403_v53  ;;  %v332_v21 = vadd.f32 %v2745_v1, %v296_v7  ;;  %v641_v22 = vor.u32 %v640_v12, %v514_v48  ;;  %v286_v26 = vmul.f32 %v2732_v0, %v250_v9  ;;  %1523 = vmatpush.bf16.msra.mxu1 %v2948_v47 }
  0x35   : > { %773 = vrot.lane.b32.xlu2 %v696_v42, %s2687_s29  ;;  %v468_v20 = vunpack.c.l.b16 %v404_v3  ;;  %v363_v25 = vmax.f32 %v331_v16, 0.0  ;;  %v321_v27 = vadd.f32 %v2745_v1, %v285_v10  ;;  %v2927_v28 = vpack.c.b16 %v448_v61, %v447_v52  ;;  %v2958_v3 = vld [vmem:[%s3621_s3 + $0x10] sm:$0xff] }
  0x36   : > { %v364_v30 = vmax.f32 %v332_v21, 0.0  ;;  %v687_v33 = vsel %vm2803_vm2, %v641_v22, 0  ;;  %v322_v34 = vadd.f32 %v2745_v1, %v286_v26  ;;  %v661_v36 = vor.u32 %v660_v19, %v584_v18 }
  0x37   : > { %v2929_v29 = vpack.c.b16 %v468_v20, %v467_v11  ;;  %v353_v35 = vmax.f32 %v321_v27, 0.0  ;;  %v524_v38 = vshll.u32 %v2927_v28, 16  ;;  %v395_v40 = vpack.c.bf16 %v363_v25, %v363_v25 }
  0x38   : > { %v396_v42 = vpack.c.bf16 %v364_v30, %v364_v30  ;;  %v354_v43 = vmax.f32 %v322_v34, 0.0  ;;  %v287_v45 = vmul.f32 %v2732_v0, %v251_v32  ;;  %v288_v59 = vmul.f32 %v2732_v0, %v252_v41  ;;  %1524 = vmatpush.bf16.msra.mxu1 %v2958_v3 }
  0x39   : > { %v385_v44 = vpack.c.bf16 %v353_v35, %v353_v35  ;;  %v594_v51 = vshll.u32 %v2929_v29, 16  ;;  %v697_v7 = vsel %vm2803_vm2, %v661_v36, 0  ;;  %v521_v9 = vshrl.u32 %v2927_v28, 16 }
  0x3a   : > { %v386_v52 = vpack.c.bf16 %v354_v43, %v354_v43  ;;  %v323_v61 = vadd.f32 %v2745_v1, %v287_v45  ;;  %v642_v10 = vrot.slane %v524_v38, 1  ;;  %v459_v11 = vunpack.c.l.b16 %v395_v40 }
  0x3b   : > { %707 = vrot.lane.b32.xlu0 %v2884_v37, %s2686_s28  ;;  %v449_v53 = vunpack.c.l.b16 %v385_v44  ;;  %v460_v12 = vunpack.c.l.b16 %v396_v42  ;;  %v324_v19 = vadd.f32 %v2745_v1, %v288_v59  ;;  %v591_v21 = vshrl.u32 %v2929_v29, 16 }
  0x3c   : > { %727 = vrot.lane.b32.xlu1 %v2878_v31, %s2686_s28  ;;  %v450_v16 = vunpack.c.l.b16 %v386_v52  ;;  %v355_v20 = vmax.f32 %v323_v61, 0.0  ;;  %v662_v22 = vrot.slane %v594_v51, 1  ;;  %v643_v30 = vor.u32 %v642_v10, %v521_v9 }
  0x3d   : > { %755 = vrot.lane.b32.xlu2 %v687_v33, %s2687_s29  ;;  %v356_v26 = vmax.f32 %v324_v19, 0.0  ;;  %v2977_v32 = vpack.c.b16 %v460_v12, %v459_v11 }
  0x3e   : > { %v2969_v25 = vpack.c.b16 %v450_v16, %v449_v53  ;;  %v387_v27 = vpack.c.bf16 %v355_v20, %v355_v20  ;;  %v663_v34 = vor.u32 %v662_v22, %v591_v21  ;;  %v688_v42 = vsel %vm2803_vm2, %v643_v30, 0 }
  0x3f   : > { %v388_v33 = vpack.c.bf16 %v356_v26, %v356_v26  ;;  %v3628_v41 = vshll.u32 %v2977_v32, 16  ;;  %v563_v53 = vshrl.u32 %v2977_v32, 16  ;;  %v253_v26 = vld [vmem:[%s2740_s25 + $0x80] sm:$0xff] }
  0x40   : > { %v3629_v35 = vshll.u32 %v2969_v25, 16  ;;  %v451_v36 = vunpack.c.l.b16 %v387_v27  ;;  %v698_v43 = vsel %vm2803_vm2, %v663_v34, 0  ;;  %v528_v44 = vshrl.u32 %v2969_v25, 16  ;;  %v254_v27 = vld [vmem:[%s2740_s25 + $0x88] sm:$0xff] }
  0x41   : > { %v452_v40 = vunpack.c.l.b16 %v388_v33  ;;  %v654_v59 = vrot.slane %v3628_v41, 1  ;;  %v289_v30 = vmul.f32 %v2732_v0, %v253_v26  ;;  %v290_v33 = vmul.f32 %v2732_v0, %v254_v27  ;;  %v2623_v26 = vld [vmem:[%s3621_s3 + $0x50] sm:$0xff]  ;;  %v3059_v27 = vld [vmem:[%s3621_s3] sm:$0xff] }
  0x42   : > { %v644_v45 = vrot.slane %v3629_v35, 1 }
  0x43   : > { %775 = vrot.lane.b32.xlu0 %v697_v7, %s2687_s29  ;;  %v2992_v52 = vpack.c.b16 %v452_v40, %v451_v36  ;;  %v655_v10 = vor.u32 %v654_v59, %v563_v53  ;;  %v325_v34 = vadd.f32 %v2745_v1, %v289_v30  ;;  %v326_v36 = vadd.f32 %v2745_v1, %v290_v33  ;;  %v3064_v30 = vld [vmem:[%s3621_s3 + $0x80] sm:$0xff] }
  0x44   : > { %709 = vrot.lane.b32.xlu1 %v2927_v28, %s2686_s28  ;;  %v645_v61 = vor.u32 %v644_v45, %v528_v44 }
  0x45   : > { %729 = vrot.lane.b32.xlu2 %v2929_v29, %s2686_s28  ;;  %v3626_v7 = vshll.u32 %v2992_v52, 16  ;;  %v3627_v12 = vshrl.u32 %v2992_v52, 16  ;;  %v694_v19 = vsel %vm2803_vm2, %v655_v10, 0  ;;  %v357_v40 = vmax.f32 %v325_v34, 0.0 }
  0x46   : > { %v689_v11 = vsel %vm2803_vm2, %v645_v61, 0 }
  0x47   : > { %v646_v16 = vrot.slane %v3626_v7, 1  ;;  %v257_v7 = vld [vmem:[%s2740_s25 + $0xa0] sm:$0xff] }
  0x49   : > { %v647_v20 = vor.u32 %v646_v16, %v3627_v12  ;;  %v3038_v16 = vld [vmem:[%s3621_s3 + $0x8] sm:$0xff]  ;;  %v293_v12 = vmul.f32 %v2732_v0, %v257_v7  ;;  %v495_v7 = vrot.slane %v493_v57, 7  ;;  %v502_v57 = vrot.slane %v500_v4, 7 }
  0x4a   : > { %1525 = vmatpush.bf16.msra.mxu1 %v3038_v16 }
  0x4b   : > { %757 = vrot.lane.b32.xlu0 %v688_v42, %s2687_s29  ;;  %v690_v22 = vsel %vm2803_vm2, %v647_v20, 0  ;;  %v358_v42 = vmax.f32 %v326_v36, 0.0  ;;  %v2688_v20 = vmov 0  }
  0x4c   : > { %777 = vrot.lane.b32.xlu1 %v698_v43, %s2687_s29  ;;  %v389_v43 = vpack.c.bf16 %v357_v40, %v357_v40  ;;  %862 = vst.msk [vmem:[#allocation2] sm:$0xf] %vm861_vm3, %v2688_v20 }
  0x4d   : > { %711 = vrot.lane.b32.xlu2 %v2969_v25, %s2686_s28  ;;  %v390_v45 = vpack.c.bf16 %v358_v42, %v358_v42  ;;  %863 = vst.msk [vmem:[#allocation2 + $0x4] sm:$0xf] %vm861_vm3, %v2688_v20 }
  0x4e   : > { %v453_v59 = vunpack.c.l.b16 %v389_v43  ;;  %865 = vst.msk [vmem:[#allocation2 + $0x88] sm:$0xf] %vm861_vm3, %v2688_v20  ;;  %1526 = vmatpush.bf16.msra.mxu1 %v3059_v27  ;;  %v2622_v43 = vld [vmem:[%s3621_s3 + $0x48] sm:$0xff] }
  0x4f   : > { %v454_v61 = vunpack.c.l.b16 %v390_v45  ;;  %866 = vst.msk [vmem:[#allocation2 + $0x8c] sm:$0xf] %vm861_vm3, %v2688_v20  ;;  %v3084_v45 = vld [vmem:[%s3621_s3 + $0x78] sm:$0xff] }
  0x51   : > { %v3030_v10 = vpack.c.b16 %v454_v61, %v453_v59  ;;  %v255_v59 = vld [vmem:[%s2740_s25 + $0x90] sm:$0xff]  ;;  %v256_v61 = vld [vmem:[%s2740_s25 + $0x98] sm:$0xff] }
  0x52   : > { %v292_v20 = vmul.f32 %v2732_v0, %v256_v61  ;;  %v3108_v61 = vld [vmem:[%s3621_s3 + $0x68] sm:$0xff] }
  0x53   : > { %721 = vrot.lane.b32.xlu0 %v2977_v32, %s2686_s28  ;;  %v3625_v33 = vshrl.u32 %v3030_v10, 16 }
  0x54   : > { %759 = vrot.lane.b32.xlu1 %v689_v11, %s2687_s29  ;;  %v2624_v11 = vld [vmem:[%s3621_s3 + $0x58] sm:$0xff]  ;;  %v2581_v42 = vld [vmem:[#allocation2] sm:$0xff] }
  0x55   : > { %769 = vrot.lane.b32.xlu2 %v694_v19, %s2687_s29  ;;  %v3043_v19 = vld [vmem:[%s3621_s3 + $0x88] sm:$0xff]  ;;  %1268 = vmatpush.bf16.msra.mxu0 %v2624_v11 }
  0x56   : > { %1820 = vmatpush.bf16.msra.mxu2 %v3043_v19  ;;  %2647 = vmatpush.bf16.msra.mxu3 %v2624_v11  ;;  %v291_v11 = vmul.f32 %v2732_v0, %v255_v59  ;;  %v2620_v59 = vld [vmem:[%s3621_s3 + $0x38] sm:$0xff] }
  0x57   : > { %2445 = vmatmul.msk.bf16.vlgmr.msra.gmra.mxu1 %vm1217_vm4, %v2581_v42 }
  0x59   : > { %1269 = vmatpush.bf16.msra.mxu0 %v2623_v26 }
  0x5a   : > { %1821 = vmatpush.bf16.msra.mxu2 %v3064_v30  ;;  %2648 = vmatpush.bf16.msra.mxu3 %v2623_v26  ;;  %v2621_v26 = vld [vmem:[%s3621_s3 + $0x40] sm:$0xff] }
  0x5b   : > { %713 = vrot.lane.b32.xlu0 %v2992_v52, %s2686_s28 }
  0x5c   : > { %761 = vrot.lane.b32.xlu1 %v690_v22, %s2687_s29  ;;  %v3624_v22 = vshll.u32 %v3030_v10, 16 }
  0x5d   : > { %715 = vrot.lane.b32.xlu2 %v3030_v10, %s2686_s28  ;;  %1270 = vmatpush.bf16.msra.mxu0 %v2622_v43 }
  0x5e   : > { %v648_v34 = vrot.slane %v3624_v22, 1  ;;  %1822 = vmatpush.bf16.msra.mxu2 %v3084_v45  ;;  %2649 = vmatpush.bf16.msra.mxu3 %v2622_v43 }
  0x60   : > { %v649_v36 = vor.u32 %v648_v34, %v3625_v33  ;;  %v3097_v34 = vld [vmem:[%s3621_s3 + $0x70] sm:$0xff] }
  0x61   : > { %1271 = vmatpush.bf16.msra.mxu0 %v2621_v26 }
  0x62   : > { %v691_v40 = vsel %vm2803_vm2, %v649_v36, 0  ;;  %v327_v36 = vadd.f32 %v2745_v1, %v291_v11  ;;  %1823 = vmatpush.bf16.msra.mxu2 %v3097_v34  ;;  %2650 = vmatpush.bf16.msra.mxu3 %v2621_v26 }
  0x63   : > { %763 = vrot.lane.b32.xlu0 %v691_v40, %s2687_s29  ;;  %v328_v40 = vadd.f32 %v2745_v1, %v292_v20 }
  0x64   : > { %v359_v42 = vmax.f32 %v327_v36, 0.0  ;;  %v2619_v36 = vld [vmem:[%s3621_s3 + $0x30] sm:$0xff] }
  0x65   : > { %v360_v43 = vmax.f32 %v328_v40, 0.0  ;;  %1272 = vmatpush.bf16.msra.mxu0 %v2620_v59  ;;  %v3119_v40 = vld [vmem:[%s3621_s3 + $0x60] sm:$0xff] }
  0x66   : > { %v391_v11 = vpack.c.bf16 %v359_v42, %v359_v42  ;;  %1824 = vmatpush.bf16.msra.mxu2 %v3108_v61  ;;  %2651 = vmatpush.bf16.msra.mxu3 %v2620_v59  ;;  %v329_v59 = vadd.f32 %v2745_v1, %v293_v12 }
  0x67   : > { %v392_v22 = vpack.c.bf16 %v360_v43, %v360_v43  ;;  %v258_v43 = vld [vmem:[%s2740_s25 + $0xa8] sm:$0xff] }
  0x68   : > { %v455_v20 = vunpack.c.l.b16 %v391_v11 }
  0x69   : > { %v456_v33 = vunpack.c.l.b16 %v392_v22  ;;  %1273 = vmatpush.bf16.msra.mxu0 %v2619_v36  ;;  %v294_v22 = vmul.f32 %v2732_v0, %v258_v43  ;;  %v488_v0 = vrot.slane %v486_v62, 7 }
  0x6a   : > { %1825 = vmatpush.bf16.msra.mxu2 %v3119_v40  ;;  %2652 = vmatpush.bf16.msra.mxu3 %v2619_v36 }
  0x6b   : > { %v3122_v42 = vpack.c.b16 %v456_v33, %v455_v20  ;;  %v330_v11 = vadd.f32 %v2745_v1, %v294_v22  ;;  %v361_v33 = vmax.f32 %v329_v59, 0.0 }
  0x6d   : > { %717 = vrot.lane.b32.xlu1 %v3122_v42, %s2686_s28  ;;  %v362_v20 = vmax.f32 %v330_v11, 0.0  ;;  %v393_v41 = vpack.c.bf16 %v361_v33, %v361_v33 }
  0x6e   : > { %2653 = vmatpush.bf16.msrb.mxu3 %v2904_v60  ;;  %v498_v60 = vor.u32 %v496_v58, %v495_v7 }
  0x6f   : > { %v394_v35 = vpack.c.bf16 %v362_v20, %v362_v20  ;;  %v457_v43 = vunpack.c.l.b16 %v393_v41 }
  0x70   : > { %v617_v4 = vsel %vm3146_vm7, 0, %v498_v60  ;;  %v549_v60 = vshrl.u32 %v3122_v42, 16 }
  0x71   : > { %v458_v36 = vunpack.c.l.b16 %v394_v35 }
  0x72   : > { %2654 = vmatpush.bf16.msrb.mxu3 %v2917_v17  ;;  %v491_v17 = vor.u32 %v489_v63, %v488_v0  ;;  %v505_v63 = vor.u32 %v503_v2, %v502_v57  ;;  %v509_v57 = vrot.slane %v507_v23, 7 }
  0x73   : > { %v3140_v59 = vpack.c.b16 %v458_v36, %v457_v43 }
  0x74   : > { %v616_v54 = vsel %vm3146_vm7, 0, %v491_v17  ;;  %v618_v2 = vsel %vm3146_vm7, 0, %v505_v63  ;;  %v579_v63 = vrot.slane %v577_v6, 7 }
  0x75   : > { %719 = vrot.lane.b32.xlu0 %v3140_v59, %s2686_s28  ;;  %v556_v50 = vshrl.u32 %v3140_v59, 16  ;;  %v559_v58 = vshll.u32 %v3140_v59, 16 }
  0x76   : > { %2655 = vmatpush.bf16.msrb.mxu3 %v2948_v47  ;;  %v572_v47 = vrot.slane %v570_v13, 7 }
  0x77   : > { %v3111_v26 = vpop.permute.xlu2 %703  ;;  %v652_v35 = vrot.slane %v559_v58, 1 }
  0x78   : > { %v575_v33 = vor.u32 %v573_v14, %v572_v47 }
  0x79   : > { %v653_v41 = vor.u32 %v652_v35, %v556_v50 }
  0x7a   : > { %2656 = vmatpush.bf16.msrb.mxu3 %v2958_v3  ;;  %v628_v47 = vsel %vm3146_vm7, 0, %v575_v33 }
  0x7b   : > { %v693_v55 = vsel %vm2803_vm2, %v653_v41, 0  ;;  %v788_v41 = vsel %vm779_vm8, %v618_v2, %v3111_v26 }
  0x7c   : > { %767 = vrot.lane.b32.xlu1 %v693_v55, %s2687_s29 }
  0x7e   : > { %2657 = vmatpush.bf16.msrb.mxu3 %v3038_v16 }
  0x7f   : > { %v724_v12 = vpop.permute.xlu2 %723 }
  0x80   : > { %v818_v23 = vsel %vm779_vm8, %v628_v47, %v724_v12 }
  0x82   : > { %2658 = vmatpush.bf16.msrb.mxu3 %v3059_v27  ;;  %v512_v27 = vor.u32 %v510_v24, %v509_v57 }
  0x87   : > { %v706_v0 = vpop.permute.xlu2 %705 }
  0x8d   : > { %v702_v1 = vpop.permute.xlu0 %701 }
  0x8e   : > { %v700_v22 = vpop.permute.xlu1 %699  ;;  %v785_v13 = vsel %vm779_vm8, %v617_v4, %v702_v1 }
  0x8f   : > { %v782_v20 = vsel %vm779_vm8, %v616_v54, %v700_v22  ;;  %v552_v22 = vshll.u32 %v3122_v42, 16  ;;  %v774_v24 = vpop.permute.xlu2 %773 }
  0x91   : > { %v650_v54 = vrot.slane %v552_v22, 1 }
  0x95   : > { %v750_v11 = vpop.permute.xlu0 %749 }
  0x96   : > { %v832_v3 = vsel %vm828_vm9, %v785_v13, %v750_v11  ;;  %v748_v7 = vpop.permute.xlu1 %747  ;;  %v651_v13 = vor.u32 %v650_v54, %v549_v60 }
  0x97   : > { %v885_v43 = vunpack.c.l.b16 %v832_v3  ;;  %v886_v36 = vunpack.c.h.b16 %v832_v3  ;;  %v830_v1 = vsel %vm828_vm9, %v782_v20, %v748_v7  ;;  %v582_v7 = vor.u32 %v580_v49, %v579_v63 }
  0x98   : > { %v883_v5 = vunpack.c.l.b16 %v830_v1  ;;  %v884_v14 = vunpack.c.h.b16 %v830_v1  ;;  %v692_v33 = vsel %vm2803_vm2, %v651_v13, 0 }
  0x99   : > { %v917_v17 = vpack.c.b16 %v885_v43, %v885_v43  ;;  %v918_v16 = vpack.c.b16 %v886_v36, %v886_v36  ;;  %765 = vrot.lane.b32.xlu2 %v692_v33, %s2687_s29  ;;  %v619_v36 = vsel %vm3146_vm7, 0, %v512_v27  ;;  %v629_v39 = vsel %vm3146_vm7, 0, %v582_v7  ;;  %s3372_s29 = scalar_lea.vmem %s3622_s4, %s2579_s22  ;;  %s2240_s22 = sshll.u32 %s3641_s19, 1 }
  0x9a   : > { %v915_v4 = vpack.c.b16 %v883_v5, %v883_v5  ;;  %v916_v35 = vpack.c.b16 %v884_v14, %v884_v14  ;;  %v516_v5 = vrot.slane %v514_v48, 7  ;;  %v791_v49 = vsel %vm779_vm8, %v619_v36, %v706_v0  ;;  %s235_s30 = scalar_lea.vmem %s3623_s5, %s2240_s22 }
  0x9b   : > { %982 = vst.msk [vmem:[#allocation2 + $0x10] sm:$0xf] %vm861_vm3, %v917_v17 }
  0x9c   : > { %983 = vst.msk [vmem:[#allocation2 + $0x14] sm:$0xf] %vm861_vm3, %v918_v16  ;;  %v519_v54 = vor.u32 %v517_v56, %v516_v5 }
  0x9d   : > { %980 = vst.msk [vmem:[#allocation2 + $0x8] sm:$0xf] %vm861_vm3, %v915_v4  ;;  %v752_v11 = vpop.permute.xlu0 %751  ;;  %v586_v4 = vrot.slane %v584_v18, 7 }
  0x9e   : > { %981 = vst.msk [vmem:[#allocation2 + $0xc] sm:$0xf] %vm861_vm3, %v916_v35  ;;  %v834_v6 = vsel %vm828_vm9, %v788_v41, %v752_v11  ;;  %v772_v26 = vpop.permute.xlu1 %771  ;;  %v756_v11 = vpop.permute.xlu2 %755  ;;  %v620_v33 = vsel %vm3146_vm7, 0, %v519_v54 }
  0x9f   : > { %v887_v20 = vunpack.c.l.b16 %v834_v6  ;;  %v888_v3 = vunpack.c.h.b16 %v834_v6  ;;  %v854_v12 = vsel %vm828_vm9, %v818_v23, %v772_v26 }
  0xa0   : > { %v907_v55 = vunpack.c.l.b16 %v854_v12  ;;  %v908_v15 = vunpack.c.h.b16 %v854_v12 }
  0xa1   : > { %v919_v2 = vpack.c.b16 %v887_v20, %v887_v20  ;;  %v920_v43 = vpack.c.b16 %v888_v3, %v888_v3  ;;  %v589_v20 = vor.u32 %v587_v46, %v586_v4 }
  0xa2   : > { %v939_v1 = vpack.c.b16 %v907_v55, %v907_v55  ;;  %v940_v8 = vpack.c.b16 %v908_v15, %v908_v15  ;;  %v523_v55 = vrot.slane %v521_v9, 7 }
  0xa3   : > { %984 = vst.msk [vmem:[#allocation2 + $0x18] sm:$0xf] %vm861_vm3, %v919_v2  ;;  %v2625_v14 = vld [vmem:[#allocation2 + $0x10] sm:$0xff]  ;;  %v630_v31 = vsel %vm3146_vm7, 0, %v589_v20  ;;  %v593_v2 = vrot.slane %v591_v21, 7 }
  0xa4   : > { %985 = vst.msk [vmem:[#allocation2 + $0x1c] sm:$0xf] %vm861_vm3, %v920_v43  ;;  %2561 = vmatmul.msk.bf16.vlgmr.msra.gmra.mxu2 %vm1217_vm4, %v2625_v14  ;;  %v526_v9 = vor.u32 %v524_v38, %v523_v55  ;;  %v2604_v5 = vld [vmem:[#allocation2 + $0x10] sm:$0xff] }
  0xa5   : > { %1004 = vst.msk [vmem:[#allocation2 + $0x68] sm:$0xf] %vm861_vm3, %v939_v1  ;;  %v2603_v57 = vld [vmem:[#allocation2 + $0x8] sm:$0xff]  ;;  %v726_v16 = vpop.permute.xlu0 %725  ;;  %v2583_v14 = vld [vmem:[#allocation2 + $0x10] sm:$0xff]  ;;  %v596_v21 = vor.u32 %v594_v51, %v593_v2 }
  0xa6   : > { %v2582_v17 = vld [vmem:[#allocation2 + $0x8] sm:$0xff]  ;;  %1005 = vst.msk [vmem:[#allocation2 + $0x6c] sm:$0xf] %vm861_vm3, %v940_v8  ;;  %v821_v48 = vsel %vm779_vm8, %v629_v39, %v726_v16  ;;  %v754_v47 = vpop.permute.xlu1 %753  ;;  %2341 = vmatmul.msk.bf16.vlgmr.msra.gmra.mxu0 %vm1217_vm4, %v2603_v57  ;;  %v530_v57 = vrot.slane %v528_v44, 7 }
  0xa7   : > { %2446 = vmatmul.msk.bf16.gmra.mxu1 %vm1217_vm4, %v2582_v17  ;;  %v856_v0 = vsel %vm828_vm9, %v821_v48, %v774_v24  ;;  %v836_v35 = vsel %vm828_vm9, %v791_v49, %v754_v47  ;;  %v730_v24 = vpop.permute.xlu2 %729  ;;  %v631_v51 = vsel %vm3146_vm7, 0, %v596_v21  ;;  %v565_v48 = vrot.slane %v563_v53, 7 }
  0xa8   : > { %v909_v63 = vunpack.c.l.b16 %v856_v0  ;;  %v910_v41 = vunpack.c.h.b16 %v856_v0  ;;  %v889_v23 = vunpack.c.l.b16 %v836_v35  ;;  %v890_v13 = vunpack.c.h.b16 %v836_v35 }
  0xa9   : > { %v3634_v0 = vshll.u32 %v2969_v25, 16 }
  0xaa   : > { %v941_v27 = vpack.c.b16 %v909_v63, %v909_v63  ;;  %v942_v6 = vpack.c.b16 %v910_v41, %v910_v41  ;;  %v921_v26 = vpack.c.b16 %v889_v23, %v889_v23  ;;  %v922_v18 = vpack.c.b16 %v890_v13, %v890_v13 }
  0xab   : > { %v2626_v1 = vld [vmem:[#allocation2 + $0x18] sm:$0xff]  ;;  %v533_v35 = vor.u32 %v3634_v0, %v530_v57  ;;  %v3635_v13 = vshll.u32 %v2977_v32, 16 }
  0xac   : > { %1006 = vst.msk [vmem:[#allocation2 + $0x70] sm:$0xf] %vm861_vm3, %v941_v27 }
  0xad   : > { %1007 = vst.msk [vmem:[#allocation2 + $0x74] sm:$0xf] %vm861_vm3, %v942_v6  ;;  %v2615_v37 = vld [vmem:[#allocation2 + $0x68] sm:$0xff]  ;;  %v708_v56 = vpop.permute.xlu0 %707  ;;  %v622_v25 = vsel %vm3146_vm7, 0, %v533_v35 }
  0xae   : > { %986 = vst.msk [vmem:[#allocation2 + $0x20] sm:$0xf] %vm861_vm3, %v921_v26  ;;  %v794_v3 = vsel %vm779_vm8, %v620_v33, %v708_v56  ;;  %v728_v12 = vpop.permute.xlu1 %727  ;;  %2353 = vmatmul.msk.bf16.vlgmr.msra.gmra.mxu3 %vm1217_vm4, %v2615_v37 }
  0xaf   : > { %987 = vst.msk [vmem:[#allocation2 + $0x24] sm:$0xf] %vm861_vm3, %v922_v18  ;;  %v838_v7 = vsel %vm828_vm9, %v794_v3, %v756_v11  ;;  %2659 = vmatpush.bf16.msra.mxu3 %v3043_v19  ;;  %v824_v8 = vsel %vm779_vm8, %v630_v31, %v728_v12  ;;  %v712_v16 = vpop.permute.xlu2 %711  ;;  %v568_v11 = vor.u32 %v3635_v13, %v565_v48  ;;  %v2584_v3 = vld [vmem:[#allocation2 + $0x18] sm:$0xff] }
  0xb0   : > { %v891_v46 = vunpack.c.l.b16 %v838_v7  ;;  %v892_v15 = vunpack.c.h.b16 %v838_v7  ;;  %v800_v32 = vsel %vm779_vm8, %v622_v25, %v712_v16 }
  0xb1   : > { %v627_v37 = vsel %vm3146_vm7, 0, %v568_v11 }
  0xb2   : > { %v923_v43 = vpack.c.b16 %v891_v46, %v891_v46  ;;  %v924_v36 = vpack.c.b16 %v892_v15, %v892_v15 }
  0xb3   : > { %2660 = vmatpush.bf16.msra.mxu3 %v3064_v30  ;;  %v621_v30 = vsel %vm3146_vm7, 0, %v526_v9 }
  0xb4   : > { %988 = vst.msk [vmem:[#allocation2 + $0x28] sm:$0xf] %vm861_vm3, %v923_v43  ;;  %2562 = vmatmul.msk.bf16.gmra.mxu2 %vm1217_vm4, %v2626_v1  ;;  %v2616_v47 = vld [vmem:[#allocation2 + $0x70] sm:$0xff] }
  0xb5   : > { %v776_v19 = vpop.permute.xlu0 %775  ;;  %989 = vst.msk [vmem:[#allocation2 + $0x2c] sm:$0xf] %vm861_vm3, %v924_v36 }
  0xb6   : > { %v858_v39 = vsel %vm828_vm9, %v824_v8, %v776_v19  ;;  %v710_v49 = vpop.permute.xlu1 %709  ;;  %2342 = vmatmul.msk.bf16.gmra.mxu0 %vm1217_vm4, %v2604_v5  ;;  %v2627_v20 = vld [vmem:[#allocation2 + $0x20] sm:$0xff]  ;;  %v3636_v8 = vshrl.u32 %v2992_v52, 16  ;;  %v3637_v19 = vshll.u32 %v2992_v52, 16 }
  0xb7   : > { %2447 = vmatmul.msk.bf16.gmra.mxu1 %vm1217_vm4, %v2583_v14  ;;  %v911_v28 = vunpack.c.l.b16 %v858_v39  ;;  %v912_v38 = vunpack.c.h.b16 %v858_v39  ;;  %2661 = vmatpush.bf16.msra.mxu3 %v3084_v45  ;;  %v797_v4 = vsel %vm779_vm8, %v621_v30, %v710_v49  ;;  %v827_v45 = vsel %vm779_vm8, %v631_v51, %v730_v24  ;;  %v770_v56 = vpop.permute.xlu2 %769  ;;  %v2606_v30 = vld [vmem:[#allocation2 + $0x20] sm:$0xff] }
  0xb8   : > { %v537_v9 = vrot.slane %v3636_v8, 7  ;;  %v2585_v57 = vld [vmem:[#allocation2 + $0x20] sm:$0xff] }
  0xb9   : > { %v943_v17 = vpack.c.b16 %v911_v28, %v911_v28  ;;  %v944_v29 = vpack.c.b16 %v912_v38, %v912_v38 }
  0xba   : > { %v540_v21 = vor.u32 %v3637_v19, %v537_v9 }
  0xbb   : > { %1008 = vst.msk [vmem:[#allocation2 + $0x78] sm:$0xf] %vm861_vm3, %v943_v17  ;;  %2662 = vmatpush.bf16.msra.mxu3 %v3097_v34 }
  0xbc   : > { %1009 = vst.msk [vmem:[#allocation2 + $0x7c] sm:$0xf] %vm861_vm3, %v944_v29  ;;  %v623_v49 = vsel %vm3146_vm7, 0, %v540_v21  ;;  %v2628_v28 = vld [vmem:[#allocation2 + $0x28] sm:$0xff] }
  0xbd   : > { %v758_v44 = vpop.permute.xlu0 %757 }
  0xbe   : > { %v778_v54 = vpop.permute.xlu1 %777  ;;  %v840_v63 = vsel %vm828_vm9, %v797_v4, %v758_v44  ;;  %2354 = vmatmul.msk.bf16.gmra.mxu3 %vm1217_vm4, %v2616_v47  ;;  %v3638_v47 = vshrl.u32 %v3030_v10, 16  ;;  %v3639_v44 = vshll.u32 %v3030_v10, 16 }
  0xbf   : > { %v860_v53 = vsel %vm828_vm9, %v827_v45, %v778_v54  ;;  %v893_v41 = vunpack.c.l.b16 %v840_v63  ;;  %v894_v23 = vunpack.c.h.b16 %v840_v63  ;;  %2663 = vmatpush.bf16.msra.mxu3 %v3108_v61  ;;  %v2605_v61 = vld [vmem:[#allocation2 + $0x18] sm:$0xff]  ;;  %v716_v54 = vpop.permute.xlu2 %715 }
  0xc0   : > { %v913_v27 = vunpack.c.l.b16 %v860_v53  ;;  %v914_v6 = vunpack.c.h.b16 %v860_v53  ;;  %v544_v4 = vrot.slane %v3638_v47, 7  ;;  %v2637_v47 = vld [vmem:[#allocation2 + $0x70] sm:$0xff] }
  0xc1   : > { %v925_v34 = vpack.c.b16 %v893_v41, %v893_v41  ;;  %v926_v33 = vpack.c.b16 %v894_v23, %v894_v23  ;;  %v2607_v41 = vld [vmem:[#allocation2 + $0x28] sm:$0xff] }
  0xc2   : > { %v945_v26 = vpack.c.b16 %v913_v27, %v913_v27  ;;  %v946_v18 = vpack.c.b16 %v914_v6, %v914_v6  ;;  %v547_v0 = vor.u32 %v3639_v44, %v544_v4  ;;  %v2586_v23 = vld [vmem:[#allocation2 + $0x28] sm:$0xff] }
  0xc3   : > { %990 = vst.msk [vmem:[#allocation2 + $0x30] sm:$0xf] %vm861_vm3, %v925_v34  ;;  %2664 = vmatpush.bf16.msra.mxu3 %v3119_v40  ;;  %v2617_v5 = vld [vmem:[#allocation2 + $0x78] sm:$0xff] }
  0xc4   : > { %1010 = vst.msk [vmem:[#allocation2 + $0x80] sm:$0xf] %vm861_vm3, %v945_v26  ;;  %2563 = vmatmul.msk.bf16.gmra.mxu2 %vm1217_vm4, %v2627_v20  ;;  %v624_v35 = vsel %vm3146_vm7, 0, %v547_v0  ;;  %v551_v26 = vrot.slane %v549_v60, 7 }
  0xc5   : > { %1011 = vst.msk [vmem:[#allocation2 + $0x84] sm:$0xf] %vm861_vm3, %v946_v18  ;;  %v722_v12 = vpop.permute.xlu0 %721  ;;  %v806_v53 = vsel %vm779_vm8, %v624_v35, %v716_v54 }
  0xc6   : > { %991 = vst.msk [vmem:[#allocation2 + $0x34] sm:$0xf] %vm861_vm3, %v926_v33  ;;  %v815_v7 = vsel %vm779_vm8, %v627_v37, %v722_v12  ;;  %v760_v55 = vpop.permute.xlu1 %759  ;;  %2343 = vmatmul.msk.bf16.gmra.mxu0 %vm1217_vm4, %v2605_v61  ;;  %v554_v18 = vor.u32 %v552_v22, %v551_v26  ;;  %v2594_v12 = vld [vmem:[#allocation2 + $0x68] sm:$0xff] }
  0xc7   : > { %2448 = vmatmul.msk.bf16.gmra.mxu1 %vm1217_vm4, %v2584_v3  ;;  %v852_v31 = vsel %vm828_vm9, %v815_v7, %v770_v56  ;;  %v842_v40 = vsel %vm828_vm9, %v800_v32, %v760_v55 }
  0xc8   : > { %v905_v46 = vunpack.c.l.b16 %v852_v31  ;;  %v906_v15 = vunpack.c.h.b16 %v852_v31  ;;  %v895_v24 = vunpack.c.l.b16 %v842_v40  ;;  %v896_v2 = vunpack.c.h.b16 %v842_v40 }
  0xc9   : > { %v625_v32 = vsel %vm3146_vm7, 0, %v554_v18  ;;  %v558_v31 = vrot.slane %v556_v50, 7 }
  0xca   : > { %v937_v43 = vpack.c.b16 %v905_v46, %v905_v46  ;;  %v938_v36 = vpack.c.b16 %v906_v15, %v906_v15  ;;  %v927_v1 = vpack.c.b16 %v895_v24, %v895_v24  ;;  %v928_v14 = vpack.c.b16 %v896_v2, %v896_v2 }
  0xcb   : > { %v561_v24 = vor.u32 %v559_v58, %v558_v31 }
  0xcc   : > { %1002 = vst.msk [vmem:[#allocation2 + $0x60] sm:$0xf] %vm861_vm3, %v937_v43  ;;  %v2618_v45 = vld [vmem:[#allocation2 + $0x80] sm:$0xff] }
  0xcd   : > { %1003 = vst.msk [vmem:[#allocation2 + $0x64] sm:$0xf] %vm861_vm3, %v938_v36  ;;  %v714_v39 = vpop.permute.xlu0 %713  ;;  %v2629_v63 = vld [vmem:[#allocation2 + $0x30] sm:$0xff]  ;;  %v626_v43 = vsel %vm3146_vm7, 0, %v561_v24 }
  0xce   : > { %992 = vst.msk [vmem:[#allocation2 + $0x38] sm:$0xf] %vm861_vm3, %v927_v1  ;;  %2355 = vmatmul.msk.bf16.gmra.mxu3 %vm1217_vm4, %v2617_v5  ;;  %v803_v38 = vsel %vm779_vm8, %v623_v49, %v714_v39  ;;  %v762_v17 = vpop.permute.xlu1 %761  ;;  %v2608_v20 = vld [vmem:[#allocation2 + $0x30] sm:$0xff]  ;;  %v2596_v49 = vld [vmem:[#allocation2 + $0x78] sm:$0xff] }
  0xcf   : > { %993 = vst.msk [vmem:[#allocation2 + $0x3c] sm:$0xf] %vm861_vm3, %v928_v14  ;;  %v844_v29 = vsel %vm828_vm9, %v803_v38, %v762_v17  ;;  %v2587_v37 = vld [vmem:[#allocation2 + $0x30] sm:$0xff] }
  0xd0   : > { %v897_v52 = vunpack.c.l.b16 %v844_v29  ;;  %v898_v51 = vunpack.c.h.b16 %v844_v29  ;;  %v2595_v5 = vld [vmem:[#allocation2 + $0x70] sm:$0xff] }
  0xd2   : > { %v929_v16 = vpack.c.b16 %v897_v52, %v897_v52  ;;  %v930_v48 = vpack.c.b16 %v898_v51, %v898_v51 }
  0xd4   : > { %2564 = vmatmul.msk.bf16.gmra.mxu2 %vm1217_vm4, %v2628_v28  ;;  %994 = vst.msk [vmem:[#allocation2 + $0x40] sm:$0xf] %vm861_vm3, %v929_v16  ;;  %v2593_v25 = vld [vmem:[#allocation2 + $0x60] sm:$0xff]  ;;  %v1528_v59 = vpop.f32.mrf.mxu1 }
  0xd5   : > { %995 = vst.msk [vmem:[#allocation2 + $0x44] sm:$0xf] %vm861_vm3, %v930_v48  ;;  %v764_v13 = vpop.permute.xlu0 %763 }
  0xd6   : > { %2344 = vmatmul.msk.bf16.gmra.mxu0 %vm1217_vm4, %v2606_v30  ;;  %v846_v11 = vsel %vm828_vm9, %v806_v53, %v764_v13  ;;  %v2630_v33 = vld [vmem:[#allocation2 + $0x38] sm:$0xff] }
  0xd7   : > { %2449 = vmatmul.msk.bf16.gmra.mxu1 %vm1217_vm4, %v2585_v57  ;;  %v899_v10 = vunpack.c.l.b16 %v846_v11  ;;  %v900_v27 = vunpack.c.h.b16 %v846_v11  ;;  %v2609_v46 = vld [vmem:[#allocation2 + $0x38] sm:$0xff] }
  0xd8   : > { %v2588_v15 = vld [vmem:[#allocation2 + $0x38] sm:$0xff] }
  0xd9   : > { %v931_v6 = vpack.c.b16 %v899_v10, %v899_v10  ;;  %v932_v34 = vpack.c.b16 %v900_v27, %v900_v27 }
  0xdb   : > { %996 = vst.msk [vmem:[#allocation2 + $0x48] sm:$0xf] %vm861_vm3, %v931_v6 }
  0xdc   : > { %997 = vst.msk [vmem:[#allocation2 + $0x4c] sm:$0xf] %vm861_vm3, %v932_v34  ;;  %v2631_v40 = vld [vmem:[#allocation2 + $0x40] sm:$0xff]  ;;  %v1530_v39 = vpop.f32.mrf.mxu1 }
  0xdd   : > { %v2610_v62 = vld [vmem:[#allocation2 + $0x40] sm:$0xff] }
  0xde   : > { %2356 = vmatmul.msk.bf16.gmra.mxu3 %vm1217_vm4, %v2618_v45  ;;  %v2589_v21 = vld [vmem:[#allocation2 + $0x40] sm:$0xff] }
  0xdf   : > { %v718_v60 = vpop.permute.xlu1 %717 }
  0xe0   : > { %v809_v56 = vsel %vm779_vm8, %v625_v32, %v718_v60 }
  0xe3   : > { %v2632_v58 = vld [vmem:[#allocation2 + $0x48] sm:$0xff] }
  0xe4   : > { %2565 = vmatmul.msk.bf16.gmra.mxu2 %vm1217_vm4, %v2629_v63  ;;  %v2611_v57 = vld [vmem:[#allocation2 + $0x48] sm:$0xff] }
  0xe5   : > { %v2590_v17 = vld [vmem:[#allocation2 + $0x48] sm:$0xff] }
  0xe6   : > { %2345 = vmatmul.msk.bf16.gmra.mxu0 %vm1217_vm4, %v2607_v41 }
  0xe7   : > { %2450 = vmatmul.msk.bf16.gmra.mxu1 %vm1217_vm4, %v2586_v23  ;;  %v720_v2 = vpop.permute.xlu0 %719 }
  0xe8   : > { %v812_v36 = vsel %vm779_vm8, %v626_v43, %v720_v2 }
  0xee   : > { %2457 = vmatmul.msk.bf16.vlgmr.msrb.gmra.mxu3 %vm1217_vm4, %v2593_v25  ;;  %v768_v1 = vpop.permute.xlu1 %767 }
  0xef   : > { %v850_v50 = vsel %vm828_vm9, %v812_v36, %v768_v1 }
  0xf0   : > { %v903_v8 = vunpack.c.l.b16 %v850_v50  ;;  %v904_v9 = vunpack.c.h.b16 %v850_v50 }
  0xf2   : > { %v935_v14 = vpack.c.b16 %v903_v8, %v903_v8  ;;  %v936_v19 = vpack.c.b16 %v904_v9, %v904_v9 }
  0xf3   : > { %v766_v61 = vpop.permute.xlu2 %765 }
  0xf4   : > { %2566 = vmatmul.msk.bf16.gmra.mxu2 %vm1217_vm4, %v2630_v33  ;;  %v848_v3 = vsel %vm828_vm9, %v809_v56, %v766_v61  ;;  %1000 = vst.msk [vmem:[#allocation2 + $0x58] sm:$0xf] %vm861_vm3, %v935_v14 }
  0xf5   : > { %v901_v42 = vunpack.c.l.b16 %v848_v3  ;;  %v902_v22 = vunpack.c.h.b16 %v848_v3  ;;  %1001 = vst.msk [vmem:[#allocation2 + $0x5c] sm:$0xf] %vm861_vm3, %v936_v19 }
  0xf6   : > { %2346 = vmatmul.msk.bf16.gmra.mxu0 %vm1217_vm4, %v2608_v20 }
  0xf7   : > { %2451 = vmatmul.msk.bf16.gmra.mxu1 %vm1217_vm4, %v2587_v37  ;;  %v933_v7 = vpack.c.b16 %v901_v42, %v901_v42  ;;  %v934_v55 = vpack.c.b16 %v902_v22, %v902_v22  ;;  %v2638_v42 = vld [vmem:[#allocation2 + $0x78] sm:$0xff] }
  0xf9   : > { %998 = vst.msk [vmem:[#allocation2 + $0x50] sm:$0xf] %vm861_vm3, %v933_v7 }
  0xfa   : > { %999 = vst.msk [vmem:[#allocation2 + $0x54] sm:$0xf] %vm861_vm3, %v934_v55 }
  0xfc   : > { %v2634_v35 = vld [vmem:[#allocation2 + $0x58] sm:$0xff] }
  0xfd   : > { %v2613_v1 = vld [vmem:[#allocation2 + $0x58] sm:$0xff] }
  0xfe   : > { %2458 = vmatmul.msk.bf16.gmra.mxu3 %vm1217_vm4, %v2594_v12  ;;  %v2592_v50 = vld [vmem:[#allocation2 + $0x58] sm:$0xff] }
 0x101   : > { %v2633_v28 = vld [vmem:[#allocation2 + $0x50] sm:$0xff] }
 0x102   : > { %v2612_v6 = vld [vmem:[#allocation2 + $0x50] sm:$0xff] }
 0x103   : > { %v2591_v34 = vld [vmem:[#allocation2 + $0x50] sm:$0xff] }
 0x104   : > { %2567 = vmatmul.msk.bf16.gmra.mxu2 %vm1217_vm4, %v2631_v40 }
 0x106   : > { %2347 = vmatmul.msk.bf16.gmra.mxu0 %vm1217_vm4, %v2609_v46 }
 0x107   : > { %2452 = vmatmul.msk.bf16.gmra.mxu1 %vm1217_vm4, %v2588_v15  ;;  %v2635_v15 = vld [vmem:[#allocation2 + $0x60] sm:$0xff] }
 0x10e   : > { %2459 = vmatmul.msk.bf16.gmra.mxu3 %vm1217_vm4, %v2595_v5 }
 0x114   : > { %2568 = vmatmul.msk.bf16.gmra.mxu2 %vm1217_vm4, %v2632_v58 }
 0x116   : > { %2348 = vmatmul.msk.bf16.gmra.mxu0 %vm1217_vm4, %v2610_v62 }
 0x117   : > { %2453 = vmatmul.msk.bf16.gmra.mxu1 %vm1217_vm4, %v2589_v21 }
 0x11e   : > { %2460 = vmatmul.msk.bf16.gmra.mxu3 %vm1217_vm4, %v2596_v49 }
 0x123   : > { %v1275_v38 = vpop.f32.mrf.mxu0 }
 0x124   : > { %v1533_v30 = vpop.f32.mrf.mxu1  ;;  %2569 = vmatmul.msk.bf16.gmra.mxu2 %vm1217_vm4, %v2633_v28  ;;  %v1529_v29 = vadd.f32 %v1528_v59, %v1275_v38  ;;  %v2639_v28 = vld [vmem:[#allocation2 + $0x80] sm:$0xff] }
 0x126   : > { %2349 = vmatmul.msk.bf16.gmra.mxu0 %vm1217_vm4, %v2611_v57 }
 0x127   : > { %2454 = vmatmul.msk.bf16.gmra.mxu1 %vm1217_vm4, %v2590_v17  ;;  %v1827_v52 = vpop.f32.mrf.mxu2 }
 0x128   : > { %v1907_v51 = vadd.f32 %v1827_v52, %v1529_v29 }
 0x12a   : > { %1939 = vst.msk [vmem:[%s3372_s29] sm:$0xff] %vm779_vm8, %v1907_v51  ;;  %v2040_v44 = vmul.f32 %v1907_v51, %v1907_v51  ;;  %v1971_v63 = vsel %vm779_vm8, %v1907_v51, 0.0 }
 0x12b   : > { %v1277_v16 = vpop.f32.mrf.mxu0 }
 0x12c   : > { %v1535_v48 = vpop.f32.mrf.mxu1  ;;  %v1531_v4 = vadd.f32 %v1530_v39, %v1277_v16  ;;  %v2072_v10 = vsel %vm779_vm8, %v2040_v44, 0.0  ;;  %v2636_v16 = vld [vmem:[#allocation2 + $0x68] sm:$0xff]  ;;  %v2614_v44 = vld [vmem:[#allocation2 + $0x60] sm:$0xff] }
 0x12e   : > { %2573 = vmatmul.msk.bf16.vlgmr.msra.gmra.mxu3 %vm1217_vm4, %v2637_v47 }
 0x12f   : > { %v1829_v45 = vpop.f32.mrf.mxu2 }
 0x130   : > { %v1908_v0 = vadd.f32 %v1829_v45, %v1531_v4 }
 0x131   : > { %v3377_v54 = vpop.f32.mrf.mxu3 }
 0x132   : > { %1940 = vst.msk [vmem:[%s3372_s29 + $0x8] sm:$0xff] %vm779_vm8, %v1908_v0  ;;  %v1972_v53 = vsel %vm779_vm8, %v1908_v0, 0.0  ;;  %v2041_v41 = vmul.f32 %v1908_v0, %v1908_v0 }
 0x133   : > { %v1973_v23 = vadd.f32 %v1972_v53, %v1971_v63  ;;  %v1280_v13 = vpop.f32.mrf.mxu0 }
 0x134   : > { %v1538_v11 = vpop.f32.mrf.mxu1  ;;  %v2073_v27 = vsel %vm779_vm8, %v2041_v41, 0.0  ;;  %2570 = vmatmul.msk.bf16.gmra.mxu2 %vm1217_vm4, %v2634_v35  ;;  %v1534_v26 = vadd.f32 %v1533_v30, %v1280_v13 }
 0x135   : > { %v2074_v25 = vadd.f32 %v2073_v27, %v2072_v10 }
 0x136   : > { %2350 = vmatmul.msk.bf16.gmra.mxu0 %vm1217_vm4, %v2612_v6 }
 0x137   : > { %2455 = vmatmul.msk.bf16.gmra.mxu1 %vm1217_vm4, %v2591_v34  ;;  %v1832_v18 = vpop.f32.mrf.mxu2 }
 0x138   : > { %v1909_v33 = vadd.f32 %v1832_v18, %v1534_v26 }
 0x139   : > { %v3388_v20 = vpop.f32.mrf.mxu3 }
 0x13a   : > { %1941 = vst.msk [vmem:[%s3372_s29 + $0x10] sm:$0xff] %vm779_vm8, %v1909_v33  ;;  %v1974_v37 = vsel %vm779_vm8, %v1909_v33, 0.0  ;;  %v2042_v32 = vmul.f32 %v1909_v33, %v1909_v33 }
 0x13b   : > { %v1975_v60 = vadd.f32 %v1974_v37, %v1973_v23  ;;  %v1282_v56 = vpop.f32.mrf.mxu0 }
 0x13c   : > { %v1540_v61 = vpop.f32.mrf.mxu1  ;;  %v2075_v3 = vsel %vm779_vm8, %v2042_v32, 0.0  ;;  %v1536_v12 = vadd.f32 %v1535_v48, %v1282_v56 }
 0x13d   : > { %v2076_v22 = vadd.f32 %v2075_v3, %v2074_v25 }
 0x13e   : > { %2574 = vmatmul.msk.bf16.gmra.mxu3 %vm1217_vm4, %v2638_v42 }
 0x13f   : > { %v1834_v7 = vpop.f32.mrf.mxu2 }
 0x140   : > { %v1910_v55 = vadd.f32 %v1834_v7, %v1536_v12 }
 0x141   : > { %v3395_v31 = vpop.f32.mrf.mxu3 }
 0x142   : > { %1942 = vst.msk [vmem:[%s3372_s29 + $0x18] sm:$0xff] %vm779_vm8, %v1910_v55  ;;  %v1976_v40 = vsel %vm779_vm8, %v1910_v55, 0.0  ;;  %v2043_v46 = vmul.f32 %v1910_v55, %v1910_v55 }
 0x143   : > { %v1977_v24 = vadd.f32 %v1976_v40, %v1975_v60  ;;  %v1285_v2 = vpop.f32.mrf.mxu0 }
 0x144   : > { %v1543_v43 = vpop.f32.mrf.mxu1  ;;  %v2077_v36 = vsel %vm779_vm8, %v2043_v46, 0.0  ;;  %2571 = vmatmul.msk.bf16.gmra.mxu2 %vm1217_vm4, %v2635_v15  ;;  %v1539_v9 = vadd.f32 %v1538_v11, %v1285_v2  ;;  %v2640_v11 = vld [vmem:[#allocation2 + $0x88] sm:$0xff] }
 0x145   : > { %v2078_v8 = vadd.f32 %v2077_v36, %v2076_v22 }
 0x146   : > { %2351 = vmatmul.msk.bf16.gmra.mxu0 %vm1217_vm4, %v2613_v1 }
 0x147   : > { %2456 = vmatmul.msk.bf16.gmra.mxu1 %vm1217_vm4, %v2592_v50  ;;  %v1837_v5 = vpop.f32.mrf.mxu2 }
 0x148   : > { %v1911_v14 = vadd.f32 %v1837_v5, %v1539_v9 }
 0x149   : > { %v3404_v19 = vpop.f32.mrf.mxu3 }
 0x14a   : > { %1943 = vst.msk [vmem:[%s3372_s29 + $0x20] sm:$0xff] %vm779_vm8, %v1911_v14  ;;  %v1978_v59 = vsel %vm779_vm8, %v1911_v14, 0.0  ;;  %v2044_v58 = vmul.f32 %v1911_v14, %v1911_v14 }
 0x14b   : > { %v1979_v62 = vadd.f32 %v1978_v59, %v1977_v24  ;;  %v1287_v21 = vpop.f32.mrf.mxu0 }
 0x14c   : > { %v1545_v39 = vpop.f32.mrf.mxu1  ;;  %v2079_v49 = vsel %vm779_vm8, %v2044_v58, 0.0  ;;  %v1541_v30 = vadd.f32 %v1540_v61, %v1287_v21 }
 0x14d   : > { %v2080_v38 = vadd.f32 %v2079_v49, %v2078_v8 }
 0x14e   : > { %2575 = vmatmul.msk.bf16.gmra.mxu3 %vm1217_vm4, %v2639_v28 }
 0x14f   : > { %v1839_v57 = vpop.f32.mrf.mxu2 }
 0x150   : > { %v1912_v17 = vadd.f32 %v1839_v57, %v1541_v30 }
 0x151   : > { %v3411_v29 = vpop.f32.mrf.mxu3 }
 0x152   : > { %1944 = vst.msk [vmem:[%s3372_s29 + $0x28] sm:$0xff] %vm779_vm8, %v1912_v17  ;;  %v1980_v52 = vsel %vm779_vm8, %v1912_v17, 0.0  ;;  %v2045_v51 = vmul.f32 %v1912_v17, %v1912_v17 }
 0x153   : > { %v1981_v48 = vadd.f32 %v1980_v52, %v1979_v62  ;;  %v1290_v47 = vpop.f32.mrf.mxu0 }
 0x154   : > { %v1548_v4 = vpop.f32.mrf.mxu1  ;;  %v2081_v45 = vsel %vm779_vm8, %v2045_v51, 0.0  ;;  %2572 = vmatmul.msk.bf16.gmra.mxu2 %vm1217_vm4, %v2636_v16  ;;  %v1544_v35 = vadd.f32 %v1543_v43, %v1290_v47 }
 0x155   : > { %v2082_v0 = vadd.f32 %v2081_v45, %v2080_v38 }
 0x156   : > { %2352 = vmatmul.msk.bf16.gmra.mxu0 %vm1217_vm4, %v2614_v44 }
 0x157   : > { %v1842_v63 = vpop.f32.mrf.mxu2 }
 0x158   : > { %v1913_v53 = vadd.f32 %v1842_v63, %v1544_v35 }
 0x159   : > { %v3419_v41 = vpop.f32.mrf.mxu3 }
 0x15a   : > { %1945 = vst.msk [vmem:[%s3372_s29 + $0x30] sm:$0xff] %vm779_vm8, %v1913_v53  ;;  %v1982_v23 = vsel %vm779_vm8, %v1913_v53, 0.0  ;;  %v2046_v13 = vmul.f32 %v1913_v53, %v1913_v53 }
 0x15b   : > { %v1983_v10 = vadd.f32 %v1982_v23, %v1981_v48  ;;  %v1292_v27 = vpop.f32.mrf.mxu0 }
 0x15c   : > { %v1550_v6 = vpop.f32.mrf.mxu1  ;;  %v2083_v34 = vsel %vm779_vm8, %v2046_v13, 0.0  ;;  %v1546_v26 = vadd.f32 %v1545_v39, %v1292_v27 }
 0x15d   : > { %v2084_v25 = vadd.f32 %v2083_v34, %v2082_v0 }
 0x15e   : > { %2576 = vmatmul.msk.bf16.gmra.mxu3 %vm1217_vm4, %v2640_v11 }
 0x15f   : > { %v1844_v18 = vpop.f32.mrf.mxu2 }
 0x160   : > { %v1914_v33 = vadd.f32 %v1844_v18, %v1546_v26 }
 0x161   : > { %v3426_v37 = vpop.f32.mrf.mxu3 }
 0x162   : > { %1946 = vst.msk [vmem:[%s3372_s29 + $0x38] sm:$0xff] %vm779_vm8, %v1914_v33  ;;  %v1984_v32 = vsel %vm779_vm8, %v1914_v33, 0.0  ;;  %v2047_v60 = vmul.f32 %v1914_v33, %v1914_v33 }
 0x163   : > { %v1985_v56 = vadd.f32 %v1984_v32, %v1983_v10  ;;  %v1295_v61 = vpop.f32.mrf.mxu0 }
 0x164   : > { %v1553_v3 = vpop.f32.mrf.mxu1  ;;  %v2085_v42 = vsel %vm779_vm8, %v2047_v60, 0.0  ;;  %v1549_v12 = vadd.f32 %v1548_v4, %v1295_v61 }
 0x165   : > { %v2086_v22 = vadd.f32 %v2085_v42, %v2084_v25 }
 0x167   : > { %v1847_v7 = vpop.f32.mrf.mxu2 }
 0x168   : > { %v1915_v55 = vadd.f32 %v1847_v7, %v1549_v12 }
 0x169   : > { %v3432_v40 = vpop.f32.mrf.mxu3 }
 0x16a   : > { %1947 = vst.msk [vmem:[%s3372_s29 + $0x40] sm:$0xff] %vm779_vm8, %v1915_v55  ;;  %v1986_v46 = vsel %vm779_vm8, %v1915_v55, 0.0  ;;  %v2048_v15 = vmul.f32 %v1915_v55, %v1915_v55 }
 0x16b   : > { %v1987_v24 = vadd.f32 %v1986_v46, %v1985_v56  ;;  %v1297_v2 = vpop.f32.mrf.mxu0 }
 0x16c   : > { %v1555_v43 = vpop.f32.mrf.mxu1  ;;  %v2087_v36 = vsel %vm779_vm8, %v2048_v15, 0.0  ;;  %v1551_v50 = vadd.f32 %v1550_v6, %v1297_v2 }
 0x16d   : > { %v2088_v1 = vadd.f32 %v2087_v36, %v2086_v22 }
 0x16f   : > { %v1849_v8 = vpop.f32.mrf.mxu2 }
 0x170   : > { %v1916_v9 = vadd.f32 %v1849_v8, %v1551_v50 }
 0x171   : > { %v3438_v5 = vpop.f32.mrf.mxu3 }
 0x172   : > { %1948 = vst.msk [vmem:[%s3372_s29 + $0x48] sm:$0xff] %vm779_vm8, %v1916_v9  ;;  %v1988_v14 = vsel %vm779_vm8, %v1916_v9, 0.0  ;;  %v2049_v59 = vmul.f32 %v1916_v9, %v1916_v9 }
 0x173   : > { %v1989_v58 = vadd.f32 %v1988_v14, %v1987_v24  ;;  %v1300_v62 = vpop.f32.mrf.mxu0 }
 0x174   : > { %v1558_v21 = vpop.f32.mrf.mxu1  ;;  %v2089_v39 = vsel %vm779_vm8, %v2049_v59, 0.0  ;;  %v1554_v28 = vadd.f32 %v1553_v3, %v1300_v62 }
 0x175   : > { %v2090_v49 = vadd.f32 %v2089_v39, %v2088_v1 }
 0x177   : > { %v1852_v38 = vpop.f32.mrf.mxu2 }
 0x178   : > { %v1917_v30 = vadd.f32 %v1852_v38, %v1554_v28 }
 0x179   : > { %v3444_v57 = vpop.f32.mrf.mxu3 }
 0x17a   : > { %1949 = vst.msk [vmem:[%s3372_s29 + $0x50] sm:$0xff] %vm779_vm8, %v1917_v30  ;;  %v1990_v17 = vsel %vm779_vm8, %v1917_v30, 0.0  ;;  %v2050_v52 = vmul.f32 %v1917_v30, %v1917_v30 }
 0x17b   : > { %v1991_v51 = vadd.f32 %v1990_v17, %v1989_v58  ;;  %v1302_v16 = vpop.f32.mrf.mxu0  ;;  %v1589_v17 = vadd.f32 %v3438_v5, %v3377_v54  ;;  %v1591_v54 = vadd.f32 %v3444_v57, %v3388_v20 }
 0x17c   : > { %v1560_v48 = vpop.f32.mrf.mxu1  ;;  %v2091_v47 = vsel %vm779_vm8, %v2050_v52, 0.0  ;;  %v1556_v45 = vadd.f32 %v1555_v43, %v1302_v16 }
 0x17d   : > { %v2092_v4 = vadd.f32 %v2091_v47, %v2090_v49 }
 0x17f   : > { %v1854_v44 = vpop.f32.mrf.mxu2 }
 0x180   : > { %v1918_v0 = vadd.f32 %v1854_v44, %v1556_v45 }
 0x181   : > { %v3450_v35 = vpop.f32.mrf.mxu3 }
 0x182   : > { %1950 = vst.msk [vmem:[%s3372_s29 + $0x58] sm:$0xff] %vm779_vm8, %v1918_v0  ;;  %v1992_v63 = vsel %vm779_vm8, %v1918_v0, 0.0  ;;  %v2051_v53 = vmul.f32 %v1918_v0, %v1918_v0 }
 0x183   : > { %v1993_v23 = vadd.f32 %v1992_v63, %v1991_v51  ;;  %v1305_v13 = vpop.f32.mrf.mxu0 }
 0x184   : > { %v1563_v11 = vpop.f32.mrf.mxu1  ;;  %v2093_v10 = vsel %vm779_vm8, %v2051_v53, 0.0  ;;  %v1559_v6 = vadd.f32 %v1558_v21, %v1305_v13 }
 0x185   : > { %v2094_v27 = vadd.f32 %v2093_v10, %v2092_v4 }
 0x187   : > { %v1857_v34 = vpop.f32.mrf.mxu2 }
 0x188   : > { %v1919_v25 = vadd.f32 %v1857_v34, %v1559_v6 }
 0x189   : > { %v3456_v26 = vpop.f32.mrf.mxu3 }
 0x18a   : > { %1951 = vst.msk [vmem:[%s3372_s29 + $0x60] sm:$0xff] %vm779_vm8, %v1919_v25  ;;  %v1994_v18 = vsel %vm779_vm8, %v1919_v25, 0.0  ;;  %v2052_v33 = vmul.f32 %v1919_v25, %v1919_v25  ;;  %v1596_v25 = vadd.f32 %v3456_v26, %v3404_v19 }
 0x18b   : > { %v3461_v32 = vadd.f32 %v1994_v18, %v1993_v23  ;;  %v1307_v60 = vpop.f32.mrf.mxu0 }
 0x18c   : > { %v2095_v56 = vsel %vm779_vm8, %v2052_v33, 0.0  ;;  %v1565_v3 = vpop.f32.mrf.mxu1  ;;  %v1561_v42 = vadd.f32 %v1560_v48, %v1307_v60 }
 0x18d   : > { %v3464_v61 = vadd.f32 %v2095_v56, %v2094_v27 }
 0x18f   : > { %v1859_v22 = vpop.f32.mrf.mxu2 }
 0x190   : > { %v3466_v12 = vadd.f32 %v1859_v22, %v1561_v42 }
 0x191   : > { %v3468_v7 = vpop.f32.mrf.mxu3 }
 0x192   : > { %1952 = vst.msk [vmem:[%s3372_s29 + $0x68] sm:$0xff] %vm779_vm8, %v3466_v12 }
 0x193   : > { %v1310_v55 = vpop.f32.mrf.mxu0 }
 0x194   : > { %v1564_v46 = vadd.f32 %v1563_v11, %v1310_v55  ;;  %v1568_v15 = vpop.f32.mrf.mxu1  ;;  %v1594_v11 = vadd.f32 %v3450_v35, %v3395_v31  ;;  %v2053_v31 = vmul.f32 %v3466_v12, %v3466_v12 }
 0x196   : > { %v2097_v19 = vsel %vm779_vm8, %v2053_v31, 0.0 }
 0x197   : > { %v1862_v24 = vpop.f32.mrf.mxu2 }
 0x198   : > { %v1921_v2 = vadd.f32 %v1862_v24, %v1564_v46  ;;  %v1599_v46 = vadd.f32 %v3468_v7, %v3411_v29 }
 0x199   : > { %v3473_v43 = vpop.f32.mrf.mxu3 }
 0x19a   : > { %1953 = vst.msk [vmem:[%s3372_s29 + $0x70] sm:$0xff] %vm779_vm8, %v1921_v2  ;;  %v2054_v42 = vmul.f32 %v1921_v2, %v1921_v2  ;;  %v1998_v26 = vsel %vm779_vm8, %v1921_v2, 0.0 }
 0x19b   : > { %v1312_v36 = vpop.f32.mrf.mxu0 }
 0x19c   : > { %v1566_v1 = vadd.f32 %v1565_v3, %v1312_v36  ;;  %v1570_v9 = vpop.f32.mrf.mxu1  ;;  %v1996_v3 = vsel %vm779_vm8, %v3466_v12, 0.0  ;;  %v2099_v36 = vsel %vm779_vm8, %v2054_v42, 0.0 }
 0x19f   : > { %v1864_v50 = vpop.f32.mrf.mxu2 }
 0x1a0   : > { %v1922_v8 = vadd.f32 %v1864_v50, %v1566_v1 }
 0x1a1   : > { %v3477_v14 = vpop.f32.mrf.mxu3 }
 0x1a2   : > { %1954 = vst.msk [vmem:[%s3372_s29 + $0x78] sm:$0xff] %vm779_vm8, %v1922_v8  ;;  %v2055_v22 = vmul.f32 %v1922_v8, %v1922_v8  ;;  %v2000_v12 = vsel %vm779_vm8, %v1922_v8, 0.0 }
 0x1a3   : > { %v1315_v59 = vpop.f32.mrf.mxu0 }
 0x1a4   : > { %v1569_v58 = vadd.f32 %v1568_v15, %v1315_v59  ;;  %v1573_v49 = vpop.f32.mrf.mxu1  ;;  %v1997_v15 = vadd.f32 %v1996_v3, %v3461_v32 }
 0x1a6   : > { %v1999_v59 = vadd.f32 %v1998_v26, %v1997_v15  ;;  %v1604_v15 = vadd.f32 %v3477_v14, %v3426_v37 }
 0x1a7   : > { %v1867_v62 = vpop.f32.mrf.mxu2 }
 0x1a8   : > { %v1923_v21 = vadd.f32 %v1867_v62, %v1569_v58  ;;  %v2101_v58 = vsel %vm779_vm8, %v2055_v22, 0.0  ;;  %v2001_v8 = vadd.f32 %v2000_v12, %v1999_v59 }
 0x1a9   : > { %v3481_v39 = vpop.f32.mrf.mxu3 }
 0x1aa   : > { %1955 = vst.msk [vmem:[%s3372_s29 + $0x80] sm:$0xff] %vm779_vm8, %v1923_v21  ;;  %v2056_v1 = vmul.f32 %v1923_v21, %v1923_v21  ;;  %v2002_v62 = vsel %vm779_vm8, %v1923_v21, 0.0 }
 0x1ab   : > { %v1317_v28 = vpop.f32.mrf.mxu0 }
 0x1ac   : > { %v1571_v38 = vadd.f32 %v1570_v9, %v1317_v28  ;;  %v1575_v47 = vpop.f32.mrf.mxu1  ;;  %v2098_v9 = vadd.f32 %v2097_v19, %v3464_v61 }
 0x1ae   : > { %v2100_v7 = vadd.f32 %v2099_v36, %v2098_v9 }
 0x1af   : > { %v1869_v30 = vpop.f32.mrf.mxu2 }
 0x1b0   : > { %v3487_v52 = vadd.f32 %v1869_v30, %v1571_v38  ;;  %v2103_v38 = vsel %vm779_vm8, %v2056_v1, 0.0  ;;  %v2102_v21 = vadd.f32 %v2101_v58, %v2100_v7 }
 0x1b1   : > { %v1887_v51 = vpop.f32.mrf.mxu3 }
 0x1b2   : > { %1956 = vst.msk [vmem:[%s3372_s29 + $0x88] sm:$0xff] %vm779_vm8, %v3487_v52  ;;  %v3492_v16 = vadd.f32 %v1887_v51, %v1589_v17  ;;  %v2057_v29 = vmul.f32 %v3487_v52, %v3487_v52  ;;  %v2004_v61 = vsel %vm779_vm8, %v3487_v52, 0.0  ;;  %v2003_v17 = vadd.f32 %v2002_v62, %v2001_v8 }
 0x1b3   : > { %v1320_v48 = vpop.f32.mrf.mxu0 }
 0x1b4   : > { %1963 = vst.msk [vmem:[%s3372_s29 + $0xc0] sm:$0xff] %vm779_vm8, %v3492_v16  ;;  %v1574_v4 = vadd.f32 %v1573_v49, %v1320_v48  ;;  %v1578_v23 = vpop.f32.mrf.mxu1  ;;  %v2105_v51 = vsel %vm779_vm8, %v2057_v29, 0.0  ;;  %v2064_v9 = vmul.f32 %v3492_v16, %v3492_v16  ;;  %v2018_v37 = vsel %vm779_vm8, %v3492_v16, 0.0 }
 0x1b5   : > { %v1606_v16 = vadd.f32 %v3481_v39, %v3432_v40 }
 0x1b7   : > { %v1872_v45 = vpop.f32.mrf.mxu2 }
 0x1b8   : > { %v1925_v5 = vadd.f32 %v1872_v45, %v1574_v4  ;;  %v1601_v45 = vadd.f32 %v3473_v43, %v3419_v41 }
 0x1b9   : > { %v1889_v44 = vpop.f32.mrf.mxu3 }
 0x1ba   : > { %1957 = vst.msk [vmem:[%s3372_s29 + $0x90] sm:$0xff] %vm779_vm8, %v1925_v5  ;;  %v3501_v0 = vadd.f32 %v1889_v44, %v1591_v54  ;;  %v2058_v30 = vmul.f32 %v1925_v5, %v1925_v5  ;;  %v2006_v48 = vsel %vm779_vm8, %v1925_v5, 0.0  ;;  %v2104_v54 = vadd.f32 %v2103_v38, %v2102_v21 }
 0x1bb   : > { %v1322_v63 = vpop.f32.mrf.mxu0  ;;  %v2005_v44 = vadd.f32 %v2004_v61, %v2003_v17 }
 0x1bc   : > { %1964 = vst.msk [vmem:[%s3372_s29 + $0xc8] sm:$0xff] %vm779_vm8, %v3501_v0  ;;  %v1576_v53 = vadd.f32 %v1575_v47, %v1322_v63  ;;  %v1580_v33 = vpop.f32.mrf.mxu1  ;;  %v2107_v52 = vsel %vm779_vm8, %v2058_v30, 0.0  ;;  %v2065_v14 = vmul.f32 %v3501_v0, %v3501_v0  ;;  %v2020_v38 = vsel %vm779_vm8, %v3501_v0, 0.0 }
 0x1be   : > { %v2121_v17 = vsel %vm779_vm8, %v2065_v14, 0.0 }
 0x1bf   : > { %v1874_v13 = vpop.f32.mrf.mxu2 }
 0x1c0   : > { %v1926_v10 = vadd.f32 %v1874_v13, %v1576_v53 }
 0x1c1   : > { %v1892_v20 = vpop.f32.mrf.mxu3 }
 0x1c2   : > { %1958 = vst.msk [vmem:[%s3372_s29 + $0x98] sm:$0xff] %vm779_vm8, %v1926_v10  ;;  %v3510_v57 = vadd.f32 %v1892_v20, %v1594_v11  ;;  %v2059_v47 = vmul.f32 %v1926_v10, %v1926_v10  ;;  %v2008_v53 = vsel %vm779_vm8, %v1926_v10, 0.0  ;;  %v2106_v11 = vadd.f32 %v2105_v51, %v2104_v54 }
 0x1c3   : > { %v1325_v27 = vpop.f32.mrf.mxu0  ;;  %v2007_v20 = vadd.f32 %v2006_v48, %v2005_v44 }
 0x1c4   : > { %1965 = vst.msk [vmem:[%s3372_s29 + $0xd0] sm:$0xff] %vm779_vm8, %v3510_v57  ;;  %v1579_v6 = vadd.f32 %v1578_v23, %v1325_v27  ;;  %v1583_v49 = vpop.f32.mrf.mxu1  ;;  %v2109_v5 = vsel %vm779_vm8, %v2059_v47, 0.0  ;;  %v2108_v43 = vadd.f32 %v2107_v52, %v2106_v11  ;;  %v2066_v61 = vmul.f32 %v3510_v57, %v3510_v57 }
 0x1c5   : > { %v2022_v51 = vsel %vm779_vm8, %v3510_v57, 0.0 }
 0x1c7   : > { %v1877_v34 = vpop.f32.mrf.mxu2 }
 0x1c8   : > { %v1927_v18 = vadd.f32 %v1877_v34, %v1579_v6 }
 0x1c9   : > { %v1894_v60 = vpop.f32.mrf.mxu3 }
 0x1ca   : > { %1959 = vst.msk [vmem:[%s3372_s29 + $0xa0] sm:$0xff] %vm779_vm8, %v1927_v18  ;;  %v3521_v35 = vadd.f32 %v1894_v60, %v1596_v25  ;;  %v2060_v23 = vmul.f32 %v1927_v18, %v1927_v18  ;;  %v2010_v6 = vsel %vm779_vm8, %v1927_v18, 0.0  ;;  %v2009_v25 = vadd.f32 %v2008_v53, %v2007_v20 }
 0x1cb   : > { %v1327_v56 = vpop.f32.mrf.mxu0 }
 0x1cc   : > { %1966 = vst.msk [vmem:[%s3372_s29 + $0xd8] sm:$0xff] %vm779_vm8, %v3521_v35  ;;  %v1581_v55 = vadd.f32 %v1580_v33, %v1327_v56  ;;  %v2111_v60 = vsel %vm779_vm8, %v2060_v23, 0.0  ;;  %v2110_v56 = vadd.f32 %v2109_v5, %v2108_v43  ;;  %v2011_v3 = vadd.f32 %v2010_v6, %v2009_v25  ;;  %v1585_v42 = vpop.f32.mrf.mxu1 }
 0x1cd   : > { %v2067_v48 = vmul.f32 %v3521_v35, %v3521_v35  ;;  %v2024_v54 = vsel %vm779_vm8, %v3521_v35, 0.0 }
 0x1ce   : > { %v2112_v22 = vadd.f32 %v2111_v60, %v2110_v56 }
 0x1cf   : > { %v1879_v24 = vpop.f32.mrf.mxu2  ;;  %v2125_v52 = vsel %vm779_vm8, %v2067_v48, 0.0 }
 0x1d0   : > { %v1928_v50 = vadd.f32 %v1879_v24, %v1581_v55 }
 0x1d1   : > { %v1897_v2 = vpop.f32.mrf.mxu3 }
 0x1d2   : > { %1960 = vst.msk [vmem:[%s3372_s29 + $0xa8] sm:$0xff] %vm779_vm8, %v1928_v50  ;;  %v3542_v32 = vadd.f32 %v1897_v2, %v1599_v46  ;;  %v2061_v34 = vmul.f32 %v1928_v50, %v1928_v50  ;;  %v2012_v10 = vsel %vm779_vm8, %v1928_v50, 0.0 }
 0x1d3   : > { %v1330_v28 = vpop.f32.mrf.mxu0  ;;  %v2013_v55 = vadd.f32 %v2012_v10, %v2011_v3 }
 0x1d4   : > { %1967 = vst.msk [vmem:[%s3372_s29 + $0xe0] sm:$0xff] %vm779_vm8, %v3542_v32  ;;  %v1584_v4 = vadd.f32 %v1583_v49, %v1330_v28  ;;  %v2113_v18 = vsel %vm779_vm8, %v2061_v34, 0.0  ;;  %v2119_v28 = vsel %vm779_vm8, %v2064_v9, 0.0  ;;  %v2068_v40 = vmul.f32 %v3542_v32, %v3542_v32 }
 0x1d5   : > { %v2114_v12 = vadd.f32 %v2113_v18, %v2112_v22  ;;  %v2026_v57 = vsel %vm779_vm8, %v3542_v32, 0.0 }
 0x1d6   : > { %v2127_v11 = vsel %vm779_vm8, %v2068_v40, 0.0 }
 0x1d7   : > { %v1882_v63 = vpop.f32.mrf.mxu2 }
 0x1d8   : > { %v1929_v13 = vadd.f32 %v1882_v63, %v1584_v4 }
 0x1d9   : > { %v1899_v27 = vpop.f32.mrf.mxu3 }
 0x1da   : > { %1961 = vst.msk [vmem:[%s3372_s29 + $0xb0] sm:$0xff] %vm779_vm8, %v1929_v13  ;;  %v1936_v41 = vadd.f32 %v1899_v27, %v1601_v45  ;;  %v2062_v31 = vmul.f32 %v1929_v13, %v1929_v13  ;;  %v2014_v19 = vsel %vm779_vm8, %v1929_v13, 0.0  ;;  %v2123_v45 = vsel %vm779_vm8, %v2066_v61, 0.0 }
 0x1db   : > { %v1332_v33 = vpop.f32.mrf.mxu0  ;;  %v2015_v1 = vadd.f32 %v2014_v19, %v2013_v55 }
 0x1dc   : > { %1968 = vst.msk [vmem:[%s3372_s29 + $0xe8] sm:$0xff] %vm779_vm8, %v1936_v41  ;;  %v1586_v26 = vadd.f32 %v1585_v42, %v1332_v33  ;;  %v2115_v24 = vsel %vm779_vm8, %v2062_v31, 0.0  ;;  %v2069_v53 = vmul.f32 %v1936_v41, %v1936_v41  ;;  %v2028_v35 = vsel %vm779_vm8, %v1936_v41, 0.0 }
 0x1dd   : > { %v2116_v62 = vadd.f32 %v2115_v24, %v2114_v12 }
 0x1de   : > { %v2129_v6 = vsel %vm779_vm8, %v2069_v53, 0.0 }
 0x1df   : > { %v1884_v46 = vpop.f32.mrf.mxu2 }
 0x1e0   : > { %v1930_v36 = vadd.f32 %v1884_v46, %v1586_v26 }
 0x1e1   : > { %v1902_v50 = vpop.f32.mrf.mxu3 }
 0x1e2   : > { %1962 = vst.msk [vmem:[%s3372_s29 + $0xb8] sm:$0xff] %vm779_vm8, %v1930_v36  ;;  %v2016_v59 = vsel %vm779_vm8, %v1930_v36, 0.0  ;;  %v2063_v2 = vmul.f32 %v1930_v36, %v1930_v36  ;;  %v1937_v58 = vadd.f32 %v1902_v50, %v1604_v15 }
 0x1e3   : > { %v2017_v29 = vadd.f32 %v2016_v59, %v2015_v1 }
 0x1e4   : > { %v2117_v7 = vsel %vm779_vm8, %v2063_v2, 0.0  ;;  %1969 = vst.msk [vmem:[%s3372_s29 + $0xf0] sm:$0xff] %vm779_vm8, %v1937_v58  ;;  %v2070_v20 = vmul.f32 %v1937_v58, %v1937_v58  ;;  %v2030_v34 = vsel %vm779_vm8, %v1937_v58, 0.0 }
 0x1e5   : > { %v2019_v8 = vadd.f32 %v2018_v37, %v2017_v29  ;;  %v2118_v49 = vadd.f32 %v2117_v7, %v2116_v62 }
 0x1e6   : > { %v2131_v32 = vsel %vm779_vm8, %v2070_v20, 0.0 }
 0x1e7   : > { %v2021_v30 = vadd.f32 %v2020_v38, %v2019_v8  ;;  %v2120_v21 = vadd.f32 %v2119_v28, %v2118_v49 }
 0x1e9   : > { %v2023_v47 = vadd.f32 %v2022_v51, %v2021_v30  ;;  %v2122_v4 = vadd.f32 %v2121_v17, %v2120_v21  ;;  %v1904_v0 = vpop.f32.mrf.mxu3 }
 0x1ea   : > { %v1938_v39 = vadd.f32 %v1904_v0, %v1606_v16 }
 0x1eb   : > { %v2124_v44 = vadd.f32 %v2123_v45, %v2122_v4  ;;  %v2025_v63 = vadd.f32 %v2024_v54, %v2023_v47 }
 0x1ec   : > { %1970 = vst.msk [vmem:[%s3372_s29 + $0xf8] sm:$0xff] %vm779_vm8, %v1938_v39  ;;  %v2071_v43 = vmul.f32 %v1938_v39, %v1938_v39  ;;  %v2032_v60 = vsel %vm779_vm8, %v1938_v39, 0.0 }
 0x1ed   : > { %v2027_v23 = vadd.f32 %v2026_v57, %v2025_v63  ;;  %v2126_v13 = vadd.f32 %v2125_v52, %v2124_v44 }
 0x1ee   : > { %v2133_v56 = vsel %vm779_vm8, %v2071_v43, 0.0 }
 0x1ef   : > { %v2029_v27 = vadd.f32 %v2028_v35, %v2027_v23  ;;  %v2128_v5 = vadd.f32 %v2127_v11, %v2126_v13 }
 0x1f1   : > { %v2031_v25 = vadd.f32 %v2030_v34, %v2029_v27  ;;  %v2130_v33 = vadd.f32 %v2129_v6, %v2128_v5 }
 0x1f3   : > { %v2132_v10 = vadd.f32 %v2131_v32, %v2130_v33  ;;  %v2033_v31 = vadd.f32 %v2032_v60, %v2031_v25 }
 0x1f5   : > { %v2034_v41 = vrot.slane %v2033_v31, 4  ;;  %v2134_v3 = vadd.f32 %v2133_v56, %v2132_v10 }
 0x1f7   : > { %v2035_v42 = vadd.f32 %v2034_v41, %v2033_v31  ;;  %v2135_v18 = vrot.slane %v2134_v3, 4 }
 0x1f9   : > { %v2036_v19 = vrot.slane %v2035_v42, 2  ;;  %v2136_v26 = vadd.f32 %v2135_v18, %v2134_v3 }
 0x1fb   : > { %v2037_v22 = vadd.f32 %v2036_v19, %v2035_v42  ;;  %v2137_v55 = vrot.slane %v2136_v26, 2 }
 0x1fd   : > { %v2038_v46 = vrot.slane %v2037_v22, 1  ;;  %v2138_v15 = vadd.f32 %v2137_v55, %v2136_v26 }
 0x1ff   : > { %v2139_v24 = vrot.slane %v2138_v15, 1  ;;  %v2039_v36 = vadd.f32 %v2038_v46, %v2037_v22 }
 0x201   : > { %v2140_v12 = vadd.f32 %v2139_v24, %v2138_v15 }
 0x203   : > { %v2142_v1 = vsel %vm613_vm5, %v2039_v36, %v2140_v12 }
 0x204   : > { %2144 = vst.msk [vmem:[%s235_s30] sm:$0x3] %vm2143_vm10, %v2142_v1 }
 0x205 PF: > { %s16_s18 = sadd.s32 1, %s2684_s18  }
 0x206   : > { %p13_p4 = scmp.ge.s32.totalorder %s16_s18, 4  }
 0x208   :  { %15 = sbr.rel (!%p13_p4) target bundleno = 1 (0x1), region = 83 }

</bundles_post_ra>
